<compile_context>
chip_gen: v7x
topology: tpu7x:2x2x1
jax: 0.10.0
libtpu: 0.0.40
codegen_flags: <defaults>
</compile_context>

<pallas_src>
import functools

import jax
import jax.numpy as jnp
from jax.experimental import pallas as pl
from jax.experimental.pallas import tpu as pltpu

# ----- model hyperparameters (small, consistent with the module) -----
NCOLS      = 16
NOUTPUT    = 4
NUMNEURONS = 32
NUMLAYERS  = 3

H_PAD = 128     # hidden width zero-padded to a full lane (numerically exact)


def _round_up(x, m):
    return (x + m - 1) // m * m


# ----- packed-parameter layout (every segment starts on an 8-row boundary) --
# params_h: (PH_ROWS, H_PAD)  = w_in | b_in | w_h | b_h   (all lane-padded)
R_W_IN  = 0
R_B_IN  = _round_up(NCOLS, 8)                 # 16
R_W_H   = R_B_IN + 8                          # 24
R_B_H   = R_W_H + H_PAD                       # 152
PH_ROWS = R_B_H + 8                           # 160

# params_o: (PO_ROWS, NOUTPUT) = w_out | b_out   (narrow: 4 lanes, full dim)
R_W_OUT = 0
R_B_OUT = H_PAD                               # 128
PO_ROWS = R_B_OUT + 8                         # 136

_PREC = jax.lax.Precision.HIGHEST             # true-f32 parity with PyTorch


def _mlp_kernel(x_ref, ph_ref, po_ref, o_ref):
    tm = x_ref.shape[0]

    x     = x_ref[...]                                # (tm, NCOLS)
    w_in  = ph_ref[R_W_IN:R_W_IN + NCOLS, :]          # (NCOLS, H_PAD)
    w_h   = ph_ref[R_W_H:R_W_H + H_PAD, :]            # (H_PAD, H_PAD)
    w_out = po_ref[R_W_OUT:R_W_OUT + H_PAD, :]        # (H_PAD, NOUTPUT)

    # Hoist bias broadcasts out of the layer loop (JAX does not CSE them).
    b_in  = jnp.broadcast_to(ph_ref[R_B_IN:R_B_IN + 1, :], (tm, H_PAD))
    b_h   = jnp.broadcast_to(ph_ref[R_B_H:R_B_H + 1, :], (tm, H_PAD))
    b_out = jnp.broadcast_to(po_ref[R_B_OUT:R_B_OUT + 1, :], (tm, NOUTPUT))

    # input layer: Linear(ncols, numneurons) + ReLU (+ dropout = identity)
    h = jnp.maximum(
        jnp.dot(x, w_in, preferred_element_type=jnp.float32,
                precision=_PREC) + b_in, 0.0)

    # NUMLAYERS hidden blocks, all sharing the SAME Linear (as in the module)
    for _ in range(NUMLAYERS):
        h = jnp.maximum(
            jnp.dot(h, w_h, preferred_element_type=jnp.float32,
                    precision=_PREC) + b_h, 0.0)

    # output layer: Linear(numneurons, noutput), no activation.
    # Narrow (bm, NOUTPUT) store: masked vst but 32x less HBM writeback than a
    # lane-padded slab, and no post-slice copy in the wrapper.
    o = jnp.dot(h, w_out, preferred_element_type=jnp.float32,
                precision=_PREC) + b_out
    o_ref[...] = o.astype(o_ref.dtype)


def prepare_params(w_in, b_in, w_h, b_h, w_out, b_out):
    """One-time packing of PyTorch-layout params ((out,in) weights, (out,) biases)
    into two contiguous, lane-padded buffers the kernel keeps resident in VMEM."""
    ph = jnp.zeros((PH_ROWS, H_PAD), jnp.float32)
    ph = ph.at[R_W_IN:R_W_IN + NCOLS, :NUMNEURONS].set(
        jnp.transpose(w_in).astype(jnp.float32))
    ph = ph.at[R_B_IN, :NUMNEURONS].set(b_in.astype(jnp.float32))
    ph = ph.at[R_W_H:R_W_H + NUMNEURONS, :NUMNEURONS].set(
        jnp.transpose(w_h).astype(jnp.float32))
    ph = ph.at[R_B_H, :NUMNEURONS].set(b_h.astype(jnp.float32))

    po = jnp.zeros((PO_ROWS, NOUTPUT), jnp.float32)
    po = po.at[R_W_OUT:R_W_OUT + NUMNEURONS, :].set(
        jnp.transpose(w_out).astype(jnp.float32))
    po = po.at[R_B_OUT, :].set(b_out.astype(jnp.float32))
    return ph, po


@functools.partial(jax.jit, static_argnames=("block_m",))
def mlp_forward(x, params_h, params_o, *, block_m=2048):
    """x: [B, NCOLS] float32 (stack of evaluation points). Returns [B, NOUTPUT]."""
    B = x.shape[0]
    # Keep >= 2 grid blocks whenever B permits (so both v7x TensorCores pick up
    # work) and bound padded-row waste for small/awkward B; cap at block_m.
    bm = max(8, min(block_m, _round_up(pl.cdiv(max(B, 1), 2), 8)))
    b_pad = _round_up(B, bm)
    if b_pad != B:
        x = jnp.pad(x, ((0, b_pad - B), (0, 0)))

    out = pl.pallas_call(
        _mlp_kernel,
        out_shape=jax.ShapeDtypeStruct((b_pad, NOUTPUT), jnp.float32),
        grid=(b_pad // bm,),
        in_specs=[
            pl.BlockSpec((bm, NCOLS), lambda i: (i, 0)),
            # constant block index -> parameters stay resident across the grid
            pl.BlockSpec((PH_ROWS, H_PAD), lambda i: (0, 0)),
            pl.BlockSpec((PO_ROWS, NOUTPUT), lambda i: (0, 0)),
        ],
        out_specs=pl.BlockSpec((bm, NOUTPUT), lambda i: (i, 0)),
        compiler_params=pltpu.CompilerParams(
            dimension_semantics=("parallel",)),
    )(x, params_h, params_o)

    if b_pad != B:
        out = out[:B]
    return out


def _xavier_normal(key, out_dim, in_dim):
    std = (2.0 / (in_dim + out_dim)) ** 0.5
    return std * jax.random.normal(key, (out_dim, in_dim), dtype=jnp.float32)


if __name__ == "__main__":
    BATCH = 256   # stack of evaluation points (MCMC-style) -> grid of 2 blocks

    key = jax.random.PRNGKey(0)
    kx, k1, k2, k3, kb1, kb2, kb3 = jax.random.split(key, 7)

    x = jax.random.normal(kx, (BATCH, NCOLS), dtype=jnp.float32)

    # deterministic parameter init (xavier-normal weights, small normal biases)
    w_in  = _xavier_normal(k1, NUMNEURONS, NCOLS)
    w_h   = _xavier_normal(k2, NUMNEURONS, NUMNEURONS)
    w_out = _xavier_normal(k3, NOUTPUT, NUMNEURONS)
    b_in  = 0.01 * jax.random.normal(kb1, (NUMNEURONS,), dtype=jnp.float32)
    b_h   = 0.01 * jax.random.normal(kb2, (NUMNEURONS,), dtype=jnp.float32)
    b_out = 0.01 * jax.random.normal(kb3, (NOUTPUT,), dtype=jnp.float32)

    # One-time packing (outside the hot path).
    params_h, params_o = prepare_params(w_in, b_in, w_h, b_h, w_out, b_out)
    params_h, params_o = jax.block_until_ready((params_h, params_o))

    out = mlp_forward(x, params_h, params_o)
    out = jax.block_until_ready(out)

    # pure-JAX reference (eval mode: dropout = identity, shared hidden weights)
    prec = jax.lax.Precision.HIGHEST
    h = jnp.maximum(jnp.dot(x, w_in.T, precision=prec) + b_in, 0.0)
    for _ in range(NUMLAYERS):
        h = jnp.maximum(jnp.dot(h, w_h.T, precision=prec) + b_h, 0.0)
    ref = jnp.dot(h, w_out.T, precision=prec) + b_out

    assert out.shape == (BATCH, NOUTPUT)
    assert jnp.allclose(out, ref, atol=1e-5, rtol=1e-5)

    print("KERNEL_OK")
</pallas_src>

<mosaic_0001>
module attributes {stable_mosaic.version = 11 : i64} {
  func.func @_mlp_kernel(%arg0: i32, %arg1: memref<128x16xf32, #tpu.memory_space<vmem>>, %arg2: memref<160x128xf32, #tpu.memory_space<vmem>>, %arg3: memref<136x4xf32, #tpu.memory_space<vmem>>, %arg4: memref<128x4xf32, #tpu.memory_space<vmem>>) attributes {dimension_semantics = [#tpu.dimension_semantics<parallel>], iteration_bounds = array<i64: 2>, scalar_prefetch = 0 : i64, scratch_operands = 0 : i64, tpu.core_type = #tpu.core_type<tc>, window_params = [{transform_indices = @transform_0, window_bounds = array<i64: 128, 16>}, {pipeline_mode = #tpu.pipeline_mode<synchronous>, transform_indices = @transform_1, window_bounds = array<i64: 160, 128>}, {pipeline_mode = #tpu.pipeline_mode<synchronous>, transform_indices = @transform_2, window_bounds = array<i64: 136, 4>}, {transform_indices = @transform_3, window_bounds = array<i64: 128, 4>}]} {
    %c0 = arith.constant 0 : index
    %c0_0 = arith.constant 0 : index
    %0 = vector.load %arg1[%c0, %c0_0] : memref<128x16xf32, #tpu.memory_space<vmem>>, vector<128x16xf32>
    %c0_1 = arith.constant 0 : index
    %c0_2 = arith.constant 0 : index
    %1 = vector.load %arg2[%c0_1, %c0_2] : memref<160x128xf32, #tpu.memory_space<vmem>>, vector<16x128xf32>
    %c24 = arith.constant 24 : index
    %c0_3 = arith.constant 0 : index
    %2 = vector.load %arg2[%c24, %c0_3] : memref<160x128xf32, #tpu.memory_space<vmem>>, vector<128x128xf32>
    %c0_4 = arith.constant 0 : index
    %c0_5 = arith.constant 0 : index
    %3 = vector.load %arg3[%c0_4, %c0_5] : memref<136x4xf32, #tpu.memory_space<vmem>>, vector<128x4xf32>
    %c16 = arith.constant 16 : index
    %c0_6 = arith.constant 0 : index
    %4 = vector.load %arg2[%c16, %c0_6] : memref<160x128xf32, #tpu.memory_space<vmem>>, vector<1x128xf32>
    %5 = vector.shape_cast %4 : vector<1x128xf32> to vector<1x128xf32>
    %6 = vector.broadcast %5 : vector<1x128xf32> to vector<128x128xf32>
    %c152 = arith.constant 152 : index
    %c0_7 = arith.constant 0 : index
    %7 = vector.load %arg2[%c152, %c0_7] : memref<160x128xf32, #tpu.memory_space<vmem>>, vector<1x128xf32>
    %8 = vector.shape_cast %7 : vector<1x128xf32> to vector<1x128xf32>
    %9 = vector.broadcast %8 : vector<1x128xf32> to vector<128x128xf32>
    %c128 = arith.constant 128 : index
    %c0_8 = arith.constant 0 : index
    %10 = vector.load %arg3[%c128, %c0_8] : memref<136x4xf32, #tpu.memory_space<vmem>>, vector<1x4xf32>
    %11 = vector.shape_cast %10 : vector<1x4xf32> to vector<1x4xf32>
    %12 = vector.broadcast %11 : vector<1x4xf32> to vector<128x4xf32>
    %cst = arith.constant dense<0.000000e+00> : vector<128x128xf32>
    %13 = tpu.matmul %0, %1, %cst {dimension_numbers = #tpu.dot_dimension_numbers<[1], [0], [0], [1], [0, 0, 1, 1], [], []>, precision = #tpu.contract_precision<fp32>} : vector<128x16xf32>, vector<16x128xf32>, vector<128x128xf32> -> vector<128x128xf32>
    %14 = arith.addf %13, %6 : vector<128x128xf32>
    %cst_9 = arith.constant 0.000000e+00 : f32
    %15 = vector.broadcast %cst_9 : f32 to vector<128x128xf32>
    %16 = arith.maximumf %14, %15 : vector<128x128xf32>
    %cst_10 = arith.constant dense<0.000000e+00> : vector<128x128xf32>
    %17 = tpu.matmul %16, %2, %cst_10 {dimension_numbers = #tpu.dot_dimension_numbers<[1], [0], [0], [1], [0, 0, 1, 1], [], []>, precision = #tpu.contract_precision<fp32>} : vector<128x128xf32>, vector<128x128xf32>, vector<128x128xf32> -> vector<128x128xf32>
    %18 = arith.addf %17, %9 : vector<128x128xf32>
    %cst_11 = arith.constant 0.000000e+00 : f32
    %19 = vector.broadcast %cst_11 : f32 to vector<128x128xf32>
    %20 = arith.maximumf %18, %19 : vector<128x128xf32>
    %cst_12 = arith.constant dense<0.000000e+00> : vector<128x128xf32>
    %21 = tpu.matmul %20, %2, %cst_12 {dimension_numbers = #tpu.dot_dimension_numbers<[1], [0], [0], [1], [0, 0, 1, 1], [], []>, precision = #tpu.contract_precision<fp32>} : vector<128x128xf32>, vector<128x128xf32>, vector<128x128xf32> -> vector<128x128xf32>
    %22 = arith.addf %21, %9 : vector<128x128xf32>
    %cst_13 = arith.constant 0.000000e+00 : f32
    %23 = vector.broadcast %cst_13 : f32 to vector<128x128xf32>
    %24 = arith.maximumf %22, %23 : vector<128x128xf32>
    %cst_14 = arith.constant dense<0.000000e+00> : vector<128x128xf32>
    %25 = tpu.matmul %24, %2, %cst_14 {dimension_numbers = #tpu.dot_dimension_numbers<[1], [0], [0], [1], [0, 0, 1, 1], [], []>, precision = #tpu.contract_precision<fp32>} : vector<128x128xf32>, vector<128x128xf32>, vector<128x128xf32> -> vector<128x128xf32>
    %26 = arith.addf %25, %9 : vector<128x128xf32>
    %cst_15 = arith.constant 0.000000e+00 : f32
    %27 = vector.broadcast %cst_15 : f32 to vector<128x128xf32>
    %28 = arith.maximumf %26, %27 : vector<128x128xf32>
    %cst_16 = arith.constant dense<0.000000e+00> : vector<128x4xf32>
    %29 = tpu.matmul %28, %3, %cst_16 {dimension_numbers = #tpu.dot_dimension_numbers<[1], [0], [0], [1], [0, 0, 1, 1], [], []>, precision = #tpu.contract_precision<fp32>} : vector<128x128xf32>, vector<128x4xf32>, vector<128x4xf32> -> vector<128x4xf32>
    %30 = arith.addf %29, %12 : vector<128x4xf32>
    %c0_17 = arith.constant 0 : index
    %c0_18 = arith.constant 0 : index
    %31 = vector.load %arg4[%c0_17, %c0_18] : memref<128x4xf32, #tpu.memory_space<vmem>>, vector<128x4xf32>
    tpu.vector_store %arg4[%c0_17, %c0_18], %30 {strides = array<i32>} : memref<128x4xf32, #tpu.memory_space<vmem>>, vector<128x4xf32>,
    return
  }
  func.func @transform_0(%arg0: i32) -> (i32, i32) {
    %c0_i32 = arith.constant 0 : i32
    %c0_i32_0 = arith.constant 0 : i32
    return %arg0, %c0_i32 : i32, i32
  }
  func.func @transform_1(%arg0: i32) -> (i32, i32) {
    %c0_i32 = arith.constant 0 : i32
    %c0_i32_0 = arith.constant 0 : i32
    %c0_i32_1 = arith.constant 0 : i32
    return %c0_i32, %c0_i32_0 : i32, i32
  }
  func.func @transform_2(%arg0: i32) -> (i32, i32) {
    %c0_i32 = arith.constant 0 : i32
    %c0_i32_0 = arith.constant 0 : i32
    %c0_i32_1 = arith.constant 0 : i32
    return %c0_i32, %c0_i32_0 : i32, i32
  }
  func.func @transform_3(%arg0: i32) -> (i32, i32) {
    %c0_i32 = arith.constant 0 : i32
    %c0_i32_0 = arith.constant 0 : i32
    return %arg0, %c0_i32 : i32, i32
  }
}

</mosaic_0001>

<bundles_post_ra>
// kernel: mlp_forward.1
= control target key start
LH: loop header
LB: loop body
LE: loop exit
PB: predicated region body
PF: predicated region fallthrough
CT: control target
= control target key end

     0   :  { %s10384_s12 = smov 0   ;;  %s12668_s0 = inlined_call_operand.vmem [shape: f32[256,16], index: 0, kind: input, shape index: {}]   ;;  %s12669_s1 = inlined_call_operand.vmem [shape: f32[160,128], index: 1, kind: input, shape index: {}]   ;;  %s12670_s2 = inlined_call_operand.vmem [shape: f32[136,4], index: 2, kind: input, shape index: {}]   ;;  %s12671_s3 = inlined_call_operand.vmem [shape: f32[256,4], index: 3, kind: output, shape index: {}]  }
   0x1 LB: > { %s6673_s13 = sadd.s32 4294967295, %s10362_s12   ;;  %p6677_p0 = scmp.ge.s32.totalorder %s10362_s12, 1  ;;  %s10362_s12 = sphi %s10384_s12, %s13_s12  }
   0x2   : > { %p138_p1 = scmp.lt.s32.totalorder %s10362_s12, 3 }
   0x4   : > { %p139_p2 = pnand %p6677_p0, %p138_p1 }
   0x6   : > { %142 = sbr.rel (%p139_p2) target bundleno = 1894 (0x766), region = 32 }
   0xd   : > { %v190_v0 = vld [vmem:[%s12669_s1] sm:$0xff]  ;;  %v191_v1 = vld [vmem:[%s12669_s1 + $0x8] sm:$0xff]  ;;  %s6678_s18 = sshll.u32 %s6673_s13, 4  ;;  %vm239_vm0 = vcmask 130048   ;;  %vm6600_vm1 = vcmask 31744  }
   0xe   : > { %v289_v2 = vand.u32 4294901760, %v190_v0  ;;  %v292_v3 = vand.u32 4294901760, %v191_v1  ;;  %p163_p3 = scmp.lt.s32.totalorder %s6678_s18, 31 }
  0x10   : > { %v10398_v4 = vpack.c.bf16 %v292_v3, %v289_v2  ;;  %s13015_s18 = smov (!%p163_p3, %s6678_s18), 31  ;;  %v517_v5 = vsub.f32 %v190_v0, %v289_v2  ;;  %v524_v6 = vsub.f32 %v191_v1, %v292_v3 }
  0x11   : > { %s6679_s19 = sshll.u32 %s13015_s18, 3 }
  0x12   : > { %9088 = vmatprep.subr.bf16.mxu0 %v10398_v4  ;;  %9076 = vmatprep.subr.bf16.mxu1 %v10398_v4  ;;  %v518_v7 = vand.u32 4294901760, %v517_v5  ;;  %v525_v8 = vand.u32 4294901760, %v524_v6  ;;  %s10411_s22 = scalar_lea.vmem %s12668_s0, %s6679_s19  ;;  %v10423_v21 = vpack.c.bf16 %v524_v6, %v517_v5  ;;  %s12631_s25 = scalar_lea.vmem %s12671_s3, %s6679_s19 }
  0x13   : > { %9090 = vmatpush3.bf16.msra.mxu0 %v10398_v4  ;;  %9078 = vmatpush3.bf16.msra.mxu1 %v10398_v4  ;;  %v174_v9 = vld [vmem:[%s10411_s22] sm:$0xff]  ;;  %v175_v10 = vld [vmem:[%s10411_s22 + $0x8] sm:$0xff]  ;;  %v176_v13 = vld [vmem:[%s10411_s22 + $0x10] sm:$0xff] }
  0x14   : > { %v519_v11 = vsub.f32 %v517_v5, %v518_v7  ;;  %v526_v12 = vsub.f32 %v524_v6, %v525_v8  ;;  %v9091_v14 = vpack.c.bf16 %v525_v8, %v518_v7  ;;  %v241_v15 = vsel %vm239_vm0, %v174_v9, 0  ;;  %v177_v18 = vld [vmem:[%s10411_s22 + $0x18] sm:$0xff]  ;;  %v178_v19 = vld [vmem:[%s10411_s22 + $0x20] sm:$0xff]  ;;  %v179_v20 = vld [vmem:[%s10411_s22 + $0x28] sm:$0xff] }
  0x15   : > { %v244_v16 = vsel %vm239_vm0, %v175_v10, 0  ;;  %v247_v17 = vsel %vm239_vm0, %v176_v13, 0  ;;  %v10425_v22 = vand.u32 4294901760, %v241_v15  ;;  %v180_v26 = vld [vmem:[%s10411_s22 + $0x30] sm:$0xff]  ;;  %v250_v28 = vsel %vm239_vm0, %v177_v18, 0  ;;  %v181_v35 = vld [vmem:[%s10411_s22 + $0x38] sm:$0xff] }
  0x16   : > { %v10427_v23 = vand.u32 4294901760, %v244_v16  ;;  %v520_v24 = vand.u32 4294901760, %v519_v11  ;;  %v527_v25 = vand.u32 4294901760, %v526_v12  ;;  %9092 = vmatprep.subr.bf16.mxu0 %v9091_v14  ;;  %v10430_v27 = vand.u32 4294901760, %v247_v17  ;;  %v182_v56 = vld [vmem:[%s10411_s22 + $0x40] sm:$0xff]  ;;  %v183_v57 = vld [vmem:[%s10411_s22 + $0x48] sm:$0xff] }
  0x17   : > { %v253_v29 = vsel %vm239_vm0, %v178_v19, 0  ;;  %v256_v30 = vsel %vm239_vm0, %v179_v20, 0  ;;  %v10436_v31 = vsub.f32 %v241_v15, %v10425_v22  ;;  %v10441_v34 = vand.u32 4294901760, %v250_v28  ;;  %v184_v2 = vld [vmem:[%s10411_s22 + $0x50] sm:$0xff]  ;;  %v185_v3 = vld [vmem:[%s10411_s22 + $0x58] sm:$0xff]  ;;  %v186_v12 = vld [vmem:[%s10411_s22 + $0x60] sm:$0xff] }
  0x18   : > { %v10439_v32 = vsub.f32 %v244_v16, %v10427_v23  ;;  %v9079_v33 = vpack.c.bf16 %v527_v25, %v520_v24  ;;  %v10445_v36 = vsub.f32 %v247_v17, %v10430_v27  ;;  %v10447_v37 = vand.u32 4294901760, %v253_v29  ;;  %v187_v13 = vld [vmem:[%s10411_s22 + $0x68] sm:$0xff] }
  0x19   : > { %v10449_v38 = vand.u32 4294901760, %v256_v30  ;;  %v259_v39 = vsel %vm239_vm0, %v180_v26, 0  ;;  %v357_v40 = vand.u32 4294901760, %v10436_v31  ;;  %v10455_v42 = vsub.f32 %v250_v28, %v10441_v34 }
  0x1a   : > { %v367_v41 = vand.u32 4294901760, %v10439_v32  ;;  %9080 = vmatprep.subr.bf16.mxu1 %v9079_v33  ;;  %v10457_v43 = vand.u32 4294901760, %v259_v39  ;;  %v377_v44 = vand.u32 4294901760, %v10445_v36  ;;  %v10461_v45 = vsub.f32 %v253_v29, %v10447_v37 }
  0x1b   : > { %v10464_v46 = vsub.f32 %v256_v30, %v10449_v38  ;;  %v262_v47 = vsel %vm239_vm0, %v181_v35, 0  ;;  %7651 = vmatprep.mubr.f32.mxu0 %v357_v40  ;;  %v358_v48 = vsub.f32 %v10436_v31, %v357_v40  ;;  %v387_v50 = vand.u32 4294901760, %v10455_v42 }
  0x1c   : > { %v368_v49 = vsub.f32 %v10439_v32, %v367_v41  ;;  %v10471_v51 = vsub.f32 %v259_v39, %v10457_v43  ;;  %7652 = vmatmul.mubr.f32.vlgmr.msra.gmra.mrb[0].mxu0 %v367_v41  ;;  %v378_v52 = vsub.f32 %v10445_v36, %v377_v44  ;;  %v397_v53 = vand.u32 4294901760, %v10461_v45 }
  0x1d   : > { %v407_v54 = vand.u32 4294901760, %v10464_v46  ;;  %v10476_v55 = vand.u32 4294901760, %v262_v47  ;;  %v359_v58 = vand.u32 4294901760, %v358_v48  ;;  %7654 = vmatprep.mubr.f32.mxu0 %v377_v44  ;;  %9094 = vmatpush3.bf16.msra.mxu0 %v9091_v14  ;;  %v388_v60 = vsub.f32 %v10455_v42, %v387_v50  ;;  %v188_v14 = vld [vmem:[%s10411_s22 + $0x70] sm:$0xff] }
  0x1e   : > { %v369_v59 = vand.u32 4294901760, %v368_v49  ;;  %v417_v61 = vand.u32 4294901760, %v10471_v51  ;;  %v379_v62 = vand.u32 4294901760, %v378_v52  ;;  %v398_v63 = vsub.f32 %v10461_v45, %v397_v53  ;;  %9096 = vmatprep.subr.bf16.mxu0 %v10398_v4 }
  0x1f   : > { %v408_v0 = vsub.f32 %v10464_v46, %v407_v54  ;;  %v10485_v1 = vsub.f32 %v262_v47, %v10476_v55  ;;  %7567 = vmatprep.mubr.f32.mxu1 %v359_v58  ;;  %v389_v5 = vand.u32 4294901760, %v388_v60  ;;  %v265_v6 = vsel %vm239_vm0, %v182_v56, 0 }
  0x20   : > { %v268_v7 = vsel %vm239_vm0, %v183_v57, 0  ;;  %7568 = vmatmul.mubr.f32.vlgmr.msra.gmra.mrb[0].mxu1 %v369_v59  ;;  %7655 = vmatmul.mubr.f32.gmra.mrb[2].mxu0 %v387_v50  ;;  %v399_v8 = vand.u32 4294901760, %v398_v63  ;;  %v418_v10 = vsub.f32 %v10471_v51, %v417_v61  ;;  %v10494_v11 = vand.u32 4294901760, %v265_v6 }
  0x21   : > { %v427_v9 = vand.u32 4294901760, %v10485_v1  ;;  %9082 = vmatpush3.bf16.msra.mxu1 %v9079_v33  ;;  %7570 = vmatprep.mubr.f32.mxu1 %v379_v62  ;;  %v409_v15 = vand.u32 4294901760, %v408_v0  ;;  %v10499_v16 = vand.u32 4294901760, %v268_v7  ;;  %v271_v17 = vsel %vm239_vm0, %v184_v2, 0  ;;  %v189_v33 = vld [vmem:[%s10411_s22 + $0x78] sm:$0xff] }
  0x22   : > { %v274_v18 = vsel %vm239_vm0, %v185_v3, 0  ;;  %7657 = vmatprep.mubr.f32.mxu0 %v397_v53  ;;  %v10504_v19 = vsub.f32 %v265_v6, %v10494_v11  ;;  %v10507_v24 = vand.u32 4294901760, %v271_v17  ;;  %9084 = vmatprep.subr.bf16.mxu1 %v10423_v21  ;;  %v277_v28 = vsel %vm239_vm0, %v186_v12, 0 }
  0x23   : > { %v428_v20 = vsub.f32 %v10485_v1, %v427_v9  ;;  %v10509_v25 = vand.u32 4294901760, %v274_v18  ;;  %v10513_v26 = vsub.f32 %v268_v7, %v10499_v16  ;;  %v280_v29 = vsel %vm239_vm0, %v187_v13, 0 }
  0x24   : > { %v283_v30 = vsel %vm239_vm0, %v188_v14, 0  ;;  %7571 = vmatmul.mubr.f32.gmra.mrb[2].mxu1 %v389_v5  ;;  %7658 = vmatmul.mubr.f32.gmra.mrb[4].mxu0 %v407_v54  ;;  %v419_v35 = vand.u32 4294901760, %v418_v10  ;;  %v437_v39 = vand.u32 4294901760, %v10504_v19  ;;  %v10521_v40 = vsub.f32 %v271_v17, %v10507_v24 }
  0x25   : > { %v10524_v41 = vsub.f32 %v274_v18, %v10509_v25  ;;  %7573 = vmatprep.mubr.f32.mxu1 %v399_v8  ;;  %7660 = vmatprep.mubr.f32.mxu0 %v417_v61  ;;  %v447_v44 = vand.u32 4294901760, %v10513_v26  ;;  %v10527_v47 = vand.u32 4294901760, %v277_v28  ;;  %v10529_v48 = vand.u32 4294901760, %v280_v29 }
  0x26   : > { %v10531_v49 = vand.u32 4294901760, %v283_v30  ;;  %v438_v50 = vsub.f32 %v10504_v19, %v437_v39  ;;  %v457_v52 = vand.u32 4294901760, %v10521_v40  ;;  %v286_v53 = vsel %vm239_vm0, %v189_v33, 0 }
  0x27   : > { %v429_v54 = vand.u32 4294901760, %v428_v20  ;;  %v10537_v56 = vsub.f32 %v277_v28, %v10527_v47  ;;  %v448_v57 = vsub.f32 %v10513_v26, %v447_v44  ;;  %v467_v58 = vand.u32 4294901760, %v10524_v41  ;;  %v10565_v28 = vld [vmem:[%s12669_s1 + $0x18] sm:$0xff] }
  0x28   : > { %7574 = vmatmul.mubr.f32.gmra.mrb[4].mxu1 %v409_v15  ;;  %7661 = vmatmul.mubr.f32.gmra.mrb[6].mxu0 %v427_v9  ;;  %v10542_v59 = vsub.f32 %v280_v29, %v10529_v48  ;;  %v10544_v60 = vand.u32 4294901760, %v286_v53  ;;  %v439_v61 = vand.u32 4294901760, %v438_v50  ;;  %v458_v62 = vsub.f32 %v10521_v40, %v457_v52  ;;  %v10570_v29 = vld [vmem:[%s12669_s1 + $0x20] sm:$0xff] }
  0x29   : > { %7576 = vmatprep.mubr.f32.mxu1 %v419_v35  ;;  %7663 = vmatprep.mubr.f32.mxu0 %v437_v39  ;;  %v477_v63 = vand.u32 4294901760, %v10537_v56  ;;  %v10549_v0 = vsub.f32 %v283_v30, %v10531_v49  ;;  %v449_v2 = vand.u32 4294901760, %v448_v57  ;;  %v468_v3 = vsub.f32 %v10524_v41, %v467_v58 }
  0x2a   : > { %v487_v5 = vand.u32 4294901760, %v10542_v59  ;;  %v10554_v6 = vsub.f32 %v286_v53, %v10544_v60  ;;  %v459_v7 = vand.u32 4294901760, %v458_v62  ;;  %v1409_v33 = vand.u32 4294901760, %v10565_v28  ;;  %v10636_v53 = vld [vmem:[%s12669_s1 + $0x40] sm:$0xff] }
  0x2b   : > { %v478_v8 = vsub.f32 %v10537_v56, %v477_v63  ;;  %v497_v9 = vand.u32 4294901760, %v10549_v0  ;;  %v469_v10 = vand.u32 4294901760, %v468_v3  ;;  %v1412_v35 = vand.u32 4294901760, %v10570_v29 }
  0x2c   : > { %7577 = vmatmul.mubr.f32.gmra.mrb[6].mxu1 %v429_v54  ;;  %7664 = vmatmul.mubr.f32.gmra.mrb[8].mxu0 %v447_v44  ;;  %v488_v12 = vsub.f32 %v10542_v59, %v487_v5  ;;  %v507_v13 = vand.u32 4294901760, %v10554_v6  ;;  %v1424_v57 = vand.u32 4294901760, %v10636_v53 }
  0x2d   : > { %7579 = vmatprep.mubr.f32.mxu1 %v439_v61  ;;  %7666 = vmatprep.mubr.f32.mxu0 %v457_v52  ;;  %v479_v14 = vand.u32 4294901760, %v478_v8  ;;  %v498_v15 = vsub.f32 %v10549_v0, %v497_v9  ;;  %v10582_v39 = vpack.c.bf16 %v1412_v35, %v1409_v33  ;;  %v10631_v52 = vld [vmem:[%s12669_s1 + $0x38] sm:$0xff] }
  0x2e   : > { %v489_v17 = vand.u32 4294901760, %v488_v12  ;;  %v508_v18 = vsub.f32 %v10554_v6, %v507_v13  ;;  %v1421_v54 = vand.u32 4294901760, %v10631_v52 }
  0x2f   : > { %v499_v20 = vand.u32 4294901760, %v498_v15 }
  0x30   : > { %7580 = vmatmul.mubr.f32.gmra.mrb[8].mxu1 %v449_v2  ;;  %7667 = vmatmul.mubr.f32.gmra.mrb[10].mxu0 %v467_v58  ;;  %v509_v30 = vand.u32 4294901760, %v508_v18 }
  0x31   : > { %7582 = vmatprep.mubr.f32.mxu1 %v459_v7  ;;  %7669 = vmatprep.mubr.f32.mxu0 %v477_v63 }
  0x34   : > { %7583 = vmatmul.mubr.f32.gmra.mrb[10].mxu1 %v469_v10  ;;  %7670 = vmatmul.mubr.f32.gmra.mrb[12].mxu0 %v487_v5 }
  0x35   : > { %7585 = vmatprep.mubr.f32.mxu1 %v479_v14  ;;  %7672 = vmatprep.mubr.f32.mxu0 %v497_v9 }
  0x38   : > { %7586 = vmatmul.mubr.f32.gmra.mrb[12].mxu1 %v489_v17  ;;  %7673 = vmatmul.mubr.f32.gmra.mrb[14].mxu0 %v507_v13 }
  0x39   : > { %7588 = vmatprep.mubr.f32.mxu1 %v499_v20  ;;  %7679 = vmatprep.mubr.f32.mxu0 %v10425_v22 }
  0x3c   : > { %7589 = vmatmul.mubr.f32.gmra.mrb[14].mxu1 %v509_v30  ;;  %7680 = vmatmul.mubr.f32.vlgmr.msra.gmra.mrb[0].mxu0 %v10427_v23 }
  0x3d   : > { %7595 = vmatprep.mubr.f32.mxu1 %v10425_v22  ;;  %7682 = vmatprep.mubr.f32.mxu0 %v10430_v27 }
  0x3e   : > { %9098 = vmatpush3.bf16.msra.mxu0 %v10398_v4  ;;  %v10615_v4 = vld [vmem:[%s12669_s1 + $0x28] sm:$0xff] }
  0x3f   : > { %9292 = vmatprep.subr.bf16.mxu0 %v10582_v39  ;;  %v1415_v44 = vand.u32 4294901760, %v10615_v4 }
  0x40   : > { %7596 = vmatmul.mubr.f32.vlgmr.msra.gmra.mrb[0].mxu1 %v10427_v23  ;;  %7683 = vmatmul.mubr.f32.gmra.mrb[2].mxu0 %v10441_v34 }
  0x41   : > { %9086 = vmatpush3.bf16.msra.mxu1 %v10423_v21  ;;  %7598 = vmatprep.mubr.f32.mxu1 %v10430_v27  ;;  %v10620_v21 = vld [vmem:[%s12669_s1 + $0x30] sm:$0xff] }
  0x42   : > { %7685 = vmatprep.mubr.f32.mxu0 %v10447_v37  ;;  %9100 = vmatprep.subr.bf16.mxu1 %v10582_v39  ;;  %v1418_v50 = vand.u32 4294901760, %v10620_v21 }
  0x44   : > { %7599 = vmatmul.mubr.f32.gmra.mrb[2].mxu1 %v10441_v34  ;;  %7686 = vmatmul.mubr.f32.gmra.mrb[4].mxu0 %v10449_v38 }
  0x45   : > { %7601 = vmatprep.mubr.f32.mxu1 %v10447_v37  ;;  %7688 = vmatprep.mubr.f32.mxu0 %v10457_v43 }
  0x48   : > { %7602 = vmatmul.mubr.f32.gmra.mrb[4].mxu1 %v10449_v38  ;;  %7689 = vmatmul.mubr.f32.gmra.mrb[6].mxu0 %v10476_v55 }
  0x49   : > { %7604 = vmatprep.mubr.f32.mxu1 %v10457_v43  ;;  %7691 = vmatprep.mubr.f32.mxu0 %v10494_v11 }
  0x4c   : > { %7605 = vmatmul.mubr.f32.gmra.mrb[6].mxu1 %v10476_v55  ;;  %7692 = vmatmul.mubr.f32.gmra.mrb[8].mxu0 %v10499_v16 }
  0x4d   : > { %7607 = vmatprep.mubr.f32.mxu1 %v10494_v11  ;;  %7694 = vmatprep.mubr.f32.mxu0 %v10507_v24 }
  0x50   : > { %7608 = vmatmul.mubr.f32.gmra.mrb[8].mxu1 %v10499_v16  ;;  %7695 = vmatmul.mubr.f32.gmra.mrb[10].mxu0 %v10509_v25 }
  0x51   : > { %7610 = vmatprep.mubr.f32.mxu1 %v10507_v24  ;;  %7697 = vmatprep.mubr.f32.mxu0 %v10527_v47 }
  0x54   : > { %7611 = vmatmul.mubr.f32.gmra.mrb[10].mxu1 %v10509_v25  ;;  %7698 = vmatmul.mubr.f32.gmra.mrb[12].mxu0 %v10529_v48 }
  0x55   : > { %7613 = vmatprep.mubr.f32.mxu1 %v10527_v47  ;;  %7700 = vmatprep.mubr.f32.mxu0 %v10531_v49 }
  0x58   : > { %7614 = vmatmul.mubr.f32.gmra.mrb[12].mxu1 %v10529_v48  ;;  %7701 = vmatmul.mubr.f32.gmra.mrb[14].mxu0 %v10544_v60 }
  0x59   : > { %7616 = vmatprep.mubr.f32.mxu1 %v10531_v49  ;;  %7707 = vmatprep.mubr.f32.mxu0 %v10425_v22  ;;  %v10646_v22 = vpack.c.bf16 %v1418_v50, %v1415_v44 }
  0x5c   : > { %7617 = vmatmul.mubr.f32.gmra.mrb[14].mxu1 %v10544_v60  ;;  %7708 = vmatmul.mubr.f32.vlgmr.msra.gmra.mrb[0].mxu0 %v10427_v23  ;;  %v10660_v23 = vpack.c.bf16 %v1424_v57, %v1421_v54 }
  0x5d   : > { %7623 = vmatprep.mubr.f32.mxu1 %v10436_v31  ;;  %7710 = vmatprep.mubr.f32.mxu0 %v10430_v27  ;;  %v198_v27 = vld [vmem:[%s12669_s1 + $0x48] sm:$0xff]  ;;  %v199_v31 = vld [vmem:[%s12669_s1 + $0x50] sm:$0xff] }
  0x5e   : > { %9294 = vmatpush3.bf16.msra.mxu0 %v10582_v39 }
  0x5f   : > { %9296 = vmatprep.subr.bf16.mxu0 %v10646_v22 }
  0x60   : > { %7624 = vmatmul.mubr.f32.vlgmr.msra.gmra.mrb[0].mxu1 %v10439_v32  ;;  %7711 = vmatmul.mubr.f32.gmra.mrb[2].mxu0 %v10441_v34  ;;  %v1427_v32 = vand.u32 4294901760, %v198_v27  ;;  %v1430_v34 = vand.u32 4294901760, %v199_v31 }
  0x61   : > { %7626 = vmatprep.mubr.f32.mxu1 %v10445_v36  ;;  %7713 = vmatprep.mubr.f32.mxu0 %v10447_v37  ;;  %v200_v37 = vld [vmem:[%s12669_s1 + $0x58] sm:$0xff] }
  0x62   : > { %9102 = vmatpush3.bf16.msra.mxu1 %v10582_v39  ;;  %9298 = vmatpush3.bf16.msra.mxu0 %v10646_v22  ;;  %v10700_v36 = vpack.c.bf16 %v1430_v34, %v1427_v32  ;;  %v10776_v3 = vsub.f32 %v198_v27, %v1427_v32  ;;  %v10778_v5 = vsub.f32 %v199_v31, %v1430_v34 }
  0x63   : > { %9104 = vmatprep.subr.bf16.mxu1 %v10646_v22  ;;  %9300 = vmatprep.subr.bf16.mxu0 %v10660_v23 }
  0x64   : > { %7627 = vmatmul.mubr.f32.gmra.mrb[2].mxu1 %v10455_v42  ;;  %7714 = vmatmul.mubr.f32.gmra.mrb[4].mxu0 %v10449_v38  ;;  %v201_v38 = vld [vmem:[%s12669_s1 + $0x60] sm:$0xff]  ;;  %v1433_v42 = vand.u32 4294901760, %v200_v37  ;;  %12839 = vst [vmem:[#allocation9_spill] sm:$0xff] %v10776_v3  ;;  %12840 = vst [vmem:[#allocation10_spill] sm:$0xff] %v10778_v5  ;;  %v12680_v7 = vand.u32 4294901760, %v10778_v5 }
  0x65   : > { %7629 = vmatprep.mubr.f32.mxu1 %v10461_v45  ;;  %7716 = vmatprep.mubr.f32.mxu0 %v10457_v43  ;;  %v1436_v43 = vand.u32 4294901760, %v201_v38 }
  0x66   : > { %9106 = vmatpush3.bf16.msra.mxu1 %v10646_v22  ;;  %9302 = vmatpush3.bf16.msra.mxu0 %v10660_v23  ;;  %v1702_v9 = vsub.f32 %v10778_v5, %v12680_v7  ;;  %v10788_v10 = vsub.f32 %v200_v37, %v1433_v42 }
  0x67   : > { %9108 = vmatprep.subr.bf16.mxu1 %v10660_v23  ;;  %9304 = vmatprep.subr.bf16.mxu0 %v10700_v36  ;;  %v10712_v45 = vpack.c.bf16 %v1436_v43, %v1433_v42  ;;  %v10790_v12 = vsub.f32 %v201_v38, %v1436_v43 }
  0x68   : > { %7630 = vmatmul.mubr.f32.gmra.mrb[4].mxu1 %v10464_v46  ;;  %7717 = vmatmul.mubr.f32.gmra.mrb[6].mxu0 %v10476_v55  ;;  %v202_v46 = vld [vmem:[%s12669_s1 + $0x68] sm:$0xff]  ;;  %12841 = vst [vmem:[#allocation11_spill] sm:$0xff] %v10788_v10  ;;  %v1703_v14 = vand.u32 4294901760, %v1702_v9  ;;  %v12679_v15 = vand.u32 4294901760, %v10788_v10 }
  0x69   : > { %7632 = vmatprep.mubr.f32.mxu1 %v10471_v51  ;;  %7719 = vmatprep.mubr.f32.mxu0 %v10494_v11  ;;  %12832 = vst [vmem:[#allocation2_spill] sm:$0xff] %v10712_v45  ;;  %v203_v51 = vld [vmem:[%s12669_s1 + $0x70] sm:$0xff]  ;;  %v1439_v55 = vand.u32 4294901760, %v202_v46  ;;  %12842 = vst [vmem:[#allocation12_spill] sm:$0xff] %v10790_v12  ;;  %v12678_v17 = vand.u32 4294901760, %v10790_v12 }
  0x6a   : > { %9110 = vmatpush3.bf16.msra.mxu1 %v10660_v23  ;;  %9306 = vmatpush3.bf16.msra.mxu0 %v10700_v36  ;;  %v1709_v20 = vsub.f32 %v10788_v10, %v12679_v15 }
  0x6b   : > { %9112 = vmatprep.subr.bf16.mxu1 %v10700_v36  ;;  %9308 = vmatprep.subr.bf16.mxu0 %v10712_v45  ;;  %v1716_v30 = vsub.f32 %v10790_v12, %v12678_v17 }
  0x6c   : > { %7633 = vmatmul.mubr.f32.gmra.mrb[6].mxu1 %v10485_v1  ;;  %7720 = vmatmul.mubr.f32.gmra.mrb[8].mxu0 %v10499_v16  ;;  %v1442_v1 = vand.u32 4294901760, %v203_v51  ;;  %v204_v16 = vld [vmem:[%s12669_s1 + $0x78] sm:$0xff] }
  0x6d   : > { %7635 = vmatprep.mubr.f32.mxu1 %v10504_v19  ;;  %7722 = vmatprep.mubr.f32.mxu0 %v10507_v24  ;;  %v205_v19 = vld [vmem:[%s12669_s1 + $0x80] sm:$0xff]  ;;  %v1445_v24 = vand.u32 4294901760, %v204_v16  ;;  %v1717_v31 = vand.u32 4294901760, %v1716_v30 }
  0x6e   : > { %9114 = vmatpush3.bf16.msra.mxu1 %v10700_v36  ;;  %9310 = vmatpush3.bf16.msra.mxu0 %v10712_v45  ;;  %v10724_v11 = vpack.c.bf16 %v1442_v1, %v1439_v55 }
  0x6f   : > { %9116 = vmatprep.subr.bf16.mxu1 %v10712_v45  ;;  %v10814_v37 = vsub.f32 %v204_v16, %v1445_v24 }
  0x70   : > { %7636 = vmatmul.mubr.f32.gmra.mrb[8].mxu1 %v10513_v26  ;;  %7723 = vmatmul.mubr.f32.gmra.mrb[10].mxu0 %v10509_v25  ;;  %12833 = vst [vmem:[#allocation3_spill] sm:$0xff] %v10724_v11  ;;  %v1448_v25 = vand.u32 4294901760, %v205_v19 }
  0x71   : > { %7638 = vmatprep.mubr.f32.mxu1 %v10521_v40  ;;  %7725 = vmatprep.mubr.f32.mxu0 %v10527_v47  ;;  %v10741_v40 = vsub.f32 %v10565_v28, %v1409_v33  ;;  %v206_v47 = vld [vmem:[%s12669_s1 + $0x88] sm:$0xff]  ;;  %v10799_v28 = vsub.f32 %v202_v46, %v1439_v55  ;;  %v1710_v33 = vand.u32 4294901760, %v1709_v20  ;;  %12846 = vst [vmem:[#allocation16_spill] sm:$0xff] %v10814_v37 }
  0x72   : > { %9118 = vmatpush3.bf16.msra.mxu1 %v10712_v45  ;;  %9312 = vmatprep.subr.bf16.mxu0 %v10724_v11  ;;  %v10736_v26 = vpack.c.bf16 %v1448_v25, %v1445_v24  ;;  %v10816_v38 = vsub.f32 %v205_v19, %v1448_v25  ;;  %v10856_v20 = vpack.c.bf16 %v10790_v12, %v10788_v10 }
  0x73   : > { %9120 = vmatprep.subr.bf16.mxu1 %v10724_v11  ;;  %9314 = vmatpush3.bf16.msra.mxu0 %v10724_v11  ;;  %12835 = vst [vmem:[#allocation5_spill] sm:$0xff] %v10741_v40  ;;  %v12687_v58 = vand.u32 4294901760, %v10741_v40  ;;  %12844 = vst [vmem:[#allocation14_spill] sm:$0xff] %v10799_v28  ;;  %v10818_v42 = vpack.c.bf16 %v1717_v31, %v1710_v33 }
  0x74   : > { %7639 = vmatmul.mubr.f32.gmra.mrb[10].mxu1 %v10524_v41  ;;  %7726 = vmatmul.mubr.f32.gmra.mrb[12].mxu0 %v10529_v48  ;;  %12834 = vst [vmem:[#allocation4_spill] sm:$0xff] %v10736_v26  ;;  %v10746_v41 = vsub.f32 %v10570_v29, %v1412_v35  ;;  %v207_v48 = vld [vmem:[%s12669_s1 + $0x90] sm:$0xff]  ;;  %v10801_v29 = vsub.f32 %v203_v51, %v1442_v1  ;;  %v12677_v35 = vand.u32 4294901760, %v10799_v28  ;;  %12847 = vst [vmem:[#allocation17_spill] sm:$0xff] %v10816_v38 }
  0x75   : > { %7641 = vmatprep.mubr.f32.mxu1 %v10537_v56  ;;  %7728 = vmatprep.mubr.f32.mxu0 %v10531_v49  ;;  %v1451_v49 = vand.u32 4294901760, %v206_v47  ;;  %v1454_v56 = vand.u32 4294901760, %v207_v48  ;;  %v1653_v61 = vsub.f32 %v10741_v40, %v12687_v58  ;;  %12848 = vst [vmem:[#allocation18_spill] sm:$0xff] %v10818_v42  ;;  %v12675_v51 = vand.u32 4294901760, %v10814_v37 }
  0x76   : > { %9122 = vmatpush3.bf16.msra.mxu1 %v10724_v11  ;;  %12836 = vst [vmem:[#allocation6_spill] sm:$0xff] %v10746_v41  ;;  %9316 = vmatprep.subr.bf16.mxu0 %v10736_v26  ;;  %12845 = vst [vmem:[#allocation15_spill] sm:$0xff] %v10801_v29  ;;  %v12676_v27 = vand.u32 4294901760, %v10801_v29  ;;  %v1723_v32 = vsub.f32 %v10799_v28, %v12677_v35  ;;  %v12674_v55 = vand.u32 4294901760, %v10816_v38 }
  0x77   : > { %9124 = vmatprep.subr.bf16.mxu1 %v10736_v26  ;;  %9318 = vmatpush3.bf16.msra.mxu0 %v10736_v26  ;;  %v1654_v63 = vand.u32 4294901760, %v1653_v61  ;;  %v1737_v61 = vsub.f32 %v10814_v37, %v12675_v51  ;;  %v10830_v19 = vsub.f32 %v206_v47, %v1451_v49  ;;  %v10832_v24 = vsub.f32 %v207_v48, %v1454_v56 }
  0x78   : > { %7642 = vmatmul.mubr.f32.gmra.mrb[12].mxu1 %v10542_v59  ;;  %7729 = vmatmul.mubr.f32.gmra.mrb[14].mxu0 %v10544_v60  ;;  %v12685_v59 = vand.u32 4294901760, %v10746_v41  ;;  %v10760_v60 = vpack.c.bf16 %v1454_v56, %v1451_v49  ;;  %v1730_v34 = vsub.f32 %v10801_v29, %v12676_v27  ;;  %v1724_v43 = vand.u32 4294901760, %v1723_v32 }
  0x79   : > { %7644 = vmatprep.mubr.f32.mxu1 %v10549_v0  ;;  %v1744_v16 = vsub.f32 %v10816_v38, %v12674_v55  ;;  %12849 = vst [vmem:[#allocation19_spill] sm:$0xff] %v10830_v19  ;;  %12850 = vst [vmem:[#allocation20_spill] sm:$0xff] %v10832_v24  ;;  %v1738_v25 = vand.u32 4294901760, %v1737_v61  ;;  %v10848_v56 = vpack.c.bf16 %v10746_v41, %v10741_v40 }
  0x7a   : > { %9126 = vmatpush3.bf16.msra.mxu1 %v10736_v26  ;;  %12837 = vst [vmem:[#allocation7_spill] sm:$0xff] %v10760_v60  ;;  %v1660_v62 = vsub.f32 %v10746_v41, %v12685_v59  ;;  %9320 = vmatprep.subr.bf16.mxu0 %v10760_v60  ;;  %v1731_v46 = vand.u32 4294901760, %v1730_v34  ;;  %v10860_v30 = vpack.c.bf16 %v10801_v29, %v10799_v28 }
  0x7b   : > { %9128 = vmatprep.subr.bf16.mxu1 %v10760_v60  ;;  %9322 = vmatpush3.bf16.msra.mxu0 %v10760_v60  ;;  %v10864_v33 = vpack.c.bf16 %v10816_v38, %v10814_v37  ;;  %v10868_v31 = vpack.c.bf16 %v10832_v24, %v10830_v19  ;;  %v10873_v32 = vsub.f32 %v10615_v4, %v1415_v44  ;;  %v10893_v4 = vld [vmem:[%s12669_s1 + $0x10] ss:$0 sm:$0xff] }
  0x7c   : > { %7645 = vmatmul.mubr.f32.gmra.mrb[14].mxu1 %v10554_v6  ;;  %v1661_v0 = vand.u32 4294901760, %v1660_v62  ;;  %v12681_v6 = vand.u32 4294901760, %v10776_v3  ;;  %v10822_v1 = vpack.c.bf16 %v1731_v46, %v1724_v43  ;;  %v1745_v62 = vand.u32 4294901760, %v1744_v16  ;;  %12851 = vst [vmem:[#allocation21_spill] sm:$0xff] %v10860_v30 }
  0x7d   : > { %12852 = vst [vmem:[#allocation22_spill] sm:$0xff] %v10864_v33  ;;  %12853 = vst [vmem:[#allocation23_spill] sm:$0xff] %v10868_v31  ;;  %v10878_v34 = vsub.f32 %v10620_v21, %v1418_v50  ;;  %v10883_v46 = vsub.f32 %v10631_v52, %v1421_v54  ;;  %v10888_v61 = vsub.f32 %v10636_v53, %v1424_v57  ;;  %v12684_v21 = vand.u32 4294901760, %v10873_v32 }
  0x7e   : > { %9130 = vmatpush3.bf16.msra.mxu1 %v10760_v60  ;;  %v10772_v2 = vpack.c.bf16 %v1661_v0, %v1654_v63  ;;  %v1695_v8 = vsub.f32 %v10776_v3, %v12681_v6  ;;  %v12673_v63 = vand.u32 4294901760, %v10830_v19  ;;  %v12672_v0 = vand.u32 4294901760, %v10832_v24 }
  0x7f   : > { %v12683_v44 = vand.u32 4294901760, %v10878_v34  ;;  %v12682_v52 = vand.u32 4294901760, %v10883_v46  ;;  %v12686_v54 = vand.u32 4294901760, %v10888_v61 }
  0x80   : > { %12838 = vst [vmem:[#allocation8_spill] sm:$0xff] %v10772_v2  ;;  %9132 = vmatprep.subr.bf16.mxu1 %v10772_v2  ;;  %9324 = vmatprep.subr.bf16.mxu0 %v10772_v2  ;;  %v1696_v13 = vand.u32 4294901760, %v1695_v8  ;;  %v10836_v8 = vpack.c.bf16 %v1745_v62, %v1738_v25  ;;  %v1751_v9 = vsub.f32 %v10830_v19, %v12673_v63 }
  0x82   : > { %v10794_v18 = vpack.c.bf16 %v1703_v14, %v1696_v13  ;;  %v1758_v13 = vsub.f32 %v10832_v24, %v12672_v0  ;;  %v1752_v47 = vand.u32 4294901760, %v1751_v9  ;;  %v10852_v14 = vpack.c.bf16 %v10778_v5, %v10776_v3 }
  0x84   : > { %12843 = vst [vmem:[#allocation13_spill] sm:$0xff] %v10794_v18  ;;  %v1759_v49 = vand.u32 4294901760, %v1758_v13 }
  0x86   : > { %v10844_v48 = vpack.c.bf16 %v1759_v49, %v1752_v47  ;;  %v1667_v47 = vsub.f32 %v10873_v32, %v12684_v21  ;;  %v1674_v49 = vsub.f32 %v10878_v34, %v12683_v44 }
  0x88   : > { %v1675_v7 = vand.u32 4294901760, %v1674_v49 }
 0x12f   : > { %v7709_v43 = vpop.f32.mrb[0].mxu0 }
 0x130   : > { %v1298_v16 = vpop.f32.mrb[1].mxu0 }
 0x133   : > { %v7625_v50 = vpop.f32.mrb[0].mxu1  ;;  %v7712_v25 = vpop.f32.mrb[2].mxu0 }
 0x134   : > { %v9867_v62 = vadd.f32 %v7625_v50, %v10893_v4  ;;  %v758_v53 = vpop.f32.mrb[1].mxu1  ;;  %v1310_v57 = vpop.f32.mrb[3].mxu0  ;;  %v1681_v50 = vsub.f32 %v10883_v46, %v12682_v52 }
 0x135   : > { %v9869_v9 = vadd.f32 %v10893_v4, %v758_v53  ;;  %v1688_v53 = vsub.f32 %v10888_v61, %v12686_v54 }
 0x136   : > { %v9868_v13 = vadd.f32 %v9867_v62, %v7709_v43  ;;  %v1682_v59 = vand.u32 4294901760, %v1681_v50 }
 0x137   : > { %v9870_v0 = vadd.f32 %v9869_v9, %v1298_v16  ;;  %v7628_v63 = vpop.f32.mrb[2].mxu1  ;;  %v7715_v55 = vpop.f32.mrb[4].mxu0  ;;  %v1668_v9 = vand.u32 4294901760, %v1667_v47  ;;  %v1689_v54 = vand.u32 4294901760, %v1688_v53 }
 0x138   : > { %v1393_v43 = vmax.f32 %v9868_v13, 0.0  ;;  %v9871_v62 = vadd.f32 %v7628_v63, %v10893_v4  ;;  %v772_v51 = vpop.f32.mrb[3].mxu1  ;;  %v1322_v27 = vpop.f32.mrb[5].mxu0 }
 0x139   : > { %v1392_v35 = vmax.f32 %v9870_v0, 0.0  ;;  %v9873_v17 = vadd.f32 %v10893_v4, %v772_v51  ;;  %v10930_v50 = vpack.c.bf16 %v1675_v7, %v1668_v9  ;;  %v10935_v19 = vpack.c.bf16 %v1689_v54, %v1682_v59 }
 0x13a   : > { %v10915_v15 = vand.u32 4294901760, %v1393_v43  ;;  %v9872_v16 = vadd.f32 %v9871_v62, %v7712_v25 }
 0x13b   : > { %v10917_v6 = vand.u32 4294901760, %v1392_v35  ;;  %v9874_v52 = vadd.f32 %v9873_v17, %v1310_v57  ;;  %v7631_v44 = vpop.f32.mrb[4].mxu1  ;;  %v7718_v21 = vpop.f32.mrb[6].mxu0  ;;  %12854 = vst [vmem:[#allocation24_spill] sm:$0xff] %v10930_v50  ;;  %12855 = vst [vmem:[#allocation25_spill] sm:$0xff] %v10935_v19 }
 0x13c   : > { %v10920_v13 = vsub.f32 %v1393_v43, %v10915_v15  ;;  %v1395_v63 = vmax.f32 %v9872_v16, 0.0  ;;  %v9875_v0 = vadd.f32 %v7631_v44, %v10893_v4  ;;  %v786_v58 = vpop.f32.mrb[5].mxu1  ;;  %v1334_v51 = vpop.f32.mrb[7].mxu0 }
 0x13d   : > { %v10924_v24 = vsub.f32 %v1392_v35, %v10917_v6  ;;  %v1394_v25 = vmax.f32 %v9874_v52, 0.0  ;;  %v9877_v47 = vadd.f32 %v10893_v4, %v786_v58 }
 0x13e   : > { %v12690_v17 = vand.u32 4294901760, %v10920_v13  ;;  %v10928_v57 = vand.u32 4294901760, %v1395_v63  ;;  %v9876_v49 = vadd.f32 %v9875_v0, %v7715_v55 }
 0x13f   : > { %v10932_v53 = vand.u32 4294901760, %v1394_v25  ;;  %v9878_v43 = vadd.f32 %v9877_v47, %v1322_v27  ;;  %v7634_v62 = vpop.f32.mrb[6].mxu1  ;;  %v7721_v44 = vpop.f32.mrb[8].mxu0  ;;  %v12695_v16 = vand.u32 4294901760, %v10924_v24 }
 0x140   : > { %v1502_v58 = vsub.f32 %v10920_v13, %v12690_v17  ;;  %v10941_v35 = vsub.f32 %v1395_v63, %v10928_v57  ;;  %v1397_v52 = vmax.f32 %v9876_v49, 0.0  ;;  %v9879_v7 = vadd.f32 %v7634_v62, %v10893_v4  ;;  %v800_v55 = vpop.f32.mrb[7].mxu1  ;;  %v1346_v9 = vpop.f32.mrb[9].mxu0 }
 0x141   : > { %v10945_v27 = vsub.f32 %v1394_v25, %v10932_v53  ;;  %v1396_v0 = vmax.f32 %v9878_v43, 0.0  ;;  %v9881_v47 = vadd.f32 %v10893_v4, %v800_v55  ;;  %v1492_v59 = vsub.f32 %v10924_v24, %v12695_v16 }
 0x142   : > { %v1503_v54 = vand.u32 4294901760, %v1502_v58  ;;  %v10951_v17 = vand.u32 4294901760, %v1397_v52  ;;  %v9880_v63 = vadd.f32 %v9879_v7, %v7718_v21  ;;  %v12699_v49 = vand.u32 4294901760, %v10941_v35 }
 0x143   : > { %v10954_v38 = vand.u32 4294901760, %v1396_v0  ;;  %v9882_v62 = vadd.f32 %v9881_v47, %v1334_v51  ;;  %v7637_v37 = vpop.f32.mrb[8].mxu1  ;;  %v7724_v29 = vpop.f32.mrb[10].mxu0  ;;  %v1493_v25 = vand.u32 4294901760, %v1492_v59  ;;  %v12701_v43 = vand.u32 4294901760, %v10945_v27 }
 0x144   : > { %v10958_v55 = vsub.f32 %v1397_v52, %v10951_v17  ;;  %v1399_v28 = vmax.f32 %v9880_v63, 0.0  ;;  %v9883_v16 = vadd.f32 %v7637_v37, %v10893_v4  ;;  %v814_v58 = vpop.f32.mrb[9].mxu1  ;;  %v1358_v12 = vpop.f32.mrb[11].mxu0  ;;  %v1522_v21 = vsub.f32 %v10941_v35, %v12699_v49 }
 0x145   : > { %v10965_v7 = vsub.f32 %v1396_v0, %v10954_v38  ;;  %v1398_v51 = vmax.f32 %v9882_v62, 0.0  ;;  %v9885_v47 = vadd.f32 %v10893_v4, %v814_v58  ;;  %7763 = vmatprep.mubr.f32.mxu1 %v1493_v25  ;;  %v1512_v52 = vsub.f32 %v10945_v27, %v12701_v43 }
 0x146   : > { %v10971_v59 = vand.u32 4294901760, %v1399_v28  ;;  %v9884_v37 = vadd.f32 %v9883_v16, %v7721_v44  ;;  %7764 = vmatmul.mubr.f32.vlgmr.msra.gmra.mrb[16].mxu1 %v1503_v54  ;;  %v1523_v63 = vand.u32 4294901760, %v1522_v21  ;;  %v12706_v10 = vand.u32 4294901760, %v10958_v55 }
 0x147   : > { %v10974_v5 = vand.u32 4294901760, %v1398_v51  ;;  %v9886_v49 = vadd.f32 %v9885_v47, %v1346_v9  ;;  %9134 = vmatpush3.bf16.msra.mxu1 %v10772_v2  ;;  %v7640_v0 = vpop.f32.mrb[10].mxu1  ;;  %v7727_v62 = vpop.f32.mrb[12].mxu0  ;;  %v1513_v58 = vand.u32 4294901760, %v1512_v52  ;;  %v12709_v25 = vand.u32 4294901760, %v10965_v7 }
 0x148   : > { %v10979_v3 = vsub.f32 %v1399_v28, %v10971_v59  ;;  %v1401_v43 = vmax.f32 %v9884_v37, 0.0  ;;  %v9887_v44 = vadd.f32 %v7640_v0, %v10893_v4  ;;  %v828_v16 = vpop.f32.mrb[11].mxu1  ;;  %v1370_v54 = vpop.f32.mrb[13].mxu0  ;;  %9136 = vmatprep.subr.bf16.mxu1 %v10930_v50  ;;  %v1542_v9 = vsub.f32 %v10958_v55, %v12706_v10 }
 0x149   : > { %v10987_v21 = vsub.f32 %v1398_v51, %v10974_v5  ;;  %v1400_v47 = vmax.f32 %v9886_v49, 0.0  ;;  %v9889_v52 = vadd.f32 %v10893_v4, %v828_v16  ;;  %7766 = vmatprep.mubr.f32.mxu1 %v1513_v58  ;;  %v1532_v28 = vsub.f32 %v10965_v7, %v12709_v25 }
 0x14a   : > { %v10993_v37 = vand.u32 4294901760, %v1401_v43  ;;  %v9888_v0 = vadd.f32 %v9887_v44, %v7724_v29  ;;  %7767 = vmatmul.mubr.f32.gmra.mrb[18].mxu1 %v1523_v63  ;;  %v1543_v2 = vand.u32 4294901760, %v1542_v9  ;;  %v12716_v41 = vand.u32 4294901760, %v10979_v3 }
 0x14b   : > { %v10996_v40 = vand.u32 4294901760, %v1400_v47  ;;  %v9890_v10 = vadd.f32 %v9889_v52, %v1358_v12  ;;  %9138 = vmatpush3.bf16.msra.mxu1 %v10930_v50  ;;  %v7643_v49 = vpop.f32.mrb[12].mxu1  ;;  %v7730_v51 = vpop.f32.mrb[14].mxu0  ;;  %v1533_v16 = vand.u32 4294901760, %v1532_v28  ;;  %v12717_v58 = vand.u32 4294901760, %v10987_v21 }
 0x14c   : > { %v11001_v60 = vsub.f32 %v1401_v43, %v10993_v37  ;;  %v1403_v25 = vmax.f32 %v9888_v0, 0.0  ;;  %v9891_v29 = vadd.f32 %v7643_v49, %v10893_v4  ;;  %v842_v63 = vpop.f32.mrb[13].mxu1  ;;  %v1382_v44 = vpop.f32.mrb[15].mxu0  ;;  %9140 = vmatprep.subr.bf16.mxu1 %v10935_v19  ;;  %v1562_v12 = vsub.f32 %v10979_v3, %v12716_v41 }
 0x14d   : > { %v11009_v9 = vsub.f32 %v1400_v47, %v10996_v40  ;;  %v1402_v52 = vmax.f32 %v9890_v10, 0.0  ;;  %v9893_v28 = vadd.f32 %v10893_v4, %v842_v63  ;;  %7769 = vmatprep.mubr.f32.mxu1 %v1533_v16  ;;  %v1552_v43 = vsub.f32 %v10987_v21, %v12717_v58 }
 0x14e   : > { %v11015_v0 = vand.u32 4294901760, %v1403_v25  ;;  %v9892_v49 = vadd.f32 %v9891_v29, %v7727_v62  ;;  %7770 = vmatmul.mubr.f32.gmra.mrb[20].mxu1 %v1543_v2  ;;  %v1563_v50 = vand.u32 4294901760, %v1562_v12  ;;  %v12720_v26 = vand.u32 4294901760, %v11001_v60 }
 0x14f   : > { %v11018_v11 = vand.u32 4294901760, %v1402_v52  ;;  %v9894_v41 = vadd.f32 %v9893_v28, %v1370_v54  ;;  %9142 = vmatpush3.bf16.msra.mxu1 %v10935_v19  ;;  %v7646_v10 = vpop.f32.mrb[14].mxu1  ;;  %v1553_v47 = vand.u32 4294901760, %v1552_v43  ;;  %v12727_v16 = vand.u32 4294901760, %v11009_v9 }
 0x150   : > { %v11023_v63 = vsub.f32 %v1403_v25, %v11015_v0  ;;  %v1405_v58 = vmax.f32 %v9892_v49, 0.0  ;;  %v9895_v45 = vadd.f32 %v7646_v10, %v10893_v4  ;;  %v856_v62 = vpop.f32.mrb[15].mxu1  ;;  %9144 = vmatprep.subr.bf16.mxu1 %v10794_v18  ;;  %v1582_v2 = vsub.f32 %v11001_v60, %v12720_v26 }
 0x151   : > { %v11031_v54 = vsub.f32 %v1402_v52, %v11018_v11  ;;  %v1404_v29 = vmax.f32 %v9894_v41, 0.0  ;;  %v9897_v12 = vadd.f32 %v10893_v4, %v856_v62  ;;  %7772 = vmatprep.mubr.f32.mxu1 %v1553_v47  ;;  %v1572_v25 = vsub.f32 %v11009_v9, %v12727_v16 }
 0x152   : > { %v11037_v28 = vand.u32 4294901760, %v1405_v58  ;;  %v9896_v43 = vadd.f32 %v9895_v45, %v7730_v51  ;;  %7773 = vmatmul.mubr.f32.gmra.mrb[22].mxu1 %v1563_v50  ;;  %v12721_v49 = vand.u32 4294901760, %v11023_v63  ;;  %v1583_v62 = vand.u32 4294901760, %v1582_v2 }
 0x153   : > { %v11040_v10 = vand.u32 4294901760, %v1404_v29  ;;  %v9898_v26 = vadd.f32 %v9897_v12, %v1382_v44  ;;  %9146 = vmatpush3.bf16.msra.mxu1 %v10794_v18  ;;  %v1573_v52 = vand.u32 4294901760, %v1572_v25  ;;  %v12722_v41 = vand.u32 4294901760, %v11031_v54 }
 0x154   : > { %v11045_v4 = vsub.f32 %v1405_v58, %v11037_v28  ;;  %v1407_v47 = vmax.f32 %v9896_v43, 0.0  ;;  %9148 = vmatprep.subr.bf16.mxu1 %v10818_v42  ;;  %v1602_v45 = vsub.f32 %v11023_v63, %v12721_v49  ;;  %v12864_v16 = vand.u32 4294901760, %v10924_v24 }
 0x155   : > { %v11052_v50 = vsub.f32 %v1404_v29, %v11040_v10  ;;  %v1406_v51 = vmax.f32 %v9898_v26, 0.0  ;;  %7775 = vmatprep.mubr.f32.mxu1 %v1573_v52  ;;  %v1592_v44 = vsub.f32 %v11031_v54, %v12722_v41 }
 0x156   : > { %v11057_v12 = vand.u32 4294901760, %v1407_v47  ;;  %7776 = vmatmul.mubr.f32.gmra.mrb[24].mxu1 %v1583_v62  ;;  %v12725_v58 = vand.u32 4294901760, %v11045_v4  ;;  %v1603_v26 = vand.u32 4294901760, %v1602_v45 }
 0x157   : > { %v11060_v25 = vand.u32 4294901760, %v1406_v51  ;;  %9150 = vmatpush3.bf16.msra.mxu1 %v10818_v42  ;;  %v1593_v2 = vand.u32 4294901760, %v1592_v44  ;;  %v12726_v43 = vand.u32 4294901760, %v11052_v50 }
 0x158   : > { %v11065_v29 = vsub.f32 %v1407_v47, %v11057_v12  ;;  %9152 = vmatprep.subr.bf16.mxu1 %v10822_v1  ;;  %v1622_v52 = vsub.f32 %v11045_v4, %v12725_v58 }
 0x159   : > { %v11072_v62 = vsub.f32 %v1406_v51, %v11060_v25  ;;  %7778 = vmatprep.mubr.f32.mxu1 %v1593_v2  ;;  %v1612_v44 = vsub.f32 %v11052_v50, %v12726_v43 }
 0x15a   : > { %7779 = vmatmul.mubr.f32.gmra.mrb[26].mxu1 %v1603_v26  ;;  %v12723_v49 = vand.u32 4294901760, %v11065_v29  ;;  %v1623_v41 = vand.u32 4294901760, %v1622_v52  ;;  %v11094_v52 = vpack.c.bf16 %v10878_v34, %v10873_v32 }
 0x15b   : > { %9154 = vmatpush3.bf16.msra.mxu1 %v10822_v1  ;;  %v1613_v47 = vand.u32 4294901760, %v1612_v44  ;;  %v12724_v45 = vand.u32 4294901760, %v11072_v62 }
 0x15c   : > { %9156 = vmatprep.subr.bf16.mxu1 %v10836_v8  ;;  %v1642_v51 = vsub.f32 %v11065_v29, %v12723_v49 }
 0x15d   : > { %7781 = vmatprep.mubr.f32.mxu1 %v1613_v47  ;;  %v1632_v2 = vsub.f32 %v11072_v62, %v12724_v45  ;;  %v12856_v47 = vld [vmem:[#allocation2_spill] sm:$0xff] }
 0x15e   : > { %7782 = vmatmul.mubr.f32.gmra.mrb[28].mxu1 %v1623_v41  ;;  %v1643_v44 = vand.u32 4294901760, %v1642_v51  ;;  %v11102_v41 = vpack.c.bf16 %v10888_v61, %v10883_v46  ;;  %v12857_v51 = vld [vmem:[#allocation3_spill] sm:$0xff]  ;;  %v12862_v45 = vld [vmem:[#allocation6_spill] sm:$0xff] }
 0x15f   : > { %9158 = vmatpush3.bf16.msra.mxu1 %v10836_v8  ;;  %v1633_v26 = vand.u32 4294901760, %v1632_v2  ;;  %v12858_v2 = vld [vmem:[#allocation4_spill] sm:$0xff]  ;;  %v12863_v58 = vand.u32 4294901760, %v12862_v45 }
 0x160   : > { %9160 = vmatprep.subr.bf16.mxu1 %v10844_v48 }
 0x161   : > { %7784 = vmatprep.mubr.f32.mxu1 %v1633_v26  ;;  %v12859_v26 = vld [vmem:[#allocation7_spill] sm:$0xff] }
 0x162   : > { %7785 = vmatmul.mubr.f32.gmra.mrb[30].mxu1 %v1643_v44  ;;  %v12860_v44 = vld [vmem:[#allocation5_spill] sm:$0xff] }
 0x163   : > { %9162 = vmatpush3.bf16.msra.mxu1 %v10844_v48  ;;  %7819 = vmatprep.mubr.f32.mxu1 %v10917_v6  ;;  %v12861_v49 = vand.u32 4294901760, %v12860_v44  ;;  %v12868_v44 = vand.u32 4294901760, %v10920_v13 }
 0x164   : > { %9164 = vmatprep.subr.bf16.mxu1 %v10848_v56 }
 0x165   : > { %v11164_v43 = vpack.c.bf16 %v12863_v58, %v12861_v49  ;;  %v12869_v49 = vand.u32 4294901760, %v10945_v27 }
 0x166   : > { %7820 = vmatmul.mubr.f32.vlgmr.msra.gmra.mrb[16].mxu1 %v10915_v15 }
 0x167   : > { %9166 = vmatpush3.bf16.msra.mxu1 %v10848_v56  ;;  %7822 = vmatprep.mubr.f32.mxu1 %v10932_v53 }
 0x168   : > { %9168 = vmatprep.subr.bf16.mxu1 %v11094_v52 }
 0x16a   : > { %7823 = vmatmul.mubr.f32.gmra.mrb[18].mxu1 %v10928_v57 }
 0x16b   : > { %9170 = vmatpush3.bf16.msra.mxu1 %v11094_v52  ;;  %7825 = vmatprep.mubr.f32.mxu1 %v10954_v38 }
 0x16c   : > { %9172 = vmatprep.subr.bf16.mxu1 %v11102_v41 }
 0x16e   : > { %7826 = vmatmul.mubr.f32.gmra.mrb[20].mxu1 %v10951_v17 }
 0x16f   : > { %9174 = vmatpush3.bf16.msra.mxu1 %v11102_v41  ;;  %7828 = vmatprep.mubr.f32.mxu1 %v10974_v5 }
 0x170   : > { %9176 = vmatprep.subr.bf16.mxu1 %v10852_v14 }
 0x172   : > { %7829 = vmatmul.mubr.f32.gmra.mrb[22].mxu1 %v10971_v59 }
 0x173   : > { %9178 = vmatpush3.bf16.msra.mxu1 %v10852_v14  ;;  %7831 = vmatprep.mubr.f32.mxu1 %v10996_v40 }
 0x174   : > { %9180 = vmatprep.subr.bf16.mxu1 %v10856_v20 }
 0x176   : > { %7832 = vmatmul.mubr.f32.gmra.mrb[24].mxu1 %v10993_v37 }
 0x177   : > { %9182 = vmatpush3.bf16.msra.mxu1 %v10856_v20  ;;  %7834 = vmatprep.mubr.f32.mxu1 %v11018_v11 }
 0x178   : > { %9184 = vmatprep.subr.bf16.mxu1 %v10860_v30 }
 0x17a   : > { %7835 = vmatmul.mubr.f32.gmra.mrb[26].mxu1 %v11015_v0 }
 0x17b   : > { %9186 = vmatpush3.bf16.msra.mxu1 %v10860_v30  ;;  %7837 = vmatprep.mubr.f32.mxu1 %v11040_v10 }
 0x17c   : > { %9188 = vmatprep.subr.bf16.mxu1 %v10864_v33 }
 0x17e   : > { %7838 = vmatmul.mubr.f32.gmra.mrb[28].mxu1 %v11037_v28 }
 0x17f   : > { %9190 = vmatpush3.bf16.msra.mxu1 %v10864_v33  ;;  %7840 = vmatprep.mubr.f32.mxu1 %v11060_v25  ;;  %v12866_v33 = vand.u32 4294901760, %v10878_v34 }
 0x180   : > { %9192 = vmatprep.subr.bf16.mxu1 %v10868_v31 }
 0x182   : > { %7841 = vmatmul.mubr.f32.gmra.mrb[30].mxu1 %v11057_v12 }
 0x183   : > { %9194 = vmatpush3.bf16.msra.mxu1 %v10868_v31  ;;  %7875 = vmatprep.mubr.f32.mxu1 %v10924_v24  ;;  %v12865_v31 = vand.u32 4294901760, %v10873_v32  ;;  %v12870_v24 = vand.u32 4294901760, %v10883_v46  ;;  %v12873_v32 = vand.u32 4294901760, %v10941_v35  ;;  %v12880_v46 = vand.u32 4294901760, %v10958_v55 }
 0x184   : > { %9196 = vmatprep.subr.bf16.mxu1 %v10582_v39 }
 0x185   : > { %v11175_v30 = vpack.c.bf16 %v12866_v33, %v12865_v31  ;;  %v12874_v33 = vand.u32 4294901760, %v10965_v7  ;;  %v12875_v31 = vld [vmem:[#allocation9_spill] sm:$0xff] }
 0x186   : > { %7876 = vmatmul.mubr.f32.vlgmr.msra.gmra.mrb[16].mxu1 %v10920_v13  ;;  %v12876_v34 = vand.u32 4294901760, %v12875_v31  ;;  %v12877_v13 = vld [vmem:[#allocation10_spill] sm:$0xff] }
 0x187   : > { %9198 = vmatpush3.bf16.msra.mxu1 %v10582_v39  ;;  %7878 = vmatprep.mubr.f32.mxu1 %v10945_v27  ;;  %12867 = vst [vmem:[#allocation2_spill] sm:$0xff] %v11175_v30  ;;  %v12878_v27 = vand.u32 4294901760, %v12877_v13  ;;  %v12894_v13 = vand.u32 4294901760, %v11001_v60 }
 0x188   : > { %9200 = vmatprep.subr.bf16.mxu1 %v10646_v22 }
 0x189   : > { %v11199_v45 = vpack.c.bf16 %v12878_v27, %v12876_v34 }
 0x18a   : > { %7879 = vmatmul.mubr.f32.gmra.mrb[18].mxu1 %v10941_v35  ;;  %v12882_v35 = vld [vmem:[#allocation11_spill] sm:$0xff] }
 0x18b   : > { %9202 = vmatpush3.bf16.msra.mxu1 %v10646_v22  ;;  %7881 = vmatprep.mubr.f32.mxu1 %v10965_v7  ;;  %12879 = vst [vmem:[#allocation4_spill] sm:$0xff] %v11199_v45  ;;  %v12883_v7 = vand.u32 4294901760, %v12882_v35 }
 0x18c   : > { %9204 = vmatprep.subr.bf16.mxu1 %v10660_v23 }
 0x18e   : > { %7882 = vmatmul.mubr.f32.gmra.mrb[20].mxu1 %v10958_v55  ;;  %v12888_v55 = vand.u32 4294901760, %v11009_v9 }
 0x18f   : > { %9206 = vmatpush3.bf16.msra.mxu1 %v10660_v23  ;;  %7884 = vmatprep.mubr.f32.mxu1 %v10987_v21 }
 0x190   : > { %9208 = vmatprep.subr.bf16.mxu1 %v10700_v36 }
 0x192   : > { %7885 = vmatmul.mubr.f32.gmra.mrb[22].mxu1 %v10979_v3 }
 0x193   : > { %9210 = vmatpush3.bf16.msra.mxu1 %v10700_v36  ;;  %7887 = vmatprep.mubr.f32.mxu1 %v11009_v9  ;;  %v12896_v9 = vld [vmem:[#allocation16_spill] sm:$0xff] }
 0x194   : > { %9212 = vmatprep.subr.bf16.mxu1 %v12856_v47  ;;  %v12897_v27 = vand.u32 4294901760, %v12896_v9 }
 0x196   : > { %7888 = vmatmul.mubr.f32.gmra.mrb[24].mxu1 %v11001_v60  ;;  %v12902_v60 = vand.u32 4294901760, %v11052_v50 }
 0x197   : > { %9214 = vmatpush3.bf16.msra.mxu1 %v12856_v47  ;;  %7890 = vmatprep.mubr.f32.mxu1 %v11031_v54 }
 0x198   : > { %9216 = vmatprep.subr.bf16.mxu1 %v12857_v51 }
 0x19a   : > { %7891 = vmatmul.mubr.f32.gmra.mrb[26].mxu1 %v11023_v63 }
 0x19b   : > { %9218 = vmatpush3.bf16.msra.mxu1 %v12857_v51  ;;  %7893 = vmatprep.mubr.f32.mxu1 %v11052_v50  ;;  %v12910_v50 = vand.u32 4294901760, %v11065_v29 }
 0x19c   : > { %9220 = vmatprep.subr.bf16.mxu1 %v12858_v2 }
 0x19e   : > { %7894 = vmatmul.mubr.f32.gmra.mrb[28].mxu1 %v11045_v4 }
 0x19f   : > { %9222 = vmatpush3.bf16.msra.mxu1 %v12858_v2  ;;  %7896 = vmatprep.mubr.f32.mxu1 %v11072_v62 }
 0x1a0   : > { %9224 = vmatprep.subr.bf16.mxu1 %v12859_v26 }
 0x1a2   : > { %7897 = vmatmul.mubr.f32.gmra.mrb[30].mxu1 %v11065_v29 }
 0x1a3   : > { %9226 = vmatpush3.bf16.msra.mxu1 %v12859_v26  ;;  %7931 = vmatprep.mubr.f32.mxu1 %v12864_v16  ;;  %v12871_v16 = vand.u32 4294901760, %v10888_v61  ;;  %v12881_v61 = vand.u32 4294901760, %v10987_v21  ;;  %v12889_v21 = vld [vmem:[#allocation14_spill] sm:$0xff] }
 0x1a4   : > { %9228 = vmatprep.subr.bf16.mxu1 %v11164_v43 }
 0x1a5   : > { %v11187_v58 = vpack.c.bf16 %v12871_v16, %v12870_v24  ;;  %v12887_v16 = vand.u32 4294901760, %v10979_v3  ;;  %v12895_v3 = vand.u32 4294901760, %v11031_v54  ;;  %v12903_v54 = vld [vmem:[#allocation19_spill] sm:$0xff] }
 0x1a6   : > { %7932 = vmatmul.mubr.f32.vlgmr.msra.gmra.mrb[16].mxu1 %v12868_v44  ;;  %v12884_v44 = vld [vmem:[#allocation12_spill] sm:$0xff] }
 0x1a7   : > { %9230 = vmatpush3.bf16.msra.mxu1 %v11164_v43  ;;  %7934 = vmatprep.mubr.f32.mxu1 %v12869_v49  ;;  %12872 = vst [vmem:[#allocation3_spill] sm:$0xff] %v11187_v58  ;;  %v12885_v49 = vand.u32 4294901760, %v12884_v44  ;;  %v12904_v44 = vand.u32 4294901760, %v12903_v54 }
 0x1a8   : > { %9232 = vmatprep.subr.bf16.mxu1 %v11175_v30 }
 0x1a9   : > { %v11211_v24 = vpack.c.bf16 %v12885_v49, %v12883_v7  ;;  %v12901_v7 = vand.u32 4294901760, %v11023_v63  ;;  %v12905_v49 = vld [vmem:[#allocation20_spill] sm:$0xff]  ;;  %v12909_v63 = vand.u32 4294901760, %v11072_v62 }
 0x1aa   : > { %7935 = vmatmul.mubr.f32.gmra.mrb[18].mxu1 %v12873_v32  ;;  %v12890_v32 = vand.u32 4294901760, %v12889_v21  ;;  %v12908_v21 = vand.u32 4294901760, %v11045_v4 }
 0x1ab   : > { %9234 = vmatpush3.bf16.msra.mxu1 %v11175_v30  ;;  %7937 = vmatprep.mubr.f32.mxu1 %v12874_v33  ;;  %12886 = vst [vmem:[#allocation7_spill] sm:$0xff] %v11211_v24  ;;  %v12891_v33 = vld [vmem:[#allocation15_spill] sm:$0xff] }
 0x1ac   : > { %9236 = vmatprep.subr.bf16.mxu1 %v11187_v58  ;;  %v12892_v31 = vand.u32 4294901760, %v12891_v33 }
 0x1ae   : > { %7938 = vmatmul.mubr.f32.gmra.mrb[20].mxu1 %v12880_v46  ;;  %v11223_v34 = vpack.c.bf16 %v12892_v31, %v12890_v32  ;;  %v12898_v46 = vld [vmem:[#allocation17_spill] sm:$0xff] }
 0x1af   : > { %9238 = vmatpush3.bf16.msra.mxu1 %v11187_v58  ;;  %7940 = vmatprep.mubr.f32.mxu1 %v12881_v61  ;;  %v12899_v61 = vand.u32 4294901760, %v12898_v46 }
 0x1b0   : > { %9240 = vmatprep.subr.bf16.mxu1 %v11199_v45  ;;  %12893 = vst [vmem:[#allocation5_spill] sm:$0xff] %v11223_v34 }
 0x1b1   : > { %v11235_v35 = vpack.c.bf16 %v12899_v61, %v12897_v27 }
 0x1b2   : > { %7941 = vmatmul.mubr.f32.gmra.mrb[22].mxu1 %v12887_v16  ;;  %v12906_v16 = vand.u32 4294901760, %v12905_v49 }
 0x1b3   : > { %9242 = vmatpush3.bf16.msra.mxu1 %v11199_v45  ;;  %7943 = vmatprep.mubr.f32.mxu1 %v12888_v55  ;;  %12900 = vst [vmem:[#allocation6_spill] sm:$0xff] %v11235_v35 }
 0x1b4   : > { %9244 = vmatprep.subr.bf16.mxu1 %v11211_v24  ;;  %v11247_v55 = vpack.c.bf16 %v12906_v16, %v12904_v44 }
 0x1b6   : > { %7944 = vmatmul.mubr.f32.gmra.mrb[24].mxu1 %v12894_v13  ;;  %12907 = vst [vmem:[#allocation9_spill] sm:$0xff] %v11247_v55 }
 0x1b7   : > { %9246 = vmatpush3.bf16.msra.mxu1 %v11211_v24  ;;  %7946 = vmatprep.mubr.f32.mxu1 %v12895_v3 }
 0x1b8   : > { %9248 = vmatprep.subr.bf16.mxu1 %v11223_v34 }
 0x1ba   : > { %7947 = vmatmul.mubr.f32.gmra.mrb[26].mxu1 %v12901_v7 }
 0x1bb   : > { %9250 = vmatpush3.bf16.msra.mxu1 %v11223_v34  ;;  %7949 = vmatprep.mubr.f32.mxu1 %v12902_v60 }
 0x1bc   : > { %9252 = vmatprep.subr.bf16.mxu1 %v11235_v35 }
 0x1be   : > { %7950 = vmatmul.mubr.f32.gmra.mrb[28].mxu1 %v12908_v21 }
 0x1bf   : > { %9254 = vmatpush3.bf16.msra.mxu1 %v11235_v35  ;;  %7952 = vmatprep.mubr.f32.mxu1 %v12909_v63 }
 0x1c0   : > { %9256 = vmatprep.subr.bf16.mxu1 %v11247_v55 }
 0x1c2   : > { %7953 = vmatmul.mubr.f32.gmra.mrb[30].mxu1 %v12910_v50 }
 0x1c3   : > { %9258 = vmatpush3.bf16.msra.mxu1 %v11247_v55  ;;  %7987 = vmatprep.mubr.f32.mxu1 %v10917_v6 }
 0x1c4   : > { %9260 = vmatprep.subr.bf16.mxu1 %v10582_v39 }
 0x1c6   : > { %7988 = vmatmul.mubr.f32.vlgmr.msra.gmra.mrb[16].mxu1 %v10915_v15 }
 0x1c7   : > { %9262 = vmatpush3.bf16.msra.mxu1 %v10582_v39  ;;  %7990 = vmatprep.mubr.f32.mxu1 %v10932_v53 }
 0x1c8   : > { %9264 = vmatprep.subr.bf16.mxu1 %v10646_v22 }
 0x1ca   : > { %7991 = vmatmul.mubr.f32.gmra.mrb[18].mxu1 %v10928_v57 }
 0x1cb   : > { %9266 = vmatpush3.bf16.msra.mxu1 %v10646_v22  ;;  %7993 = vmatprep.mubr.f32.mxu1 %v10954_v38 }
 0x1cc   : > { %9268 = vmatprep.subr.bf16.mxu1 %v10660_v23 }
 0x1ce   : > { %7994 = vmatmul.mubr.f32.gmra.mrb[20].mxu1 %v10951_v17 }
 0x1cf   : > { %9270 = vmatpush3.bf16.msra.mxu1 %v10660_v23  ;;  %7996 = vmatprep.mubr.f32.mxu1 %v10974_v5 }
 0x1d0   : > { %9272 = vmatprep.subr.bf16.mxu1 %v10700_v36 }
 0x1d2   : > { %7997 = vmatmul.mubr.f32.gmra.mrb[22].mxu1 %v10971_v59 }
 0x1d3   : > { %9274 = vmatpush3.bf16.msra.mxu1 %v10700_v36  ;;  %7999 = vmatprep.mubr.f32.mxu1 %v10996_v40 }
 0x1d4   : > { %9276 = vmatprep.subr.bf16.mxu1 %v12856_v47 }
 0x1d6   : > { %8000 = vmatmul.mubr.f32.gmra.mrb[24].mxu1 %v10993_v37 }
 0x1d7   : > { %9278 = vmatpush3.bf16.msra.mxu1 %v12856_v47  ;;  %8002 = vmatprep.mubr.f32.mxu1 %v11018_v11 }
 0x1d8   : > { %9280 = vmatprep.subr.bf16.mxu1 %v12857_v51 }
 0x1da   : > { %8003 = vmatmul.mubr.f32.gmra.mrb[26].mxu1 %v11015_v0 }
 0x1db   : > { %9282 = vmatpush3.bf16.msra.mxu1 %v12857_v51  ;;  %8005 = vmatprep.mubr.f32.mxu1 %v11040_v10 }
 0x1dc   : > { %9284 = vmatprep.subr.bf16.mxu1 %v12858_v2 }
 0x1de   : > { %8006 = vmatmul.mubr.f32.gmra.mrb[28].mxu1 %v11037_v28 }
 0x1df   : > { %9286 = vmatpush3.bf16.msra.mxu1 %v12858_v2  ;;  %8008 = vmatprep.mubr.f32.mxu1 %v11060_v25 }
 0x1e0   : > { %9288 = vmatprep.subr.bf16.mxu1 %v12859_v26 }
 0x1e2   : > { %8009 = vmatmul.mubr.f32.gmra.mrb[30].mxu1 %v11057_v12 }
 0x1e3   : > { %9290 = vmatpush3.bf16.msra.mxu1 %v12859_v26  ;;  %8043 = vmatprep.mubr.f32.mxu1 %v10917_v6 }
 0x1e4   : > { %9484 = vmatprep.subr.bf16.mxu1 %v10582_v39 }
 0x1e6   : > { %8044 = vmatmul.mubr.f32.vlgmr.msra.gmra.mrb[16].mxu1 %v10915_v15 }
 0x1e7   : > { %8046 = vmatprep.mubr.f32.mxu1 %v10932_v53  ;;  %9486 = vmatpush3.bf16.msra.mxu1 %v10582_v39 }
 0x1e8   : > { %9488 = vmatprep.subr.bf16.mxu1 %v10646_v22 }
 0x1ea   : > { %8047 = vmatmul.mubr.f32.gmra.mrb[18].mxu1 %v10928_v57 }
 0x1eb   : > { %8049 = vmatprep.mubr.f32.mxu1 %v10954_v38  ;;  %9490 = vmatpush3.bf16.msra.mxu1 %v10646_v22 }
 0x1ec   : > { %9492 = vmatprep.subr.bf16.mxu1 %v10660_v23 }
 0x1ee   : > { %8050 = vmatmul.mubr.f32.gmra.mrb[20].mxu1 %v10951_v17 }
 0x1ef   : > { %8052 = vmatprep.mubr.f32.mxu1 %v10974_v5  ;;  %9494 = vmatpush3.bf16.msra.mxu1 %v10660_v23 }
 0x1f0   : > { %9496 = vmatprep.subr.bf16.mxu1 %v10700_v36 }
 0x1f2   : > { %8053 = vmatmul.mubr.f32.gmra.mrb[22].mxu1 %v10971_v59 }
 0x1f3   : > { %8055 = vmatprep.mubr.f32.mxu1 %v10996_v40  ;;  %9498 = vmatpush3.bf16.msra.mxu1 %v10700_v36  ;;  %v11326_v40 = vld [vmem:[%s12669_s1 + $0x98] ss:$0 sm:$0xff] }
 0x1f4   : > { %9500 = vmatprep.subr.bf16.mxu1 %v12856_v47 }
 0x1f6   : > { %8056 = vmatmul.mubr.f32.gmra.mrb[24].mxu1 %v10993_v37 }
 0x1f7   : > { %8058 = vmatprep.mubr.f32.mxu1 %v11018_v11  ;;  %9502 = vmatpush3.bf16.msra.mxu1 %v12856_v47  ;;  %v12911_v11 = vld [vmem:[#allocation8_spill] sm:$0xff] }
 0x1f8   : > { %9504 = vmatprep.subr.bf16.mxu1 %v12857_v51 }
 0x1fa   : > { %8059 = vmatmul.mubr.f32.gmra.mrb[26].mxu1 %v11015_v0 }
 0x1fb   : > { %8061 = vmatprep.mubr.f32.mxu1 %v11040_v10  ;;  %9506 = vmatpush3.bf16.msra.mxu1 %v12857_v51 }
 0x1fc   : > { %9508 = vmatprep.subr.bf16.mxu1 %v12858_v2 }
 0x1fe   : > { %8062 = vmatmul.mubr.f32.gmra.mrb[28].mxu1 %v11037_v28 }
 0x1ff   : > { %8064 = vmatprep.mubr.f32.mxu1 %v11060_v25  ;;  %9510 = vmatpush3.bf16.msra.mxu1 %v12858_v2 }
 0x200   : > { %9512 = vmatprep.subr.bf16.mxu1 %v12859_v26 }
 0x202   : > { %8065 = vmatmul.mubr.f32.gmra.mrb[30].mxu1 %v11057_v12 }
 0x203   : > { %9514 = vmatpush3.bf16.msra.mxu1 %v12859_v26 }
 0x204   : > { %9516 = vmatprep.subr.bf16.mxu1 %v12911_v11 }
 0x2b9   : > { %v8045_v5 = vpop.f32.mrb[16].mxu1 }
 0x2ba   : > { %v9899_v6 = vadd.f32 %v8045_v5, %v11326_v40  ;;  %v2600_v15 = vpop.f32.mrb[17].mxu1 }
 0x2bb   : > { %v9900_v38 = vadd.f32 %v11326_v40, %v2600_v15 }
 0x2bc   : > { %v2695_v17 = vmax.f32 %v9899_v6, 0.0 }
 0x2bd   : > { %v2694_v57 = vmax.f32 %v9900_v38, 0.0  ;;  %v8048_v53 = vpop.f32.mrb[18].mxu1 }
 0x2be   : > { %v11330_v59 = vand.u32 4294901760, %v2695_v17  ;;  %v9901_v37 = vadd.f32 %v8048_v53, %v11326_v40  ;;  %v2612_v0 = vpop.f32.mrb[19].mxu1 }
 0x2bf   : > { %v11333_v28 = vand.u32 4294901760, %v2694_v57  ;;  %v9902_v10 = vadd.f32 %v11326_v40, %v2612_v0 }
 0x2c0   : > { %v11337_v4 = vsub.f32 %v2695_v17, %v11330_v59  ;;  %v2697_v12 = vmax.f32 %v9901_v37, 0.0 }
 0x2c1   : > { %v11340_v25 = vsub.f32 %v2694_v57, %v11333_v28  ;;  %v2696_v29 = vmax.f32 %v9902_v10, 0.0  ;;  %v8051_v62 = vpop.f32.mrb[20].mxu1 }
 0x2c2   : > { %v12738_v32 = vand.u32 4294901760, %v11337_v4  ;;  %v11343_v33 = vand.u32 4294901760, %v2697_v12  ;;  %v9903_v31 = vadd.f32 %v8051_v62, %v11326_v40  ;;  %v2624_v13 = vpop.f32.mrb[21].mxu1 }
 0x2c3   : > { %v11346_v3 = vand.u32 4294901760, %v2696_v29  ;;  %v9904_v9 = vadd.f32 %v11326_v40, %v2624_v13  ;;  %v12739_v27 = vand.u32 4294901760, %v11340_v25 }
 0x2c4   : > { %v2804_v46 = vsub.f32 %v11337_v4, %v12738_v32  ;;  %v11354_v61 = vsub.f32 %v2697_v12, %v11343_v33  ;;  %v2699_v7 = vmax.f32 %v9903_v31, 0.0 }
 0x2c5   : > { %v11357_v60 = vsub.f32 %v2696_v29, %v11346_v3  ;;  %v2698_v54 = vmax.f32 %v9904_v9, 0.0  ;;  %v8054_v44 = vpop.f32.mrb[22].mxu1  ;;  %v2794_v49 = vsub.f32 %v11340_v25, %v12739_v27 }
 0x2c6   : > { %v11362_v16 = vand.u32 4294901760, %v2699_v7  ;;  %v9905_v21 = vadd.f32 %v8054_v44, %v11326_v40  ;;  %v2636_v63 = vpop.f32.mrb[23].mxu1  ;;  %v12734_v50 = vand.u32 4294901760, %v11354_v61  ;;  %v2805_v17 = vand.u32 4294901760, %v2804_v46 }
 0x2c7   : > { %v11366_v5 = vand.u32 4294901760, %v2698_v54  ;;  %v9906_v6 = vadd.f32 %v11326_v40, %v2636_v63  ;;  %v2795_v15 = vand.u32 4294901760, %v2794_v49  ;;  %v12735_v38 = vand.u32 4294901760, %v11357_v60  ;;  %v12912_v63 = vld [vmem:[#allocation24_spill] sm:$0xff] }
 0x2c8   : > { %v11371_v57 = vsub.f32 %v2699_v7, %v11362_v16  ;;  %v2701_v53 = vmax.f32 %v9905_v21, 0.0  ;;  %v2824_v37 = vsub.f32 %v11354_v61, %v12734_v50 }
 0x2c9   : > { %v11377_v0 = vsub.f32 %v2698_v54, %v11366_v5  ;;  %v2700_v10 = vmax.f32 %v9906_v6, 0.0  ;;  %v8057_v12 = vpop.f32.mrb[24].mxu1  ;;  %8099 = vmatprep.mubr.f32.mxu0 %v2795_v15  ;;  %v2814_v29 = vsub.f32 %v11357_v60, %v12735_v38 }
 0x2ca   : > { %v11382_v62 = vand.u32 4294901760, %v2701_v53  ;;  %v9907_v31 = vadd.f32 %v8057_v12, %v11326_v40  ;;  %v2648_v13 = vpop.f32.mrb[25].mxu1  ;;  %8100 = vmatmul.mubr.f32.vlgmr.msra.gmra.mrb[16].mxu0 %v2805_v17  ;;  %v12736_v9 = vand.u32 4294901760, %v11371_v57  ;;  %v2825_v6 = vand.u32 4294901760, %v2824_v37 }
 0x2cb   : > { %v11386_v46 = vand.u32 4294901760, %v2700_v10  ;;  %v9908_v7 = vadd.f32 %v11326_v40, %v2648_v13  ;;  %9326 = vmatpush3.bf16.msra.mxu0 %v12911_v11  ;;  %v2815_v54 = vand.u32 4294901760, %v2814_v29  ;;  %v12737_v44 = vand.u32 4294901760, %v11377_v0 }
 0x2cc   : > { %v11392_v49 = vsub.f32 %v2701_v53, %v11382_v62  ;;  %v2703_v21 = vmax.f32 %v9907_v31, 0.0  ;;  %9328 = vmatprep.subr.bf16.mxu0 %v12912_v63  ;;  %v2844_v15 = vsub.f32 %v11371_v57, %v12736_v9 }
 0x2cd   : > { %v11399_v17 = vsub.f32 %v2700_v10, %v11386_v46  ;;  %v2702_v12 = vmax.f32 %v9908_v7, 0.0  ;;  %v8060_v13 = vpop.f32.mrb[26].mxu1  ;;  %8102 = vmatprep.mubr.f32.mxu0 %v2815_v54  ;;  %v2834_v29 = vsub.f32 %v11377_v0, %v12737_v44 }
 0x2ce   : > { %v11404_v53 = vand.u32 4294901760, %v2703_v21  ;;  %v9909_v31 = vadd.f32 %v8060_v13, %v11326_v40  ;;  %v2660_v50 = vpop.f32.mrb[27].mxu1  ;;  %8103 = vmatmul.mubr.f32.gmra.mrb[18].mxu0 %v2825_v6  ;;  %v12742_v37 = vand.u32 4294901760, %v11392_v49  ;;  %v2845_v13 = vand.u32 4294901760, %v2844_v15 }
 0x2cf   : > { %v11408_v38 = vand.u32 4294901760, %v2702_v12  ;;  %v9910_v10 = vadd.f32 %v11326_v40, %v2660_v50  ;;  %9330 = vmatpush3.bf16.msra.mxu0 %v12912_v63  ;;  %v2835_v7 = vand.u32 4294901760, %v2834_v29  ;;  %v12743_v54 = vand.u32 4294901760, %v11399_v17 }
 0x2d0   : > { %v11414_v9 = vsub.f32 %v2703_v21, %v11404_v53  ;;  %v2705_v44 = vmax.f32 %v9909_v31, 0.0  ;;  %9332 = vmatprep.subr.bf16.mxu0 %v10935_v19  ;;  %v2864_v6 = vsub.f32 %v11392_v49, %v12742_v37 }
 0x2d1   : > { %v11421_v32 = vsub.f32 %v2702_v12, %v11408_v38  ;;  %v2704_v50 = vmax.f32 %v9910_v10, 0.0  ;;  %v8063_v27 = vpop.f32.mrb[28].mxu1  ;;  %8105 = vmatprep.mubr.f32.mxu0 %v2835_v7  ;;  %v2854_v29 = vsub.f32 %v11399_v17, %v12743_v54 }
 0x2d2   : > { %v11426_v21 = vand.u32 4294901760, %v2705_v44  ;;  %v9911_v31 = vadd.f32 %v8063_v27, %v11326_v40  ;;  %v2672_v63 = vpop.f32.mrb[29].mxu1  ;;  %8106 = vmatmul.mubr.f32.gmra.mrb[20].mxu0 %v2845_v13  ;;  %v12752_v15 = vand.u32 4294901760, %v11414_v9  ;;  %v2865_v27 = vand.u32 4294901760, %v2864_v6 }
 0x2d3   : > { %v11430_v11 = vand.u32 4294901760, %v2704_v50  ;;  %v9912_v12 = vadd.f32 %v11326_v40, %v2672_v63  ;;  %9334 = vmatpush3.bf16.msra.mxu0 %v10935_v19  ;;  %v2855_v10 = vand.u32 4294901760, %v2854_v29  ;;  %v12753_v7 = vand.u32 4294901760, %v11421_v32 }
 0x2d4   : > { %v11436_v37 = vsub.f32 %v2705_v44, %v11426_v21  ;;  %v2707_v54 = vmax.f32 %v9911_v31, 0.0  ;;  %9336 = vmatprep.subr.bf16.mxu0 %v10794_v18  ;;  %v2884_v13 = vsub.f32 %v11414_v9, %v12752_v15 }
 0x2d5   : > { %v11443_v55 = vsub.f32 %v2704_v50, %v11430_v11  ;;  %v2706_v63 = vmax.f32 %v9912_v12, 0.0  ;;  %v8066_v35 = vpop.f32.mrb[30].mxu1  ;;  %8108 = vmatprep.mubr.f32.mxu0 %v2855_v10  ;;  %v2874_v29 = vsub.f32 %v11421_v32, %v12753_v7 }
 0x2d6   : > { %v11448_v44 = vand.u32 4294901760, %v2707_v54  ;;  %v9913_v31 = vadd.f32 %v8066_v35, %v11326_v40  ;;  %v2684_v19 = vpop.f32.mrb[31].mxu1  ;;  %8109 = vmatmul.mubr.f32.gmra.mrb[22].mxu0 %v2865_v27  ;;  %v12758_v6 = vand.u32 4294901760, %v11436_v37  ;;  %v2885_v35 = vand.u32 4294901760, %v2884_v13 }
 0x2d7   : > { %v11452_v34 = vand.u32 4294901760, %v2706_v63  ;;  %v9914_v50 = vadd.f32 %v11326_v40, %v2684_v19  ;;  %9338 = vmatpush3.bf16.msra.mxu0 %v10794_v18  ;;  %v2875_v12 = vand.u32 4294901760, %v2874_v29  ;;  %v12759_v10 = vand.u32 4294901760, %v11443_v55 }
 0x2d8   : > { %v11458_v15 = vsub.f32 %v2707_v54, %v11448_v44  ;;  %v2709_v7 = vmax.f32 %v9913_v31, 0.0  ;;  %9340 = vmatprep.subr.bf16.mxu0 %v10818_v42  ;;  %v2904_v27 = vsub.f32 %v11436_v37, %v12758_v6 }
 0x2d9   : > { %v11465_v24 = vsub.f32 %v2706_v63, %v11452_v34  ;;  %v2708_v19 = vmax.f32 %v9914_v50, 0.0  ;;  %8111 = vmatprep.mubr.f32.mxu0 %v2875_v12  ;;  %v2894_v29 = vsub.f32 %v11443_v55, %v12759_v10 }
 0x2da   : > { %v11470_v18 = vand.u32 4294901760, %v2709_v7  ;;  %8112 = vmatmul.mubr.f32.gmra.mrb[24].mxu0 %v2885_v35  ;;  %v2923_v54 = vand.u32 4294901760, %v11458_v15  ;;  %v2905_v50 = vand.u32 4294901760, %v2904_v27 }
 0x2db   : > { %v11473_v31 = vand.u32 4294901760, %v2708_v19  ;;  %9342 = vmatpush3.bf16.msra.mxu0 %v10818_v42  ;;  %v2895_v13 = vand.u32 4294901760, %v2894_v29  ;;  %v2913_v6 = vand.u32 4294901760, %v11465_v24 }
 0x2dc   : > { %v11478_v63 = vsub.f32 %v2709_v7, %v11470_v18  ;;  %9344 = vmatprep.subr.bf16.mxu0 %v10822_v1  ;;  %v2924_v12 = vsub.f32 %v11458_v15, %v2923_v54 }
 0x2dd   : > { %v11485_v35 = vsub.f32 %v2708_v19, %v11473_v31  ;;  %8114 = vmatprep.mubr.f32.mxu0 %v2895_v13  ;;  %v2914_v29 = vsub.f32 %v11465_v24, %v2913_v6 }
 0x2de   : > { %8115 = vmatmul.mubr.f32.gmra.mrb[26].mxu0 %v2905_v50  ;;  %v2943_v10 = vand.u32 4294901760, %v11478_v63  ;;  %v2925_v42 = vand.u32 4294901760, %v2924_v12  ;;  %v12914_v12 = vld [vmem:[#allocation22_spill] sm:$0xff] }
 0x2df   : > { %9346 = vmatpush3.bf16.msra.mxu0 %v10822_v1  ;;  %v2915_v7 = vand.u32 4294901760, %v2914_v29  ;;  %v2933_v27 = vand.u32 4294901760, %v11485_v35 }
 0x2e0   : > { %9348 = vmatprep.subr.bf16.mxu0 %v10836_v8  ;;  %v2944_v19 = vsub.f32 %v11478_v63, %v2943_v10 }
 0x2e1   : > { %8117 = vmatprep.mubr.f32.mxu0 %v2915_v7  ;;  %v2934_v13 = vsub.f32 %v11485_v35, %v2933_v27  ;;  %v12915_v7 = vld [vmem:[#allocation23_spill] sm:$0xff] }
 0x2e2   : > { %8118 = vmatmul.mubr.f32.gmra.mrb[28].mxu0 %v2925_v42  ;;  %v2945_v29 = vand.u32 4294901760, %v2944_v19  ;;  %v12913_v42 = vld [vmem:[#allocation21_spill] sm:$0xff]  ;;  %v12916_v19 = vand.u32 4294901760, %v11340_v25 }
 0x2e3   : > { %9350 = vmatpush3.bf16.msra.mxu0 %v10836_v8  ;;  %v2935_v50 = vand.u32 4294901760, %v2934_v13  ;;  %v12917_v13 = vand.u32 4294901760, %v11337_v4 }
 0x2e4   : > { %9352 = vmatprep.subr.bf16.mxu0 %v10844_v48 }
 0x2e5   : > { %8120 = vmatprep.mubr.f32.mxu0 %v2935_v50  ;;  %v12918_v50 = vand.u32 4294901760, %v11357_v60 }
 0x2e6   : > { %8121 = vmatmul.mubr.f32.gmra.mrb[30].mxu0 %v2945_v29  ;;  %v12919_v29 = vand.u32 4294901760, %v11354_v61 }
 0x2e7   : > { %9354 = vmatpush3.bf16.msra.mxu0 %v10844_v48  ;;  %8155 = vmatprep.mubr.f32.mxu0 %v11333_v28 }
 0x2e8   : > { %9356 = vmatprep.subr.bf16.mxu0 %v10848_v56 }
 0x2ea   : > { %8156 = vmatmul.mubr.f32.vlgmr.msra.gmra.mrb[16].mxu0 %v11330_v59 }
 0x2eb   : > { %9358 = vmatpush3.bf16.msra.mxu0 %v10848_v56  ;;  %8158 = vmatprep.mubr.f32.mxu0 %v11346_v3 }
 0x2ec   : > { %9360 = vmatprep.subr.bf16.mxu0 %v11094_v52 }
 0x2ee   : > { %8159 = vmatmul.mubr.f32.gmra.mrb[18].mxu0 %v11343_v33 }
 0x2ef   : > { %9362 = vmatpush3.bf16.msra.mxu0 %v11094_v52  ;;  %8161 = vmatprep.mubr.f32.mxu0 %v11366_v5 }
 0x2f0   : > { %9364 = vmatprep.subr.bf16.mxu0 %v11102_v41 }
 0x2f2   : > { %8162 = vmatmul.mubr.f32.gmra.mrb[20].mxu0 %v11362_v16 }
 0x2f3   : > { %9366 = vmatpush3.bf16.msra.mxu0 %v11102_v41  ;;  %8164 = vmatprep.mubr.f32.mxu0 %v11386_v46 }
 0x2f4   : > { %9368 = vmatprep.subr.bf16.mxu0 %v10852_v14 }
 0x2f6   : > { %8165 = vmatmul.mubr.f32.gmra.mrb[22].mxu0 %v11382_v62 }
 0x2f7   : > { %9370 = vmatpush3.bf16.msra.mxu0 %v10852_v14  ;;  %8167 = vmatprep.mubr.f32.mxu0 %v11408_v38 }
 0x2f8   : > { %9372 = vmatprep.subr.bf16.mxu0 %v10856_v20 }
 0x2fa   : > { %8168 = vmatmul.mubr.f32.gmra.mrb[24].mxu0 %v11404_v53 }
 0x2fb   : > { %9374 = vmatpush3.bf16.msra.mxu0 %v10856_v20  ;;  %8170 = vmatprep.mubr.f32.mxu0 %v11430_v11 }
 0x2fc   : > { %9376 = vmatprep.subr.bf16.mxu0 %v12913_v42 }
 0x2fe   : > { %8171 = vmatmul.mubr.f32.gmra.mrb[26].mxu0 %v11426_v21 }
 0x2ff   : > { %9378 = vmatpush3.bf16.msra.mxu0 %v12913_v42  ;;  %8173 = vmatprep.mubr.f32.mxu0 %v11452_v34 }
 0x300   : > { %9380 = vmatprep.subr.bf16.mxu0 %v12914_v12 }
 0x302   : > { %8174 = vmatmul.mubr.f32.gmra.mrb[28].mxu0 %v11448_v44 }
 0x303   : > { %9382 = vmatpush3.bf16.msra.mxu0 %v12914_v12  ;;  %8176 = vmatprep.mubr.f32.mxu0 %v11473_v31 }
 0x304   : > { %9384 = vmatprep.subr.bf16.mxu0 %v12915_v7 }
 0x306   : > { %8177 = vmatmul.mubr.f32.gmra.mrb[30].mxu0 %v11470_v18 }
 0x307   : > { %9386 = vmatpush3.bf16.msra.mxu0 %v12915_v7  ;;  %8211 = vmatprep.mubr.f32.mxu0 %v11340_v25  ;;  %v12920_v25 = vand.u32 4294901760, %v11377_v0 }
 0x308   : > { %9388 = vmatprep.subr.bf16.mxu0 %v10582_v39 }
 0x30a   : > { %8212 = vmatmul.mubr.f32.vlgmr.msra.gmra.mrb[16].mxu0 %v11337_v4  ;;  %v12921_v4 = vand.u32 4294901760, %v11371_v57 }
 0x30b   : > { %9390 = vmatpush3.bf16.msra.mxu0 %v10582_v39  ;;  %8214 = vmatprep.mubr.f32.mxu0 %v11357_v60  ;;  %v12922_v60 = vand.u32 4294901760, %v11399_v17 }
 0x30c   : > { %9392 = vmatprep.subr.bf16.mxu0 %v10646_v22 }
 0x30e   : > { %8215 = vmatmul.mubr.f32.gmra.mrb[18].mxu0 %v11354_v61  ;;  %v12923_v61 = vand.u32 4294901760, %v11392_v49 }
 0x30f   : > { %9394 = vmatpush3.bf16.msra.mxu0 %v10646_v22  ;;  %8217 = vmatprep.mubr.f32.mxu0 %v11377_v0  ;;  %v12924_v0 = vand.u32 4294901760, %v11421_v32 }
 0x310   : > { %9396 = vmatprep.subr.bf16.mxu0 %v10660_v23 }
 0x312   : > { %8218 = vmatmul.mubr.f32.gmra.mrb[20].mxu0 %v11371_v57  ;;  %v12926_v57 = vand.u32 4294901760, %v11414_v9 }
 0x313   : > { %9398 = vmatpush3.bf16.msra.mxu0 %v10660_v23  ;;  %8220 = vmatprep.mubr.f32.mxu0 %v11399_v17  ;;  %v12927_v17 = vand.u32 4294901760, %v11443_v55 }
 0x314   : > { %9400 = vmatprep.subr.bf16.mxu0 %v10700_v36 }
 0x316   : > { %8221 = vmatmul.mubr.f32.gmra.mrb[22].mxu0 %v11392_v49  ;;  %v12929_v49 = vand.u32 4294901760, %v11436_v37 }
 0x317   : > { %9402 = vmatpush3.bf16.msra.mxu0 %v10700_v36  ;;  %8223 = vmatprep.mubr.f32.mxu0 %v11421_v32  ;;  %v12930_v32 = vld [vmem:[#allocation6_spill] sm:$0xff] }
 0x318   : > { %9404 = vmatprep.subr.bf16.mxu0 %v12856_v47 }
 0x31a   : > { %8224 = vmatmul.mubr.f32.gmra.mrb[24].mxu0 %v11414_v9 }
 0x31b   : > { %9406 = vmatpush3.bf16.msra.mxu0 %v12856_v47  ;;  %8226 = vmatprep.mubr.f32.mxu0 %v11443_v55  ;;  %v12931_v55 = vld [vmem:[#allocation9_spill] sm:$0xff] }
 0x31c   : > { %9408 = vmatprep.subr.bf16.mxu0 %v12857_v51 }
 0x31e   : > { %8227 = vmatmul.mubr.f32.gmra.mrb[26].mxu0 %v11436_v37 }
 0x31f   : > { %9410 = vmatpush3.bf16.msra.mxu0 %v12857_v51  ;;  %8229 = vmatprep.mubr.f32.mxu0 %v11465_v24 }
 0x320   : > { %9412 = vmatprep.subr.bf16.mxu0 %v12858_v2 }
 0x322   : > { %8230 = vmatmul.mubr.f32.gmra.mrb[28].mxu0 %v11458_v15 }
 0x323   : > { %9414 = vmatpush3.bf16.msra.mxu0 %v12858_v2  ;;  %8232 = vmatprep.mubr.f32.mxu0 %v11485_v35 }
 0x324   : > { %9416 = vmatprep.subr.bf16.mxu0 %v12859_v26 }
 0x326   : > { %8233 = vmatmul.mubr.f32.gmra.mrb[30].mxu0 %v11478_v63 }
 0x327   : > { %9418 = vmatpush3.bf16.msra.mxu0 %v12859_v26  ;;  %8267 = vmatprep.mubr.f32.mxu0 %v12916_v19  ;;  %v12925_v19 = vld [vmem:[#allocation7_spill] sm:$0xff] }
 0x328   : > { %9420 = vmatprep.subr.bf16.mxu0 %v11164_v43 }
 0x32a   : > { %8268 = vmatmul.mubr.f32.vlgmr.msra.gmra.mrb[16].mxu0 %v12917_v13  ;;  %v12928_v13 = vld [vmem:[#allocation5_spill] sm:$0xff] }
 0x32b   : > { %9422 = vmatpush3.bf16.msra.mxu0 %v11164_v43  ;;  %8270 = vmatprep.mubr.f32.mxu0 %v12918_v50 }
 0x32c   : > { %9424 = vmatprep.subr.bf16.mxu0 %v11175_v30 }
 0x32e   : > { %8271 = vmatmul.mubr.f32.gmra.mrb[18].mxu0 %v12919_v29 }
 0x32f   : > { %9426 = vmatpush3.bf16.msra.mxu0 %v11175_v30  ;;  %8273 = vmatprep.mubr.f32.mxu0 %v12920_v25 }
 0x330   : > { %9428 = vmatprep.subr.bf16.mxu0 %v11187_v58 }
 0x332   : > { %8274 = vmatmul.mubr.f32.gmra.mrb[20].mxu0 %v12921_v4 }
 0x333   : > { %9430 = vmatpush3.bf16.msra.mxu0 %v11187_v58  ;;  %8276 = vmatprep.mubr.f32.mxu0 %v12922_v60  ;;  %v12936_v58 = vld [vmem:[#allocation18_spill] sm:$0xff] }
 0x334   : > { %9432 = vmatprep.subr.bf16.mxu0 %v11199_v45 }
 0x336   : > { %8277 = vmatmul.mubr.f32.gmra.mrb[22].mxu0 %v12923_v61 }
 0x337   : > { %9434 = vmatpush3.bf16.msra.mxu0 %v11199_v45  ;;  %8279 = vmatprep.mubr.f32.mxu0 %v12924_v0 }
 0x338   : > { %9436 = vmatprep.subr.bf16.mxu0 %v12925_v19 }
 0x33a   : > { %8280 = vmatmul.mubr.f32.gmra.mrb[24].mxu0 %v12926_v57 }
 0x33b   : > { %9438 = vmatpush3.bf16.msra.mxu0 %v12925_v19  ;;  %8282 = vmatprep.mubr.f32.mxu0 %v12927_v17 }
 0x33c   : > { %9440 = vmatprep.subr.bf16.mxu0 %v12928_v13 }
 0x33e   : > { %8283 = vmatmul.mubr.f32.gmra.mrb[26].mxu0 %v12929_v49 }
 0x33f   : > { %9442 = vmatpush3.bf16.msra.mxu0 %v12928_v13  ;;  %8285 = vmatprep.mubr.f32.mxu0 %v2913_v6 }
 0x340   : > { %9444 = vmatprep.subr.bf16.mxu0 %v12930_v32 }
 0x342   : > { %8286 = vmatmul.mubr.f32.gmra.mrb[28].mxu0 %v2923_v54 }
 0x343   : > { %9446 = vmatpush3.bf16.msra.mxu0 %v12930_v32  ;;  %8288 = vmatprep.mubr.f32.mxu0 %v2933_v27  ;;  %v12935_v32 = vld [vmem:[#allocation13_spill] sm:$0xff] }
 0x344   : > { %9448 = vmatprep.subr.bf16.mxu0 %v12931_v55 }
 0x346   : > { %8289 = vmatmul.mubr.f32.gmra.mrb[30].mxu0 %v2943_v10 }
 0x347   : > { %9450 = vmatpush3.bf16.msra.mxu0 %v12931_v55  ;;  %8323 = vmatprep.mubr.f32.mxu0 %v11333_v28 }
 0x348   : > { %9452 = vmatprep.subr.bf16.mxu0 %v10582_v39 }
 0x34a   : > { %8324 = vmatmul.mubr.f32.vlgmr.msra.gmra.mrb[16].mxu0 %v11330_v59 }
 0x34b   : > { %9454 = vmatpush3.bf16.msra.mxu0 %v10582_v39  ;;  %8326 = vmatprep.mubr.f32.mxu0 %v11346_v3 }
 0x34c   : > { %9456 = vmatprep.subr.bf16.mxu0 %v10646_v22 }
 0x34e   : > { %8327 = vmatmul.mubr.f32.gmra.mrb[18].mxu0 %v11343_v33 }
 0x34f   : > { %9458 = vmatpush3.bf16.msra.mxu0 %v10646_v22  ;;  %8329 = vmatprep.mubr.f32.mxu0 %v11366_v5 }
 0x350   : > { %9460 = vmatprep.subr.bf16.mxu0 %v10660_v23 }
 0x352   : > { %8330 = vmatmul.mubr.f32.gmra.mrb[20].mxu0 %v11362_v16 }
 0x353   : > { %9462 = vmatpush3.bf16.msra.mxu0 %v10660_v23  ;;  %8332 = vmatprep.mubr.f32.mxu0 %v11386_v46 }
 0x354   : > { %9464 = vmatprep.subr.bf16.mxu0 %v10700_v36 }
 0x356   : > { %8333 = vmatmul.mubr.f32.gmra.mrb[22].mxu0 %v11382_v62 }
 0x357   : > { %9466 = vmatpush3.bf16.msra.mxu0 %v10700_v36  ;;  %8335 = vmatprep.mubr.f32.mxu0 %v11408_v38 }
 0x358   : > { %9468 = vmatprep.subr.bf16.mxu0 %v12856_v47 }
 0x35a   : > { %8336 = vmatmul.mubr.f32.gmra.mrb[24].mxu0 %v11404_v53 }
 0x35b   : > { %9470 = vmatpush3.bf16.msra.mxu0 %v12856_v47  ;;  %8338 = vmatprep.mubr.f32.mxu0 %v11430_v11 }
 0x35c   : > { %9472 = vmatprep.subr.bf16.mxu0 %v12857_v51 }
 0x35e   : > { %8339 = vmatmul.mubr.f32.gmra.mrb[26].mxu0 %v11426_v21 }
 0x35f   : > { %9474 = vmatpush3.bf16.msra.mxu0 %v12857_v51  ;;  %8341 = vmatprep.mubr.f32.mxu0 %v11452_v34 }
 0x360   : > { %9476 = vmatprep.subr.bf16.mxu0 %v12858_v2 }
 0x362   : > { %8342 = vmatmul.mubr.f32.gmra.mrb[28].mxu0 %v11448_v44 }
 0x363   : > { %9478 = vmatpush3.bf16.msra.mxu0 %v12858_v2  ;;  %8344 = vmatprep.mubr.f32.mxu0 %v11473_v31 }
 0x364   : > { %9480 = vmatprep.subr.bf16.mxu0 %v12859_v26 }
 0x366   : > { %8345 = vmatmul.mubr.f32.gmra.mrb[30].mxu0 %v11470_v18 }
 0x367   : > { %9482 = vmatpush3.bf16.msra.mxu0 %v12859_v26  ;;  %8379 = vmatprep.mubr.f32.mxu0 %v11333_v28 }
 0x36a   : > { %8380 = vmatmul.mubr.f32.vlgmr.msra.gmra.mrb[16].mxu0 %v11330_v59 }
 0x36b   : > { %8382 = vmatprep.mubr.f32.mxu0 %v11346_v3 }
 0x36e   : > { %8383 = vmatmul.mubr.f32.gmra.mrb[18].mxu0 %v11343_v33 }
 0x36f   : > { %8385 = vmatprep.mubr.f32.mxu0 %v11366_v5 }
 0x372   : > { %8386 = vmatmul.mubr.f32.gmra.mrb[20].mxu0 %v11362_v16 }
 0x373   : > { %8388 = vmatprep.mubr.f32.mxu0 %v11386_v46 }
 0x376   : > { %8389 = vmatmul.mubr.f32.gmra.mrb[22].mxu0 %v11382_v62 }
 0x377   : > { %8391 = vmatprep.mubr.f32.mxu0 %v11408_v38 }
 0x37a   : > { %8392 = vmatmul.mubr.f32.gmra.mrb[24].mxu0 %v11404_v53 }
 0x37b   : > { %8394 = vmatprep.mubr.f32.mxu0 %v11430_v11 }
 0x37e   : > { %8395 = vmatmul.mubr.f32.gmra.mrb[26].mxu0 %v11426_v21 }
 0x37f   : > { %8397 = vmatprep.mubr.f32.mxu0 %v11452_v34 }
 0x382   : > { %8398 = vmatmul.mubr.f32.gmra.mrb[28].mxu0 %v11448_v44 }
 0x383   : > { %8400 = vmatprep.mubr.f32.mxu0 %v11473_v31 }
 0x386   : > { %8401 = vmatmul.mubr.f32.gmra.mrb[30].mxu0 %v11470_v18 }
 0x43d   : > { %v8381_v24 = vpop.f32.mrb[16].mxu0 }
 0x43e   : > { %v9915_v59 = vadd.f32 %v8381_v24, %v11326_v40  ;;  %v3902_v28 = vpop.f32.mrb[17].mxu0 }
 0x43f   : > { %v9916_v33 = vadd.f32 %v11326_v40, %v3902_v28 }
 0x440   : > { %v3997_v3 = vmax.f32 %v9915_v59, 0.0 }
 0x441   : > { %v3996_v16 = vmax.f32 %v9916_v33, 0.0  ;;  %v8384_v5 = vpop.f32.mrb[18].mxu0 }
 0x442   : > { %v11665_v11 = vand.u32 4294901760, %v3997_v3  ;;  %v9917_v38 = vadd.f32 %v8384_v5, %v11326_v40  ;;  %v3914_v34 = vpop.f32.mrb[19].mxu0 }
 0x443   : > { %v11668_v62 = vand.u32 4294901760, %v3996_v16  ;;  %v9918_v9 = vadd.f32 %v11326_v40, %v3914_v34 }
 0x444   : > { %v11672_v18 = vsub.f32 %v3997_v3, %v11665_v11  ;;  %v3999_v46 = vmax.f32 %v9917_v38, 0.0 }
 0x445   : > { %v11675_v53 = vsub.f32 %v3996_v16, %v11668_v62  ;;  %v3998_v37 = vmax.f32 %v9918_v9, 0.0  ;;  %v8387_v21 = vpop.f32.mrb[20].mxu0 }
 0x446   : > { %v12766_v15 = vand.u32 4294901760, %v11672_v18  ;;  %v11678_v44 = vand.u32 4294901760, %v3999_v46  ;;  %v9919_v6 = vadd.f32 %v8387_v21, %v11326_v40  ;;  %v3926_v10 = vpop.f32.mrb[21].mxu0 }
 0x447   : > { %v11681_v54 = vand.u32 4294901760, %v3998_v37  ;;  %v9920_v31 = vadd.f32 %v11326_v40, %v3926_v10  ;;  %v12767_v63 = vand.u32 4294901760, %v11675_v53 }
 0x448   : > { %v4106_v35 = vsub.f32 %v11672_v18, %v12766_v15  ;;  %v11689_v27 = vsub.f32 %v3999_v46, %v11678_v44  ;;  %v4001_v50 = vmax.f32 %v9919_v6, 0.0 }
 0x449   : > { %v11692_v29 = vsub.f32 %v3998_v37, %v11681_v54  ;;  %v4000_v25 = vmax.f32 %v9920_v31, 0.0  ;;  %v8390_v4 = vpop.f32.mrb[22].mxu0  ;;  %v4096_v60 = vsub.f32 %v11675_v53, %v12767_v63 }
 0x44a   : > { %v11697_v61 = vand.u32 4294901760, %v4001_v50  ;;  %v9921_v0 = vadd.f32 %v8390_v4, %v11326_v40  ;;  %v3938_v57 = vpop.f32.mrb[23].mxu0  ;;  %v12762_v17 = vand.u32 4294901760, %v11689_v27  ;;  %v4107_v33 = vand.u32 4294901760, %v4106_v35 }
 0x44b   : > { %v11701_v49 = vand.u32 4294901760, %v4000_v25  ;;  %v9922_v24 = vadd.f32 %v11326_v40, %v3938_v57  ;;  %v4097_v59 = vand.u32 4294901760, %v4096_v60  ;;  %v12765_v28 = vand.u32 4294901760, %v11692_v29  ;;  %v12933_v57 = vld [vmem:[#allocation24_spill] sm:$0xff] }
 0x44c   : > { %v11706_v3 = vsub.f32 %v4001_v50, %v11697_v61  ;;  %v4003_v16 = vmax.f32 %v9921_v0, 0.0  ;;  %v4126_v5 = vsub.f32 %v11689_v27, %v12762_v17  ;;  %v12932_v50 = vld [vmem:[#allocation8_spill] sm:$0xff] }
 0x44d   : > { %v11712_v38 = vsub.f32 %v4000_v25, %v11701_v49  ;;  %v4002_v34 = vmax.f32 %v9922_v24, 0.0  ;;  %v8393_v9 = vpop.f32.mrb[24].mxu0  ;;  %8435 = vmatprep.mubr.f32.mxu1 %v4097_v59  ;;  %v4116_v46 = vsub.f32 %v11692_v29, %v12765_v28  ;;  %v12934_v28 = vld [vmem:[#allocation25_spill] sm:$0xff] }
 0x44e   : > { %v11717_v37 = vand.u32 4294901760, %v4003_v16  ;;  %v9923_v21 = vadd.f32 %v8393_v9, %v11326_v40  ;;  %v3950_v6 = vpop.f32.mrb[25].mxu0  ;;  %8436 = vmatmul.mubr.f32.vlgmr.msra.gmra.mrb[32].mxu1 %v4107_v33  ;;  %v12763_v10 = vand.u32 4294901760, %v11706_v3  ;;  %v4127_v24 = vand.u32 4294901760, %v4126_v5 }
 0x44f   : > { %v11721_v31 = vand.u32 4294901760, %v4002_v34  ;;  %v9924_v35 = vadd.f32 %v11326_v40, %v3950_v6  ;;  %9518 = vmatpush3.bf16.msra.mxu1 %v12932_v50  ;;  %v4117_v25 = vand.u32 4294901760, %v4116_v46  ;;  %v12764_v4 = vand.u32 4294901760, %v11712_v38 }
 0x450   : > { %v11727_v60 = vsub.f32 %v4003_v16, %v11717_v37  ;;  %v4005_v0 = vmax.f32 %v9923_v21, 0.0  ;;  %9520 = vmatprep.subr.bf16.mxu1 %v12933_v57  ;;  %v4146_v59 = vsub.f32 %v11706_v3, %v12763_v10 }
 0x451   : > { %v11734_v33 = vsub.f32 %v4002_v34, %v11721_v31  ;;  %v4004_v9 = vmax.f32 %v9924_v35, 0.0  ;;  %v8396_v6 = vpop.f32.mrb[26].mxu0  ;;  %8438 = vmatprep.mubr.f32.mxu1 %v4117_v25  ;;  %v4136_v46 = vsub.f32 %v11712_v38, %v12764_v4 }
 0x452   : > { %v11739_v16 = vand.u32 4294901760, %v4005_v0  ;;  %v9925_v21 = vadd.f32 %v8396_v6, %v11326_v40  ;;  %v3962_v50 = vpop.f32.mrb[27].mxu0  ;;  %8439 = vmatmul.mubr.f32.gmra.mrb[34].mxu1 %v4127_v24  ;;  %v12769_v5 = vand.u32 4294901760, %v11727_v60  ;;  %v4147_v6 = vand.u32 4294901760, %v4146_v59 }
 0x453   : > { %v11743_v17 = vand.u32 4294901760, %v4004_v9  ;;  %v9926_v34 = vadd.f32 %v11326_v40, %v3962_v50  ;;  %9522 = vmatpush3.bf16.msra.mxu1 %v12933_v57  ;;  %v4137_v35 = vand.u32 4294901760, %v4136_v46  ;;  %v12770_v25 = vand.u32 4294901760, %v11734_v33 }
 0x454   : > { %v11749_v10 = vsub.f32 %v4005_v0, %v11739_v16  ;;  %v4007_v4 = vmax.f32 %v9925_v21, 0.0  ;;  %9524 = vmatprep.subr.bf16.mxu1 %v12934_v28  ;;  %v4166_v24 = vsub.f32 %v11727_v60, %v12769_v5 }
 0x455   : > { %v11756_v15 = vsub.f32 %v4004_v9, %v11743_v17  ;;  %v4006_v50 = vmax.f32 %v9926_v34, 0.0  ;;  %v8399_v63 = vpop.f32.mrb[28].mxu0  ;;  %8441 = vmatprep.mubr.f32.mxu1 %v4137_v35  ;;  %v4156_v57 = vsub.f32 %v11734_v33, %v12770_v25 }
 0x456   : > { %v11761_v0 = vand.u32 4294901760, %v4007_v4  ;;  %v9927_v46 = vadd.f32 %v8399_v63, %v11326_v40  ;;  %v3974_v21 = vpop.f32.mrb[29].mxu0  ;;  %8442 = vmatmul.mubr.f32.gmra.mrb[36].mxu1 %v4147_v6  ;;  %v12776_v59 = vand.u32 4294901760, %v11749_v10  ;;  %v4167_v63 = vand.u32 4294901760, %v4166_v24 }
 0x457   : > { %v11765_v55 = vand.u32 4294901760, %v4006_v50  ;;  %v9928_v9 = vadd.f32 %v11326_v40, %v3974_v21  ;;  %9526 = vmatpush3.bf16.msra.mxu1 %v12934_v28  ;;  %v4157_v34 = vand.u32 4294901760, %v4156_v57  ;;  %v12777_v35 = vand.u32 4294901760, %v11756_v15 }
 0x458   : > { %v11771_v5 = vsub.f32 %v4007_v4, %v11761_v0  ;;  %v4009_v25 = vmax.f32 %v9927_v46, 0.0  ;;  %9528 = vmatprep.subr.bf16.mxu1 %v12935_v32  ;;  %v4186_v6 = vsub.f32 %v11749_v10, %v12776_v59 }
 0x459   : > { %v11778_v13 = vsub.f32 %v4006_v50, %v11765_v55  ;;  %v4008_v21 = vmax.f32 %v9928_v9, 0.0  ;;  %v8402_v19 = vpop.f32.mrb[30].mxu0  ;;  %8444 = vmatprep.mubr.f32.mxu1 %v4157_v34  ;;  %v4176_v28 = vsub.f32 %v11756_v15, %v12777_v35 }
 0x45a   : > { %v11783_v4 = vand.u32 4294901760, %v4009_v25  ;;  %v9929_v57 = vadd.f32 %v8402_v19, %v11326_v40  ;;  %v3986_v46 = vpop.f32.mrb[31].mxu0  ;;  %8445 = vmatmul.mubr.f32.gmra.mrb[38].mxu1 %v4167_v63  ;;  %v12782_v24 = vand.u32 4294901760, %v11771_v5  ;;  %v4187_v19 = vand.u32 4294901760, %v4186_v6 }
 0x45b   : > { %v11787_v45 = vand.u32 4294901760, %v4008_v21  ;;  %v9930_v50 = vadd.f32 %v11326_v40, %v3986_v46  ;;  %9530 = vmatpush3.bf16.msra.mxu1 %v12935_v32  ;;  %v4177_v9 = vand.u32 4294901760, %v4176_v28  ;;  %v4195_v34 = vand.u32 4294901760, %v11778_v13 }
 0x45c   : > { %v11793_v59 = vsub.f32 %v4009_v25, %v11783_v4  ;;  %v4011_v35 = vmax.f32 %v9929_v57, 0.0  ;;  %9532 = vmatprep.subr.bf16.mxu1 %v12936_v58  ;;  %v4206_v63 = vsub.f32 %v11771_v5, %v12782_v24 }
 0x45d   : > { %v11800_v30 = vsub.f32 %v4008_v21, %v11787_v45  ;;  %v4010_v40 = vmax.f32 %v9930_v50, 0.0  ;;  %8447 = vmatprep.mubr.f32.mxu1 %v4177_v9  ;;  %v4196_v32 = vsub.f32 %v11778_v13, %v4195_v34 }
 0x45e   : > { %v11805_v28 = vand.u32 4294901760, %v4011_v35  ;;  %8448 = vmatmul.mubr.f32.gmra.mrb[40].mxu1 %v4187_v19  ;;  %v4225_v25 = vand.u32 4294901760, %v11793_v59  ;;  %v4207_v50 = vand.u32 4294901760, %v4206_v63 }
 0x45f   : > { %v11808_v57 = vand.u32 4294901760, %v4010_v40  ;;  %9534 = vmatpush3.bf16.msra.mxu1 %v12936_v58  ;;  %v4197_v6 = vand.u32 4294901760, %v4196_v32  ;;  %v4215_v46 = vand.u32 4294901760, %v11800_v30 }
 0x460   : > { %v11813_v21 = vsub.f32 %v4011_v35, %v11805_v28  ;;  %9536 = vmatprep.subr.bf16.mxu1 %v10822_v1  ;;  %v4226_v9 = vsub.f32 %v11793_v59, %v4225_v25 }
 0x461   : > { %v11820_v19 = vsub.f32 %v4010_v40, %v11808_v57  ;;  %8450 = vmatprep.mubr.f32.mxu1 %v4197_v6  ;;  %v4216_v58 = vsub.f32 %v11800_v30, %v4215_v46 }
 0x462   : > { %8451 = vmatmul.mubr.f32.gmra.mrb[42].mxu1 %v4207_v50  ;;  %v4245_v32 = vand.u32 4294901760, %v11813_v21  ;;  %v4227_v24 = vand.u32 4294901760, %v4226_v9 }
 0x463   : > { %9538 = vmatpush3.bf16.msra.mxu1 %v10822_v1  ;;  %v4217_v35 = vand.u32 4294901760, %v4216_v58  ;;  %v4235_v63 = vand.u32 4294901760, %v11820_v19 }
 0x464   : > { %9540 = vmatprep.subr.bf16.mxu1 %v10836_v8  ;;  %v4246_v40 = vsub.f32 %v11813_v21, %v4245_v32 }
 0x465   : > { %8453 = vmatprep.mubr.f32.mxu1 %v4217_v35  ;;  %v4236_v6 = vsub.f32 %v11820_v19, %v4235_v63 }
 0x466   : > { %8454 = vmatmul.mubr.f32.gmra.mrb[44].mxu1 %v4227_v24  ;;  %v4247_v1 = vand.u32 4294901760, %v4246_v40  ;;  %v11926_v40 = vld [vmem:[%s12670_s2 + $0x30] sm:$0xff] }
 0x467   : > { %9542 = vmatpush3.bf16.msra.mxu1 %v10836_v8  ;;  %v4237_v50 = vand.u32 4294901760, %v4236_v6  ;;  %v11872_v8 = vld [vmem:[%s12670_s2] sm:$0xff]  ;;  %v11931_v6 = vld [vmem:[%s12670_s2 + $0x38] sm:$0xff] }
 0x468   : > { %9544 = vmatprep.subr.bf16.mxu1 %v10844_v48 }
 0x469   : > { %8456 = vmatprep.mubr.f32.mxu1 %v4237_v50 }
 0x46a   : > { %8457 = vmatmul.mubr.f32.gmra.mrb[46].mxu1 %v4247_v1  ;;  %v12786_v1 = vand.u32 4294901760, %v11926_v40 }
 0x46b   : > { %9546 = vmatpush3.bf16.msra.mxu1 %v10844_v48  ;;  %8491 = vmatprep.mubr.f32.mxu1 %v11668_v62  ;;  %v11877_v48 = vld [vmem:[%s12670_s2 + $0x8] sm:$0xff] }
 0x46c   : > { %9548 = vmatprep.subr.bf16.mxu1 %v10848_v56 }
 0x46e   : > { %8492 = vmatmul.mubr.f32.vlgmr.msra.gmra.mrb[32].mxu1 %v11665_v11 }
 0x46f   : > { %9550 = vmatpush3.bf16.msra.mxu1 %v10848_v56  ;;  %8494 = vmatprep.mubr.f32.mxu1 %v11681_v54  ;;  %v11882_v56 = vld [vmem:[%s12670_s2 + $0x10] sm:$0xff] }
 0x470   : > { %9552 = vmatprep.subr.bf16.mxu1 %v11094_v52 }
 0x472   : > { %8495 = vmatmul.mubr.f32.gmra.mrb[34].mxu1 %v11678_v44 }
 0x473   : > { %9554 = vmatpush3.bf16.msra.mxu1 %v11094_v52  ;;  %8497 = vmatprep.mubr.f32.mxu1 %v11701_v49  ;;  %v11891_v52 = vld [vmem:[%s12670_s2 + $0x18] sm:$0xff] }
 0x474   : > { %9556 = vmatprep.subr.bf16.mxu1 %v11102_v41 }
 0x476   : > { %8498 = vmatmul.mubr.f32.gmra.mrb[36].mxu1 %v11697_v61 }
 0x477   : > { %9558 = vmatpush3.bf16.msra.mxu1 %v11102_v41  ;;  %8500 = vmatprep.mubr.f32.mxu1 %v11721_v31  ;;  %v12788_v41 = vand.u32 4294901760, %v11882_v56 }
 0x478   : > { %9560 = vmatprep.subr.bf16.mxu1 %v10852_v14 }
 0x47a   : > { %8501 = vmatmul.mubr.f32.gmra.mrb[38].mxu1 %v11717_v37 }
 0x47b   : > { %9562 = vmatpush3.bf16.msra.mxu1 %v10852_v14  ;;  %8503 = vmatprep.mubr.f32.mxu1 %v11743_v17  ;;  %v5315_v14 = vand.u32 4294901760, %v11872_v8 }
 0x47c   : > { %9564 = vmatprep.subr.bf16.mxu1 %v10856_v20 }
 0x47e   : > { %8504 = vmatmul.mubr.f32.gmra.mrb[40].mxu1 %v11739_v16 }
 0x47f   : > { %9566 = vmatpush3.bf16.msra.mxu1 %v10856_v20  ;;  %8506 = vmatprep.mubr.f32.mxu1 %v11765_v55  ;;  %v12789_v20 = vand.u32 4294901760, %v11877_v48 }
 0x480   : > { %9568 = vmatprep.subr.bf16.mxu1 %v12913_v42 }
 0x481   : > { %v11910_v24 = vpack.c.bf16 %v12789_v20, %v5315_v14  ;;  %v12941_v20 = vand.u32 4294901760, %v11689_v27 }
 0x482   : > { %8507 = vmatmul.mubr.f32.gmra.mrb[42].mxu1 %v11761_v0 }
 0x483   : > { %9570 = vmatpush3.bf16.msra.mxu1 %v12913_v42  ;;  %8509 = vmatprep.mubr.f32.mxu1 %v11787_v45  ;;  %v11897_v42 = vld [vmem:[%s12670_s2 + $0x20] sm:$0xff] }
 0x484   : > { %9572 = vmatprep.subr.bf16.mxu1 %v12914_v12  ;;  %v12787_v58 = vand.u32 4294901760, %v11897_v42  ;;  %9676 = vmatprep.subr.bf16.mxu0 %v11910_v24 }
 0x485   : > { %9678 = vmatpush3.bf16.msra.mxu0 %v11910_v24 }
 0x486   : > { %8510 = vmatmul.mubr.f32.gmra.mrb[44].mxu1 %v11783_v4 }
 0x487   : > { %9574 = vmatpush3.bf16.msra.mxu1 %v12914_v12  ;;  %8512 = vmatprep.mubr.f32.mxu1 %v11808_v57  ;;  %v11902_v12 = vld [vmem:[%s12670_s2 + $0x28] sm:$0xff] }
 0x488   : > { %9576 = vmatprep.subr.bf16.mxu1 %v12915_v7  ;;  %v12784_v35 = vand.u32 4294901760, %v11902_v12 }
 0x48a   : > { %8513 = vmatmul.mubr.f32.gmra.mrb[46].mxu1 %v11805_v28  ;;  %v11942_v50 = vpack.c.bf16 %v12784_v35, %v12787_v58  ;;  %v12939_v58 = vand.u32 4294901760, %v11692_v29 }
 0x48b   : > { %9578 = vmatpush3.bf16.msra.mxu1 %v12915_v7  ;;  %8547 = vmatprep.mubr.f32.mxu1 %v11675_v53  ;;  %v12783_v7 = vand.u32 4294901760, %v11891_v52 }
 0x48c   : > { %9580 = vmatprep.subr.bf16.mxu1 %v10582_v39 }
 0x48d   : > { %v11917_v9 = vpack.c.bf16 %v12783_v7, %v12788_v41  ;;  %v12785_v7 = vand.u32 4294901760, %v11931_v6  ;;  %v12940_v41 = vld [vmem:[#allocation2_spill] sm:$0xff] }
 0x48e   : > { %8548 = vmatmul.mubr.f32.vlgmr.msra.gmra.mrb[32].mxu1 %v11672_v18 }
 0x48f   : > { %9582 = vmatpush3.bf16.msra.mxu1 %v10582_v39  ;;  %8550 = vmatprep.mubr.f32.mxu1 %v11692_v29  ;;  %v11956_v35 = vpack.c.bf16 %v12785_v7, %v12786_v1  ;;  %v12937_v7 = vand.u32 4294901760, %v11675_v53  ;;  %v12938_v1 = vand.u32 4294901760, %v11672_v18  ;;  %v12942_v53 = vand.u32 4294901760, %v11712_v38  ;;  %v12946_v29 = vld [vmem:[#allocation4_spill] sm:$0xff] }
 0x490   : > { %9584 = vmatprep.subr.bf16.mxu1 %v10646_v22  ;;  %9680 = vmatprep.subr.bf16.mxu0 %v11917_v9  ;;  %v12944_v18 = vand.u32 4294901760, %v11706_v3 }
 0x491   : > { %9682 = vmatpush3.bf16.msra.mxu0 %v11917_v9 }
 0x492   : > { %8551 = vmatmul.mubr.f32.gmra.mrb[34].mxu1 %v11689_v27  ;;  %9684 = vmatprep.subr.bf16.mxu0 %v11942_v50  ;;  %v12947_v27 = vand.u32 4294901760, %v11727_v60 }
 0x493   : > { %9586 = vmatpush3.bf16.msra.mxu1 %v10646_v22  ;;  %8553 = vmatprep.mubr.f32.mxu1 %v11712_v38  ;;  %v12948_v38 = vand.u32 4294901760, %v11756_v15 }
 0x494   : > { %9588 = vmatprep.subr.bf16.mxu1 %v10660_v23 }
 0x495   : > { %9686 = vmatpush3.bf16.msra.mxu0 %v11942_v50 }
 0x496   : > { %8554 = vmatmul.mubr.f32.gmra.mrb[36].mxu1 %v11706_v3  ;;  %9688 = vmatprep.subr.bf16.mxu0 %v11956_v35  ;;  %v12950_v3 = vand.u32 4294901760, %v11749_v10 }
 0x497   : > { %9590 = vmatpush3.bf16.msra.mxu1 %v10660_v23  ;;  %8556 = vmatprep.mubr.f32.mxu1 %v11734_v33 }
 0x498   : > { %9592 = vmatprep.subr.bf16.mxu1 %v10700_v36 }
 0x499   : > { %9690 = vmatpush3.bf16.msra.mxu0 %v11956_v35 }
 0x49a   : > { %8557 = vmatmul.mubr.f32.gmra.mrb[38].mxu1 %v11727_v60  ;;  %v12952_v60 = vand.u32 4294901760, %v11771_v5 }
 0x49b   : > { %9594 = vmatpush3.bf16.msra.mxu1 %v10700_v36  ;;  %8559 = vmatprep.mubr.f32.mxu1 %v11756_v15  ;;  %v12953_v15 = vld [vmem:[#allocation6_spill] sm:$0xff] }
 0x49c   : > { %9596 = vmatprep.subr.bf16.mxu1 %v12856_v47 }
 0x49e   : > { %8560 = vmatmul.mubr.f32.gmra.mrb[40].mxu1 %v11749_v10  ;;  %v223_v10 = vld [vmem:[%s12670_s2 + $0x78] sm:$0xff] }
 0x49f   : > { %9598 = vmatpush3.bf16.msra.mxu1 %v12856_v47  ;;  %8562 = vmatprep.mubr.f32.mxu1 %v11778_v13  ;;  %v12954_v13 = vld [vmem:[#allocation9_spill] sm:$0xff] }
 0x4a0   : > { %9600 = vmatprep.subr.bf16.mxu1 %v12857_v51 }
 0x4a2   : > { %8563 = vmatmul.mubr.f32.gmra.mrb[42].mxu1 %v11771_v5 }
 0x4a3   : > { %9602 = vmatpush3.bf16.msra.mxu1 %v12857_v51  ;;  %8565 = vmatprep.mubr.f32.mxu1 %v11800_v30 }
 0x4a4   : > { %9604 = vmatprep.subr.bf16.mxu1 %v12858_v2 }
 0x4a6   : > { %8566 = vmatmul.mubr.f32.gmra.mrb[44].mxu1 %v11793_v59 }
 0x4a7   : > { %9606 = vmatpush3.bf16.msra.mxu1 %v12858_v2  ;;  %8568 = vmatprep.mubr.f32.mxu1 %v11820_v19 }
 0x4a8   : > { %9608 = vmatprep.subr.bf16.mxu1 %v12859_v26 }
 0x4aa   : > { %8569 = vmatmul.mubr.f32.gmra.mrb[46].mxu1 %v11813_v21 }
 0x4ab   : > { %9610 = vmatpush3.bf16.msra.mxu1 %v12859_v26  ;;  %8603 = vmatprep.mubr.f32.mxu1 %v12937_v7  ;;  %v12943_v7 = vld [vmem:[#allocation3_spill] sm:$0xff] }
 0x4ac   : > { %9612 = vmatprep.subr.bf16.mxu1 %v11164_v43 }
 0x4ae   : > { %8604 = vmatmul.mubr.f32.vlgmr.msra.gmra.mrb[32].mxu1 %v12938_v1 }
 0x4af   : > { %9614 = vmatpush3.bf16.msra.mxu1 %v11164_v43  ;;  %8606 = vmatprep.mubr.f32.mxu1 %v12939_v58  ;;  %v12945_v43 = vand.u32 4294901760, %v11734_v33  ;;  %v12951_v33 = vld [vmem:[#allocation5_spill] sm:$0xff] }
 0x4b0   : > { %9616 = vmatprep.subr.bf16.mxu1 %v12940_v41 }
 0x4b2   : > { %8607 = vmatmul.mubr.f32.gmra.mrb[34].mxu1 %v12941_v20  ;;  %v12949_v20 = vld [vmem:[#allocation7_spill] sm:$0xff] }
 0x4b3   : > { %9618 = vmatpush3.bf16.msra.mxu1 %v12940_v41  ;;  %8609 = vmatprep.mubr.f32.mxu1 %v12942_v53 }
 0x4b4   : > { %9620 = vmatprep.subr.bf16.mxu1 %v12943_v7 }
 0x4b6   : > { %8610 = vmatmul.mubr.f32.gmra.mrb[36].mxu1 %v12944_v18 }
 0x4b7   : > { %9622 = vmatpush3.bf16.msra.mxu1 %v12943_v7  ;;  %8612 = vmatprep.mubr.f32.mxu1 %v12945_v43 }
 0x4b8   : > { %9624 = vmatprep.subr.bf16.mxu1 %v12946_v29 }
 0x4ba   : > { %8613 = vmatmul.mubr.f32.gmra.mrb[38].mxu1 %v12947_v27 }
 0x4bb   : > { %9626 = vmatpush3.bf16.msra.mxu1 %v12946_v29  ;;  %8615 = vmatprep.mubr.f32.mxu1 %v12948_v38 }
 0x4bc   : > { %9628 = vmatprep.subr.bf16.mxu1 %v12949_v20 }
 0x4be   : > { %8616 = vmatmul.mubr.f32.gmra.mrb[40].mxu1 %v12950_v3 }
 0x4bf   : > { %9630 = vmatpush3.bf16.msra.mxu1 %v12949_v20  ;;  %8618 = vmatprep.mubr.f32.mxu1 %v4195_v34 }
 0x4c0   : > { %9632 = vmatprep.subr.bf16.mxu1 %v12951_v33 }
 0x4c2   : > { %8619 = vmatmul.mubr.f32.gmra.mrb[42].mxu1 %v12952_v60 }
 0x4c3   : > { %9634 = vmatpush3.bf16.msra.mxu1 %v12951_v33  ;;  %8621 = vmatprep.mubr.f32.mxu1 %v4215_v46 }
 0x4c4   : > { %9636 = vmatprep.subr.bf16.mxu1 %v12953_v15 }
 0x4c6   : > { %8622 = vmatmul.mubr.f32.gmra.mrb[44].mxu1 %v4225_v25 }
 0x4c7   : > { %9638 = vmatpush3.bf16.msra.mxu1 %v12953_v15  ;;  %8624 = vmatprep.mubr.f32.mxu1 %v4235_v63 }
 0x4c8   : > { %9640 = vmatprep.subr.bf16.mxu1 %v12954_v13 }
 0x4ca   : > { %8625 = vmatmul.mubr.f32.gmra.mrb[46].mxu1 %v4245_v32 }
 0x4cb   : > { %9642 = vmatpush3.bf16.msra.mxu1 %v12954_v13  ;;  %8659 = vmatprep.mubr.f32.mxu1 %v11668_v62 }
 0x4cc   : > { %9644 = vmatprep.subr.bf16.mxu1 %v10582_v39 }
 0x4ce   : > { %8660 = vmatmul.mubr.f32.vlgmr.msra.gmra.mrb[32].mxu1 %v11665_v11 }
 0x4cf   : > { %9646 = vmatpush3.bf16.msra.mxu1 %v10582_v39  ;;  %8662 = vmatprep.mubr.f32.mxu1 %v11681_v54  ;;  %v216_v39 = vld [vmem:[%s12670_s2 + $0x40] sm:$0xff] }
 0x4d0   : > { %9648 = vmatprep.subr.bf16.mxu1 %v10646_v22 }
 0x4d2   : > { %8663 = vmatmul.mubr.f32.gmra.mrb[34].mxu1 %v11678_v44 }
 0x4d3   : > { %9650 = vmatpush3.bf16.msra.mxu1 %v10646_v22  ;;  %8665 = vmatprep.mubr.f32.mxu1 %v11701_v49  ;;  %v217_v22 = vld [vmem:[%s12670_s2 + $0x48] sm:$0xff] }
 0x4d4   : > { %9652 = vmatprep.subr.bf16.mxu1 %v10660_v23 }
 0x4d6   : > { %8666 = vmatmul.mubr.f32.gmra.mrb[36].mxu1 %v11697_v61 }
 0x4d7   : > { %9654 = vmatpush3.bf16.msra.mxu1 %v10660_v23  ;;  %8668 = vmatprep.mubr.f32.mxu1 %v11721_v31  ;;  %v5339_v23 = vand.u32 4294901760, %v216_v39 }
 0x4d8   : > { %9656 = vmatprep.subr.bf16.mxu1 %v10700_v36 }
 0x4d9   : > { %v12139_v46 = vsub.f32 %v216_v39, %v5339_v23 }
 0x4da   : > { %8669 = vmatmul.mubr.f32.gmra.mrb[38].mxu1 %v11717_v37 }
 0x4db   : > { %9658 = vmatpush3.bf16.msra.mxu1 %v10700_v36  ;;  %8671 = vmatprep.mubr.f32.mxu1 %v11743_v17  ;;  %v5342_v36 = vand.u32 4294901760, %v217_v22  ;;  %12961 = vst [vmem:[#allocation16_spill] sm:$0xff] %v12139_v46  ;;  %v12797_v19 = vand.u32 4294901760, %v12139_v46 }
 0x4dc   : > { %9660 = vmatprep.subr.bf16.mxu1 %v12856_v47 }
 0x4dd   : > { %v12084_v30 = vpack.c.bf16 %v5342_v36, %v5339_v23  ;;  %v12141_v21 = vsub.f32 %v217_v22, %v5342_v36  ;;  %v5615_v63 = vsub.f32 %v12139_v46, %v12797_v19 }
 0x4de   : > { %8672 = vmatmul.mubr.f32.gmra.mrb[40].mxu1 %v11739_v16 }
 0x4df   : > { %9662 = vmatpush3.bf16.msra.mxu1 %v12856_v47  ;;  %8674 = vmatprep.mubr.f32.mxu1 %v11765_v55  ;;  %v218_v47 = vld [vmem:[%s12670_s2 + $0x50] sm:$0xff]  ;;  %12962 = vst [vmem:[#allocation17_spill] sm:$0xff] %v12141_v21  ;;  %v12796_v32 = vand.u32 4294901760, %v12141_v21  ;;  %v5616_v41 = vand.u32 4294901760, %v5615_v63  ;;  %v12971_v63 = vand.u32 4294901760, %v11897_v42 }
 0x4e0   : > { %9664 = vmatprep.subr.bf16.mxu1 %v12857_v51  ;;  %9692 = vmatprep.subr.bf16.mxu0 %v12084_v30 }
 0x4e1   : > { %9694 = vmatpush3.bf16.msra.mxu0 %v12084_v30 }
 0x4e2   : > { %8675 = vmatmul.mubr.f32.gmra.mrb[42].mxu1 %v11761_v0 }
 0x4e3   : > { %9666 = vmatpush3.bf16.msra.mxu1 %v12857_v51  ;;  %8677 = vmatprep.mubr.f32.mxu1 %v11787_v45  ;;  %v219_v51 = vld [vmem:[%s12670_s2 + $0x58] sm:$0xff] }
 0x4e4   : > { %9668 = vmatprep.subr.bf16.mxu1 %v12858_v2 }
 0x4e6   : > { %8678 = vmatmul.mubr.f32.gmra.mrb[44].mxu1 %v11783_v4 }
 0x4e7   : > { %9670 = vmatpush3.bf16.msra.mxu1 %v12858_v2  ;;  %8680 = vmatprep.mubr.f32.mxu1 %v11808_v57  ;;  %v5345_v2 = vand.u32 4294901760, %v218_v47 }
 0x4e8   : > { %9672 = vmatprep.subr.bf16.mxu1 %v12859_v26 }
 0x4ea   : > { %8681 = vmatmul.mubr.f32.gmra.mrb[46].mxu1 %v11805_v28 }
 0x4eb   : > { %9674 = vmatpush3.bf16.msra.mxu1 %v12859_v26  ;;  %8715 = vmatprep.mubr.f32.mxu1 %v11668_v62  ;;  %v5348_v26 = vand.u32 4294901760, %v219_v51 }
 0x4ee   : > { %8716 = vmatmul.mubr.f32.vlgmr.msra.gmra.mrb[32].mxu1 %v11665_v11  ;;  %v221_v11 = vld [vmem:[%s12670_s2 + $0x68] sm:$0xff] }
 0x4ef   : > { %8718 = vmatprep.mubr.f32.mxu1 %v11681_v54 }
 0x4f2   : > { %8719 = vmatmul.mubr.f32.gmra.mrb[34].mxu1 %v11678_v44  ;;  %v5354_v44 = vand.u32 4294901760, %v221_v11 }
 0x4f3   : > { %8721 = vmatprep.mubr.f32.mxu1 %v11701_v49 }
 0x4f4   : > { %v12165_v29 = vsub.f32 %v221_v11, %v5354_v44 }
 0x4f6   : > { %8722 = vmatmul.mubr.f32.gmra.mrb[36].mxu1 %v11697_v61  ;;  %v12109_v61 = vsub.f32 %v11872_v8, %v5315_v14  ;;  %v12148_v8 = vsub.f32 %v218_v47, %v5345_v2  ;;  %v5622_v14 = vsub.f32 %v12141_v21, %v12796_v32  ;;  %12966 = vst [vmem:[#allocation22_spill] sm:$0xff] %v12165_v29  ;;  %v12792_v33 = vand.u32 4294901760, %v12165_v29 }
 0x4f7   : > { %8724 = vmatprep.mubr.f32.mxu1 %v11721_v31 }
 0x4f8   : > { %12957 = vst [vmem:[#allocation12_spill] sm:$0xff] %v12109_v61  ;;  %v12806_v5 = vand.u32 4294901760, %v12109_v61  ;;  %12963 = vst [vmem:[#allocation19_spill] sm:$0xff] %v12148_v8  ;;  %v12795_v58 = vand.u32 4294901760, %v12148_v8  ;;  %v5623_v53 = vand.u32 4294901760, %v5622_v14  ;;  %v5650_v13 = vsub.f32 %v12165_v29, %v12792_v33 }
 0x4f9   : > { %v12228_v14 = vsub.f32 %v11897_v42, %v12971_v63 }
 0x4fa   : > { %8725 = vmatmul.mubr.f32.gmra.mrb[38].mxu1 %v11717_v37  ;;  %v222_v37 = vld [vmem:[%s12670_s2 + $0x70] sm:$0xff]  ;;  %v5629_v7 = vsub.f32 %v12148_v8, %v12795_v58  ;;  %v12167_v27 = vpack.c.bf16 %v5623_v53, %v5616_v41  ;;  %v5651_v36 = vand.u32 4294901760, %v5650_v13  ;;  %v12972_v41 = vand.u32 4294901760, %v11902_v12 }
 0x4fb   : > { %8727 = vmatprep.mubr.f32.mxu1 %v11743_v17  ;;  %v12958_v17 = vand.u32 4294901760, %v11877_v48  ;;  %v5357_v31 = vand.u32 4294901760, %v222_v37 }
 0x4fc   : > { %v5630_v38 = vand.u32 4294901760, %v5629_v7  ;;  %v12233_v53 = vsub.f32 %v11902_v12, %v12972_v41 }
 0x4fd   : > { %v12114_v49 = vsub.f32 %v11877_v48, %v12958_v17  ;;  %v12150_v48 = vsub.f32 %v219_v51, %v5348_v26  ;;  %v12179_v39 = vsub.f32 %v222_v37, %v5357_v31  ;;  %v12201_v37 = vpack.c.bf16 %v12141_v21, %v12139_v46 }
 0x4fe   : > { %8728 = vmatmul.mubr.f32.gmra.mrb[40].mxu1 %v11739_v16  ;;  %v5360_v16 = vand.u32 4294901760, %v223_v10 }
 0x4ff   : > { %8730 = vmatprep.mubr.f32.mxu1 %v11765_v55  ;;  %v220_v55 = vld [vmem:[%s12670_s2 + $0x60] sm:$0xff]  ;;  %12959 = vst [vmem:[#allocation14_spill] sm:$0xff] %v12114_v49  ;;  %12964 = vst [vmem:[#allocation20_spill] sm:$0xff] %v12150_v48  ;;  %v12794_v1 = vand.u32 4294901760, %v12150_v48  ;;  %v12791_v47 = vand.u32 4294901760, %v12179_v39  ;;  %v12197_v17 = vpack.c.bf16 %v12114_v49, %v12109_v61 }
 0x500   : > { %v5351_v62 = vand.u32 4294901760, %v220_v55  ;;  %v12126_v59 = vpack.c.bf16 %v5360_v16, %v5357_v31  ;;  %12967 = vst [vmem:[#allocation23_spill] sm:$0xff] %v12179_v39  ;;  %v12181_v22 = vsub.f32 %v223_v10, %v5360_v16  ;;  %v12205_v10 = vpack.c.bf16 %v12150_v48, %v12148_v8 }
 0x501   : > { %v5636_v18 = vsub.f32 %v12150_v48, %v12794_v1 }
 0x502   : > { %8731 = vmatmul.mubr.f32.gmra.mrb[42].mxu1 %v11761_v0  ;;  %v12104_v54 = vpack.c.bf16 %v5354_v44, %v5351_v62  ;;  %v12804_v0 = vand.u32 4294901760, %v12114_v49  ;;  %12960 = vst [vmem:[#allocation15_spill] sm:$0xff] %v12126_v59  ;;  %v12163_v43 = vsub.f32 %v220_v55, %v5351_v62  ;;  %12968 = vst [vmem:[#allocation8_spill] sm:$0xff] %v12181_v22  ;;  %v12790_v51 = vand.u32 4294901760, %v12181_v22 }
 0x503   : > { %8733 = vmatprep.mubr.f32.mxu1 %v11787_v45  ;;  %v12094_v45 = vpack.c.bf16 %v5348_v26, %v5345_v2  ;;  %v5637_v20 = vand.u32 4294901760, %v5636_v18  ;;  %v5657_v26 = vsub.f32 %v12179_v39, %v12791_v47  ;;  %v12213_v16 = vpack.c.bf16 %v12181_v22, %v12179_v39 }
 0x504   : > { %12956 = vst [vmem:[#allocation11_spill] sm:$0xff] %v12104_v54  ;;  %v5566_v34 = vsub.f32 %v12114_v49, %v12804_v0  ;;  %12965 = vst [vmem:[#allocation21_spill] sm:$0xff] %v12163_v43  ;;  %v12793_v3 = vand.u32 4294901760, %v12163_v43  ;;  %v5664_v55 = vsub.f32 %v12181_v22, %v12790_v51  ;;  %v12209_v31 = vpack.c.bf16 %v12165_v29, %v12163_v43 }
 0x505   : > { %12955 = vst [vmem:[#allocation10_spill] sm:$0xff] %v12094_v45  ;;  %9696 = vmatprep.subr.bf16.mxu0 %v12094_v45  ;;  %v12171_v60 = vpack.c.bf16 %v5637_v20, %v5630_v38  ;;  %v5658_v11 = vand.u32 4294901760, %v5657_v26  ;;  %v12799_v18 = vand.u32 4294901760, %v12228_v14  ;;  %v12798_v38 = vand.u32 4294901760, %v12233_v53  ;;  %v12242_v20 = vld [vmem:[%s12669_s1 + $0x98] ss:$0 sm:$0xff] }
 0x506   : > { %8734 = vmatmul.mubr.f32.gmra.mrb[44].mxu1 %v11783_v4  ;;  %9698 = vmatpush3.bf16.msra.mxu0 %v12094_v45  ;;  %v5559_v4 = vsub.f32 %v12109_v61, %v12806_v5  ;;  %v5567_v25 = vand.u32 4294901760, %v5566_v34  ;;  %v5643_v15 = vsub.f32 %v12163_v43, %v12793_v3  ;;  %v5665_v62 = vand.u32 4294901760, %v5664_v55 }
 0x507   : > { %8736 = vmatprep.mubr.f32.mxu1 %v11808_v57  ;;  %9700 = vmatprep.subr.bf16.mxu0 %v12104_v54  ;;  %v5587_v26 = vsub.f32 %v12228_v14, %v12799_v18  ;;  %v5594_v55 = vsub.f32 %v12233_v53, %v12798_v38 }
 0x508   : > { %v5644_v23 = vand.u32 4294901760, %v5643_v15  ;;  %v12193_v44 = vpack.c.bf16 %v5665_v62, %v5658_v11 }
 0x509   : > { %v5595_v1 = vand.u32 4294901760, %v5594_v55 }
 0x50a   : > { %8737 = vmatmul.mubr.f32.gmra.mrb[46].mxu1 %v11805_v28  ;;  %9702 = vmatpush3.bf16.msra.mxu0 %v12104_v54  ;;  %v5560_v28 = vand.u32 4294901760, %v5559_v4  ;;  %v12185_v2 = vpack.c.bf16 %v5651_v36, %v5644_v23  ;;  %v12969_v4 = vand.u32 4294901760, %v11882_v56 }
 0x50b   : > { %9704 = vmatprep.subr.bf16.mxu0 %v12126_v59 }
 0x50c   : > { %v12136_v57 = vpack.c.bf16 %v5567_v25, %v5560_v28  ;;  %v12218_v34 = vsub.f32 %v11882_v56, %v12969_v4  ;;  %v12970_v28 = vand.u32 4294901760, %v11891_v52  ;;  %v12973_v4 = vand.u32 4294901760, %v11926_v40 }
 0x50e   : > { %9706 = vmatpush3.bf16.msra.mxu0 %v12126_v59  ;;  %v12223_v25 = vsub.f32 %v11891_v52, %v12970_v28  ;;  %v12801_v7 = vand.u32 4294901760, %v12218_v34  ;;  %v12261_v28 = vsub.f32 %v11926_v40, %v12973_v4  ;;  %v5588_v4 = vand.u32 4294901760, %v5587_v26 }
 0x50f   : > { %9708 = vmatprep.subr.bf16.mxu0 %v12136_v57 }
 0x510   : > { %v12800_v56 = vand.u32 4294901760, %v12223_v25  ;;  %v5573_v13 = vsub.f32 %v12218_v34, %v12801_v7  ;;  %v12296_v18 = vpack.c.bf16 %v5595_v1, %v5588_v4 }
 0x512   : > { %v5580_v23 = vsub.f32 %v12223_v25, %v12800_v56  ;;  %v5574_v47 = vand.u32 4294901760, %v5573_v13 }
 0x514   : > { %v5581_v33 = vand.u32 4294901760, %v5580_v23 }
 0x5c1   : > { %v8717_v52 = vpop.f32.mrb[32].mxu1 }
 0x5c2   : > { %v9931_v42 = vadd.f32 %v12242_v20, %v8717_v52  ;;  %v5204_v15 = vpop.f32.mrb[33].mxu1 }
 0x5c3   : > { %v9932_v12 = vadd.f32 %v12242_v20, %v5204_v15 }
 0x5c4   : > { %v5299_v36 = vmax.f32 %v9931_v42, 0.0  ;;  %v12974_v42 = vand.u32 4294901760, %v11931_v6 }
 0x5c5   : > { %v5298_v11 = vmax.f32 %v9932_v12, 0.0  ;;  %v8720_v62 = vpop.f32.mrb[34].mxu1 }
 0x5c6   : > { %v12263_v63 = vand.u32 4294901760, %v5299_v36  ;;  %v9933_v41 = vadd.f32 %v12242_v20, %v8720_v62  ;;  %v5216_v52 = vpop.f32.mrb[35].mxu1  ;;  %v12269_v15 = vsub.f32 %v11931_v6, %v12974_v42  ;;  %v12805_v6 = vand.u32 4294901760, %v12261_v28 }
 0x5c7   : > { %v12271_v51 = vand.u32 4294901760, %v5298_v11  ;;  %v9934_v12 = vadd.f32 %v12242_v20, %v5216_v52 }
 0x5c8   : > { %v12275_v3 = vsub.f32 %v5299_v36, %v12263_v63  ;;  %v5301_v40 = vmax.f32 %v9933_v41, 0.0  ;;  %v12808_v36 = vand.u32 4294901760, %v12269_v15 }
 0x5c9   : > { %v12278_v62 = vsub.f32 %v5298_v11, %v12271_v51  ;;  %v5300_v58 = vmax.f32 %v9934_v12, 0.0  ;;  %v8723_v32 = vpop.f32.mrb[36].mxu1  ;;  %v9711_v11 = vpack.c.bf16 %v5581_v33, %v5574_v47  ;;  %v5601_v33 = vsub.f32 %v12261_v28, %v12805_v6 }
 0x5ca   : > { %v12802_v42 = vand.u32 4294901760, %v12275_v3  ;;  %v12282_v19 = vand.u32 4294901760, %v5301_v40  ;;  %v9935_v13 = vadd.f32 %v12242_v20, %v8723_v32  ;;  %v5228_v23 = vpop.f32.mrb[37].mxu1 }
 0x5cb   : > { %v12286_v52 = vand.u32 4294901760, %v5300_v58  ;;  %v9936_v26 = vadd.f32 %v12242_v20, %v5228_v23  ;;  %v12803_v55 = vand.u32 4294901760, %v12278_v62 }
 0x5cc   : > { %v5408_v41 = vsub.f32 %v12275_v3, %v12802_v42  ;;  %v12294_v12 = vsub.f32 %v5301_v40, %v12282_v19  ;;  %v5303_v38 = vmax.f32 %v9935_v13, 0.0 }
 0x5cd   : > { %v12299_v32 = vsub.f32 %v5300_v58, %v12286_v52  ;;  %v5302_v56 = vmax.f32 %v9936_v26, 0.0  ;;  %v8726_v7 = vpop.f32.mrb[38].mxu1  ;;  %v5398_v23 = vsub.f32 %v12278_v62, %v12803_v55  ;;  %v5608_v58 = vsub.f32 %v12269_v15, %v12808_v36 }
 0x5ce   : > { %v12307_v47 = vand.u32 4294901760, %v5303_v38  ;;  %v9937_v40 = vadd.f32 %v12242_v20, %v8726_v7  ;;  %v5240_v13 = vpop.f32.mrb[39].mxu1  ;;  %v12811_v1 = vand.u32 4294901760, %v12294_v12  ;;  %v5409_v0 = vand.u32 4294901760, %v5408_v41 }
 0x5cf   : > { %v12314_v4 = vand.u32 4294901760, %v5302_v56  ;;  %v9938_v26 = vadd.f32 %v12242_v20, %v5240_v13  ;;  %v5399_v42 = vand.u32 4294901760, %v5398_v23  ;;  %v12813_v55 = vand.u32 4294901760, %v12299_v32 }
 0x5d0   : > { %v12319_v6 = vsub.f32 %v5303_v38, %v12307_v47  ;;  %v5305_v5 = vmax.f32 %v9937_v40, 0.0  ;;  %v5428_v7 = vsub.f32 %v12294_v12, %v12811_v1  ;;  %v5602_v13 = vand.u32 4294901760, %v5601_v33 }
 0x5d1   : > { %v12325_v22 = vsub.f32 %v5302_v56, %v12314_v4  ;;  %v5304_v36 = vmax.f32 %v9938_v26, 0.0  ;;  %v8729_v39 = vpop.f32.mrb[40].mxu1  ;;  %8771 = vmatprep.mubr.f32.mxu0 %v5399_v42  ;;  %v5418_v23 = vsub.f32 %v12299_v32, %v12813_v55  ;;  %v5609_v1 = vand.u32 4294901760, %v5608_v58 }
 0x5d2   : > { %v12330_v41 = vand.u32 4294901760, %v5305_v5  ;;  %v9939_v38 = vadd.f32 %v12242_v20, %v8729_v39  ;;  %v5252_v40 = vpop.f32.mrb[41].mxu1  ;;  %8772 = vmatmul.mubr.f32.vlgmr.msra.gmra.mrb[32].mxu0 %v5409_v0  ;;  %v12816_v29 = vand.u32 4294901760, %v12319_v6  ;;  %v5429_v39 = vand.u32 4294901760, %v5428_v7 }
 0x5d3   : > { %v12334_v43 = vand.u32 4294901760, %v5304_v36  ;;  %v9940_v56 = vadd.f32 %v12242_v20, %v5252_v40  ;;  %9710 = vmatpush3.bf16.msra.mxu0 %v12136_v57  ;;  %v5419_v42 = vand.u32 4294901760, %v5418_v23  ;;  %v12818_v26 = vand.u32 4294901760, %v12325_v22 }
 0x5d4   : > { %v12340_v33 = vsub.f32 %v5305_v5, %v12330_v41  ;;  %v5307_v55 = vmax.f32 %v9939_v38, 0.0  ;;  %9712 = vmatprep.subr.bf16.mxu0 %v9711_v11  ;;  %v5448_v0 = vsub.f32 %v12319_v6, %v12816_v29  ;;  %v9719_v7 = vpack.c.bf16 %v5609_v1, %v5602_v13 }
 0x5d5   : > { %v12346_v58 = vsub.f32 %v5304_v36, %v12334_v43  ;;  %v5306_v48 = vmax.f32 %v9940_v56, 0.0  ;;  %v8732_v40 = vpop.f32.mrb[42].mxu1  ;;  %8774 = vmatprep.mubr.f32.mxu0 %v5419_v42  ;;  %v5438_v57 = vsub.f32 %v12325_v22, %v12818_v26 }
 0x5d6   : > { %v12351_v23 = vand.u32 4294901760, %v5307_v55  ;;  %v9941_v5 = vadd.f32 %v12242_v20, %v8732_v40  ;;  %v5264_v38 = vpop.f32.mrb[43].mxu1  ;;  %8775 = vmatmul.mubr.f32.gmra.mrb[34].mxu0 %v5429_v39  ;;  %v12820_v8 = vand.u32 4294901760, %v12340_v33  ;;  %v5449_v40 = vand.u32 4294901760, %v5448_v0 }
 0x5d7   : > { %v12355_v29 = vand.u32 4294901760, %v5306_v48  ;;  %v9942_v36 = vadd.f32 %v12242_v20, %v5264_v38  ;;  %9714 = vmatpush3.bf16.msra.mxu0 %v9711_v11  ;;  %v5439_v56 = vand.u32 4294901760, %v5438_v57  ;;  %v12821_v42 = vand.u32 4294901760, %v12346_v58 }
 0x5d8   : > { %v12360_v21 = vsub.f32 %v5307_v55, %v12351_v23  ;;  %v5309_v26 = vmax.f32 %v9941_v5, 0.0  ;;  %9716 = vmatprep.subr.bf16.mxu0 %v12296_v18  ;;  %v5468_v1 = vsub.f32 %v12340_v33, %v12820_v8 }
 0x5d9   : > { %v12367_v13 = vsub.f32 %v5306_v48, %v12355_v29  ;;  %v5308_v39 = vmax.f32 %v9942_v36, 0.0  ;;  %v8735_v38 = vpop.f32.mrb[44].mxu1  ;;  %8777 = vmatprep.mubr.f32.mxu0 %v5439_v56  ;;  %v5458_v11 = vsub.f32 %v12346_v58, %v12821_v42 }
 0x5da   : > { %v12372_v55 = vand.u32 4294901760, %v5309_v26  ;;  %v9943_v57 = vadd.f32 %v12242_v20, %v8735_v38  ;;  %v5276_v5 = vpop.f32.mrb[45].mxu1  ;;  %8778 = vmatmul.mubr.f32.gmra.mrb[36].mxu0 %v5449_v40  ;;  %v12826_v0 = vand.u32 4294901760, %v12360_v21  ;;  %v5469_v49 = vand.u32 4294901760, %v5468_v1 }
 0x5db   : > { %v12376_v46 = vand.u32 4294901760, %v5308_v39  ;;  %v9944_v48 = vadd.f32 %v12242_v20, %v5276_v5  ;;  %9718 = vmatpush3.bf16.msra.mxu0 %v12296_v18  ;;  %v5459_v36 = vand.u32 4294901760, %v5458_v11  ;;  %v12827_v56 = vand.u32 4294901760, %v12367_v13 }
 0x5dc   : > { %v12382_v8 = vsub.f32 %v5309_v26, %v12372_v55  ;;  %v5311_v42 = vmax.f32 %v9943_v57, 0.0  ;;  %9720 = vmatprep.subr.bf16.mxu0 %v9719_v7  ;;  %v5488_v40 = vsub.f32 %v12360_v21, %v12826_v0 }
 0x5dd   : > { %v12388_v38 = vsub.f32 %v5308_v39, %v12376_v46  ;;  %v5310_v61 = vmax.f32 %v9944_v48, 0.0  ;;  %v8738_v5 = vpop.f32.mrb[46].mxu1  ;;  %8780 = vmatprep.mubr.f32.mxu0 %v5459_v36  ;;  %v5478_v18 = vsub.f32 %v12367_v13, %v12827_v56 }
 0x5de   : > { %v12393_v11 = vand.u32 4294901760, %v5311_v42  ;;  %v9945_v26 = vadd.f32 %v12242_v20, %v8738_v5  ;;  %v5288_v57 = vpop.f32.mrb[47].mxu1  ;;  %8781 = vmatmul.mubr.f32.gmra.mrb[38].mxu0 %v5469_v49  ;;  %v5507_v1 = vand.u32 4294901760, %v12382_v8  ;;  %v5489_v54 = vand.u32 4294901760, %v5488_v40 }
 0x5df   : > { %v12397_v59 = vand.u32 4294901760, %v5310_v61  ;;  %v9946_v39 = vadd.f32 %v12242_v20, %v5288_v57  ;;  %9722 = vmatpush3.bf16.msra.mxu0 %v9719_v7  ;;  %v5479_v48 = vand.u32 4294901760, %v5478_v18  ;;  %v5497_v36 = vand.u32 4294901760, %v12388_v38 }
 0x5e0   : > { %v12402_v0 = vsub.f32 %v5311_v42, %v12393_v11  ;;  %v5313_v56 = vmax.f32 %v9945_v26, 0.0  ;;  %9724 = vmatprep.subr.bf16.mxu0 %v12167_v27  ;;  %v5508_v49 = vsub.f32 %v12382_v8, %v5507_v1 }
 0x5e1   : > { %v12409_v5 = vsub.f32 %v5310_v61, %v12397_v59  ;;  %v5312_v45 = vmax.f32 %v9946_v39, 0.0  ;;  %8783 = vmatprep.mubr.f32.mxu0 %v5479_v48  ;;  %v5498_v20 = vsub.f32 %v12388_v38, %v5497_v36 }
 0x5e2   : > { %v12414_v7 = vand.u32 4294901760, %v5313_v56  ;;  %8784 = vmatmul.mubr.f32.gmra.mrb[40].mxu0 %v5489_v54  ;;  %v5527_v42 = vand.u32 4294901760, %v12402_v0  ;;  %v5509_v57 = vand.u32 4294901760, %v5508_v49 }
 0x5e3   : > { %v12417_v18 = vand.u32 4294901760, %v5312_v45  ;;  %9726 = vmatpush3.bf16.msra.mxu0 %v12167_v27  ;;  %v5499_v40 = vand.u32 4294901760, %v5498_v20  ;;  %v5517_v26 = vand.u32 4294901760, %v12409_v5 }
 0x5e4   : > { %v12422_v61 = vsub.f32 %v5313_v56, %v12414_v7  ;;  %9728 = vmatprep.subr.bf16.mxu0 %v12171_v60  ;;  %v5528_v39 = vsub.f32 %v12402_v0, %v5527_v42 }
 0x5e5   : > { %v12429_v54 = vsub.f32 %v5312_v45, %v12417_v18  ;;  %8786 = vmatprep.mubr.f32.mxu0 %v5499_v40  ;;  %v5518_v27 = vsub.f32 %v12409_v5, %v5517_v26 }
 0x5e6   : > { %8787 = vmatmul.mubr.f32.gmra.mrb[42].mxu0 %v5509_v57  ;;  %v5547_v48 = vand.u32 4294901760, %v12422_v61  ;;  %v5529_v20 = vand.u32 4294901760, %v5528_v39  ;;  %v9743_v39 = vpack.c.bf16 %v12223_v25, %v12218_v34 }
 0x5e7   : > { %9730 = vmatpush3.bf16.msra.mxu0 %v12171_v60  ;;  %v5519_v56 = vand.u32 4294901760, %v5518_v27  ;;  %v5537_v49 = vand.u32 4294901760, %v12429_v54  ;;  %v12980_v27 = vld [vmem:[#allocation14_spill] sm:$0xff] }
 0x5e8   : > { %9732 = vmatprep.subr.bf16.mxu0 %v12185_v2  ;;  %v5548_v45 = vsub.f32 %v12422_v61, %v5547_v48 }
 0x5e9   : > { %8789 = vmatprep.mubr.f32.mxu0 %v5519_v56  ;;  %v5538_v40 = vsub.f32 %v12429_v54, %v5537_v49  ;;  %v12981_v56 = vand.u32 4294901760, %v12980_v27  ;;  %v12993_v27 = vand.u32 4294901760, %v12319_v6 }
 0x5ea   : > { %8790 = vmatmul.mubr.f32.gmra.mrb[44].mxu0 %v5529_v20  ;;  %v5549_v60 = vand.u32 4294901760, %v5548_v45  ;;  %v12982_v45 = vand.u32 4294901760, %v12278_v62 }
 0x5eb   : > { %9734 = vmatpush3.bf16.msra.mxu0 %v12185_v2  ;;  %v5539_v57 = vand.u32 4294901760, %v5538_v40  ;;  %v9747_v2 = vpack.c.bf16 %v12233_v53, %v12228_v14  ;;  %v12983_v40 = vand.u32 4294901760, %v12218_v34  ;;  %v12990_v34 = vand.u32 4294901760, %v12325_v22 }
 0x5ec   : > { %9736 = vmatprep.subr.bf16.mxu0 %v12193_v44 }
 0x5ed   : > { %8792 = vmatprep.mubr.f32.mxu0 %v5539_v57  ;;  %v12984_v57 = vand.u32 4294901760, %v12223_v25  ;;  %v12992_v25 = vand.u32 4294901760, %v12269_v15 }
 0x5ee   : > { %8793 = vmatmul.mubr.f32.gmra.mrb[46].mxu0 %v5549_v60 }
 0x5ef   : > { %9738 = vmatpush3.bf16.msra.mxu0 %v12193_v44  ;;  %8827 = vmatprep.mubr.f32.mxu0 %v12271_v51  ;;  %v9751_v44 = vpack.c.bf16 %v12269_v15, %v12261_v28  ;;  %v9807_v60 = vpack.c.bf16 %v12984_v57, %v12983_v40  ;;  %v13001_v15 = vld [vmem:[#allocation19_spill] sm:$0xff]  ;;  %v13003_v40 = vld [vmem:[#allocation20_spill] sm:$0xff] }
 0x5f0   : > { %9740 = vmatprep.subr.bf16.mxu0 %v12197_v17  ;;  %v13004_v57 = vand.u32 4294901760, %v13003_v40 }
 0x5f2   : > { %8828 = vmatmul.mubr.f32.vlgmr.msra.gmra.mrb[32].mxu0 %v12263_v63 }
 0x5f3   : > { %9742 = vmatpush3.bf16.msra.mxu0 %v12197_v17  ;;  %8830 = vmatprep.mubr.f32.mxu0 %v12286_v52  ;;  %v12975_v17 = vld [vmem:[#allocation10_spill] sm:$0xff] }
 0x5f4   : > { %9744 = vmatprep.subr.bf16.mxu0 %v9743_v39 }
 0x5f6   : > { %8831 = vmatmul.mubr.f32.gmra.mrb[34].mxu0 %v12282_v19 }
 0x5f7   : > { %9746 = vmatpush3.bf16.msra.mxu0 %v9743_v39  ;;  %8833 = vmatprep.mubr.f32.mxu0 %v12314_v4  ;;  %v12985_v39 = vand.u32 4294901760, %v12275_v3 }
 0x5f8   : > { %9748 = vmatprep.subr.bf16.mxu0 %v9747_v2 }
 0x5fa   : > { %8834 = vmatmul.mubr.f32.gmra.mrb[36].mxu0 %v12307_v47 }
 0x5fb   : > { %9750 = vmatpush3.bf16.msra.mxu0 %v9747_v2  ;;  %8836 = vmatprep.mubr.f32.mxu0 %v12334_v43  ;;  %v12986_v2 = vand.u32 4294901760, %v12299_v32 }
 0x5fc   : > { %9752 = vmatprep.subr.bf16.mxu0 %v9751_v44 }
 0x5fe   : > { %8837 = vmatmul.mubr.f32.gmra.mrb[38].mxu0 %v12330_v41 }
 0x5ff   : > { %9754 = vmatpush3.bf16.msra.mxu0 %v9751_v44  ;;  %8839 = vmatprep.mubr.f32.mxu0 %v12355_v29  ;;  %v12987_v44 = vand.u32 4294901760, %v12228_v14  ;;  %v12994_v14 = vand.u32 4294901760, %v12346_v58 }
 0x600   : > { %9756 = vmatprep.subr.bf16.mxu0 %v12201_v37 }
 0x602   : > { %8840 = vmatmul.mubr.f32.gmra.mrb[40].mxu0 %v12351_v23 }
 0x603   : > { %9758 = vmatpush3.bf16.msra.mxu0 %v12201_v37  ;;  %8842 = vmatprep.mubr.f32.mxu0 %v12376_v46  ;;  %v12976_v37 = vld [vmem:[#allocation11_spill] sm:$0xff] }
 0x604   : > { %9760 = vmatprep.subr.bf16.mxu0 %v12205_v10 }
 0x606   : > { %8843 = vmatmul.mubr.f32.gmra.mrb[42].mxu0 %v12372_v55 }
 0x607   : > { %9762 = vmatpush3.bf16.msra.mxu0 %v12205_v10  ;;  %8845 = vmatprep.mubr.f32.mxu0 %v12397_v59  ;;  %v12977_v10 = vld [vmem:[#allocation15_spill] sm:$0xff] }
 0x608   : > { %9764 = vmatprep.subr.bf16.mxu0 %v12209_v31 }
 0x60a   : > { %8846 = vmatmul.mubr.f32.gmra.mrb[44].mxu0 %v12393_v11 }
 0x60b   : > { %9766 = vmatpush3.bf16.msra.mxu0 %v12209_v31  ;;  %8848 = vmatprep.mubr.f32.mxu0 %v12417_v18  ;;  %v12978_v31 = vld [vmem:[#allocation12_spill] sm:$0xff] }
 0x60c   : > { %9768 = vmatprep.subr.bf16.mxu0 %v12213_v16 }
 0x60e   : > { %8849 = vmatmul.mubr.f32.gmra.mrb[46].mxu0 %v12414_v7 }
 0x60f   : > { %9770 = vmatpush3.bf16.msra.mxu0 %v12213_v16  ;;  %8883 = vmatprep.mubr.f32.mxu0 %v12278_v62  ;;  %v12979_v16 = vand.u32 4294901760, %v12978_v31  ;;  %v12988_v31 = vand.u32 4294901760, %v12233_v53  ;;  %v12995_v53 = vld [vmem:[#allocation16_spill] sm:$0xff] }
 0x610   : > { %9772 = vmatprep.subr.bf16.mxu0 %v11910_v24 }
 0x611   : > { %v9803_v20 = vpack.c.bf16 %v12981_v56, %v12979_v16  ;;  %v9811_v62 = vpack.c.bf16 %v12988_v31, %v12987_v44  ;;  %v12989_v16 = vand.u32 4294901760, %v12294_v12  ;;  %v12997_v56 = vld [vmem:[#allocation17_spill] sm:$0xff] }
 0x612   : > { %8884 = vmatmul.mubr.f32.vlgmr.msra.gmra.mrb[32].mxu0 %v12275_v3  ;;  %v12991_v3 = vand.u32 4294901760, %v12261_v28  ;;  %v13000_v28 = vand.u32 4294901760, %v12367_v13 }
 0x613   : > { %9774 = vmatpush3.bf16.msra.mxu0 %v11910_v24  ;;  %8886 = vmatprep.mubr.f32.mxu0 %v12299_v32 }
 0x614   : > { %9776 = vmatprep.subr.bf16.mxu0 %v11917_v9  ;;  %v9815_v32 = vpack.c.bf16 %v12992_v25, %v12991_v3 }
 0x616   : > { %8887 = vmatmul.mubr.f32.gmra.mrb[34].mxu0 %v12294_v12  ;;  %v12996_v12 = vand.u32 4294901760, %v12995_v53 }
 0x617   : > { %9778 = vmatpush3.bf16.msra.mxu0 %v11917_v9  ;;  %8889 = vmatprep.mubr.f32.mxu0 %v12325_v22 }
 0x618   : > { %9780 = vmatprep.subr.bf16.mxu0 %v11942_v50 }
 0x61a   : > { %8890 = vmatmul.mubr.f32.gmra.mrb[36].mxu0 %v12319_v6  ;;  %v13002_v6 = vand.u32 4294901760, %v13001_v15 }
 0x61b   : > { %9782 = vmatpush3.bf16.msra.mxu0 %v11942_v50  ;;  %8892 = vmatprep.mubr.f32.mxu0 %v12346_v58 }
 0x61c   : > { %9784 = vmatprep.subr.bf16.mxu0 %v11956_v35  ;;  %v9823_v58 = vpack.c.bf16 %v13004_v57, %v13002_v6 }
 0x61e   : > { %8893 = vmatmul.mubr.f32.gmra.mrb[38].mxu0 %v12340_v33 }
 0x61f   : > { %9786 = vmatpush3.bf16.msra.mxu0 %v11956_v35  ;;  %8895 = vmatprep.mubr.f32.mxu0 %v12367_v13 }
 0x620   : > { %9788 = vmatprep.subr.bf16.mxu0 %v12084_v30 }
 0x622   : > { %8896 = vmatmul.mubr.f32.gmra.mrb[40].mxu0 %v12360_v21 }
 0x623   : > { %9790 = vmatpush3.bf16.msra.mxu0 %v12084_v30  ;;  %8898 = vmatprep.mubr.f32.mxu0 %v12388_v38 }
 0x624   : > { %9792 = vmatprep.subr.bf16.mxu0 %v12975_v17 }
 0x626   : > { %8899 = vmatmul.mubr.f32.gmra.mrb[42].mxu0 %v12382_v8 }
 0x627   : > { %9794 = vmatpush3.bf16.msra.mxu0 %v12975_v17  ;;  %8901 = vmatprep.mubr.f32.mxu0 %v12409_v5 }
 0x628   : > { %9796 = vmatprep.subr.bf16.mxu0 %v12976_v37 }
 0x62a   : > { %8902 = vmatmul.mubr.f32.gmra.mrb[44].mxu0 %v12402_v0 }
 0x62b   : > { %9798 = vmatpush3.bf16.msra.mxu0 %v12976_v37  ;;  %8904 = vmatprep.mubr.f32.mxu0 %v12429_v54 }
 0x62c   : > { %9800 = vmatprep.subr.bf16.mxu0 %v12977_v10 }
 0x62e   : > { %8905 = vmatmul.mubr.f32.gmra.mrb[46].mxu0 %v12422_v61 }
 0x62f   : > { %9802 = vmatpush3.bf16.msra.mxu0 %v12977_v10  ;;  %8939 = vmatprep.mubr.f32.mxu0 %v12982_v45  ;;  %v12999_v45 = vand.u32 4294901760, %v12340_v33  ;;  %v13006_v33 = vld [vmem:[#allocation21_spill] sm:$0xff] }
 0x630   : > { %9804 = vmatprep.subr.bf16.mxu0 %v9803_v20 }
 0x632   : > { %8940 = vmatmul.mubr.f32.vlgmr.msra.gmra.mrb[32].mxu0 %v12985_v39  ;;  %v13007_v39 = vand.u32 4294901760, %v13006_v33 }
 0x633   : > { %9806 = vmatpush3.bf16.msra.mxu0 %v9803_v20  ;;  %8942 = vmatprep.mubr.f32.mxu0 %v12986_v2  ;;  %v12998_v20 = vand.u32 4294901760, %v12997_v56  ;;  %v13008_v2 = vld [vmem:[#allocation22_spill] sm:$0xff] }
 0x634   : > { %9808 = vmatprep.subr.bf16.mxu0 %v9807_v60  ;;  %v13009_v44 = vand.u32 4294901760, %v13008_v2 }
 0x635   : > { %v9819_v22 = vpack.c.bf16 %v12998_v20, %v12996_v12 }
 0x636   : > { %8943 = vmatmul.mubr.f32.gmra.mrb[34].mxu0 %v12989_v16  ;;  %v9827_v13 = vpack.c.bf16 %v13009_v44, %v13007_v39 }
 0x637   : > { %9810 = vmatpush3.bf16.msra.mxu0 %v9807_v60  ;;  %8945 = vmatprep.mubr.f32.mxu0 %v12990_v34  ;;  %v13005_v60 = vand.u32 4294901760, %v12360_v21  ;;  %v13010_v21 = vld [vmem:[#allocation23_spill] sm:$0xff] }
 0x638   : > { %9812 = vmatprep.subr.bf16.mxu0 %v9811_v62  ;;  %v13011_v31 = vand.u32 4294901760, %v13010_v21 }
 0x63a   : > { %8946 = vmatmul.mubr.f32.gmra.mrb[36].mxu0 %v12993_v27 }
 0x63b   : > { %9814 = vmatpush3.bf16.msra.mxu0 %v9811_v62  ;;  %8948 = vmatprep.mubr.f32.mxu0 %v12994_v14  ;;  %v13012_v62 = vld [vmem:[#allocation8_spill] sm:$0xff] }
 0x63c   : > { %9816 = vmatprep.subr.bf16.mxu0 %v9815_v32  ;;  %v13013_v16 = vand.u32 4294901760, %v13012_v62 }
 0x63e   : > { %8949 = vmatmul.mubr.f32.gmra.mrb[38].mxu0 %v12999_v45  ;;  %v9831_v38 = vpack.c.bf16 %v13013_v16, %v13011_v31 }
 0x63f   : > { %9818 = vmatpush3.bf16.msra.mxu0 %v9815_v32  ;;  %8951 = vmatprep.mubr.f32.mxu0 %v13000_v28 }
 0x640   : > { %9820 = vmatprep.subr.bf16.mxu0 %v9819_v22 }
 0x642   : > { %8952 = vmatmul.mubr.f32.gmra.mrb[40].mxu0 %v13005_v60 }
 0x643   : > { %9822 = vmatpush3.bf16.msra.mxu0 %v9819_v22  ;;  %8954 = vmatprep.mubr.f32.mxu0 %v5497_v36 }
 0x644   : > { %9824 = vmatprep.subr.bf16.mxu0 %v9823_v58 }
 0x646   : > { %8955 = vmatmul.mubr.f32.gmra.mrb[42].mxu0 %v5507_v1 }
 0x647   : > { %9826 = vmatpush3.bf16.msra.mxu0 %v9823_v58  ;;  %8957 = vmatprep.mubr.f32.mxu0 %v5517_v26 }
 0x648   : > { %9828 = vmatprep.subr.bf16.mxu0 %v9827_v13 }
 0x64a   : > { %8958 = vmatmul.mubr.f32.gmra.mrb[44].mxu0 %v5527_v42 }
 0x64b   : > { %9830 = vmatpush3.bf16.msra.mxu0 %v9827_v13  ;;  %8960 = vmatprep.mubr.f32.mxu0 %v5537_v49 }
 0x64c   : > { %9832 = vmatprep.subr.bf16.mxu0 %v9831_v38 }
 0x64e   : > { %8961 = vmatmul.mubr.f32.gmra.mrb[46].mxu0 %v5547_v48 }
 0x64f   : > { %9834 = vmatpush3.bf16.msra.mxu0 %v9831_v38  ;;  %8995 = vmatprep.mubr.f32.mxu0 %v12271_v51 }
 0x650   : > { %9836 = vmatprep.subr.bf16.mxu0 %v11910_v24 }
 0x652   : > { %8996 = vmatmul.mubr.f32.vlgmr.msra.gmra.mrb[32].mxu0 %v12263_v63 }
 0x653   : > { %9838 = vmatpush3.bf16.msra.mxu0 %v11910_v24  ;;  %8998 = vmatprep.mubr.f32.mxu0 %v12286_v52  ;;  %v6684_v24 = vld [vmem:[%s12670_s2 + $0x80] ss:$0 sm:$0xff] }
 0x654   : > { %9840 = vmatprep.subr.bf16.mxu0 %v11917_v9 }
 0x656   : > { %8999 = vmatmul.mubr.f32.gmra.mrb[34].mxu0 %v12282_v19 }
 0x657   : > { %9842 = vmatpush3.bf16.msra.mxu0 %v11917_v9  ;;  %9001 = vmatprep.mubr.f32.mxu0 %v12314_v4 }
 0x658   : > { %9844 = vmatprep.subr.bf16.mxu0 %v11942_v50 }
 0x65a   : > { %9002 = vmatmul.mubr.f32.gmra.mrb[36].mxu0 %v12307_v47 }
 0x65b   : > { %9846 = vmatpush3.bf16.msra.mxu0 %v11942_v50  ;;  %9004 = vmatprep.mubr.f32.mxu0 %v12334_v43 }
 0x65c   : > { %9848 = vmatprep.subr.bf16.mxu0 %v11956_v35 }
 0x65e   : > { %9005 = vmatmul.mubr.f32.gmra.mrb[38].mxu0 %v12330_v41 }
 0x65f   : > { %9850 = vmatpush3.bf16.msra.mxu0 %v11956_v35  ;;  %9007 = vmatprep.mubr.f32.mxu0 %v12355_v29 }
 0x660   : > { %9852 = vmatprep.subr.bf16.mxu0 %v12084_v30 }
 0x662   : > { %9008 = vmatmul.mubr.f32.gmra.mrb[40].mxu0 %v12351_v23 }
 0x663   : > { %9854 = vmatpush3.bf16.msra.mxu0 %v12084_v30  ;;  %9010 = vmatprep.mubr.f32.mxu0 %v12376_v46 }
 0x664   : > { %9856 = vmatprep.subr.bf16.mxu0 %v12975_v17 }
 0x666   : > { %9011 = vmatmul.mubr.f32.gmra.mrb[42].mxu0 %v12372_v55 }
 0x667   : > { %9858 = vmatpush3.bf16.msra.mxu0 %v12975_v17  ;;  %9013 = vmatprep.mubr.f32.mxu0 %v12397_v59 }
 0x668   : > { %9860 = vmatprep.subr.bf16.mxu0 %v12976_v37 }
 0x66a   : > { %9014 = vmatmul.mubr.f32.gmra.mrb[44].mxu0 %v12393_v11 }
 0x66b   : > { %9862 = vmatpush3.bf16.msra.mxu0 %v12976_v37  ;;  %9016 = vmatprep.mubr.f32.mxu0 %v12417_v18 }
 0x66c   : > { %9864 = vmatprep.subr.bf16.mxu0 %v12977_v10 }
 0x66e   : > { %9017 = vmatmul.mubr.f32.gmra.mrb[46].mxu0 %v12414_v7 }
 0x66f   : > { %9866 = vmatpush3.bf16.msra.mxu0 %v12977_v10  ;;  %9051 = vmatprep.mubr.f32.mxu0 %v12271_v51 }
 0x672   : > { %9052 = vmatmul.mubr.f32.vlgmr.msra.gmra.mrb[32].mxu0 %v12263_v63 }
 0x673   : > { %9054 = vmatprep.mubr.f32.mxu0 %v12286_v52 }
 0x676   : > { %9055 = vmatmul.mubr.f32.gmra.mrb[34].mxu0 %v12282_v19 }
 0x677   : > { %9057 = vmatprep.mubr.f32.mxu0 %v12314_v4 }
 0x67a   : > { %9058 = vmatmul.mubr.f32.gmra.mrb[36].mxu0 %v12307_v47 }
 0x67b   : > { %9060 = vmatprep.mubr.f32.mxu0 %v12334_v43 }
 0x67e   : > { %9061 = vmatmul.mubr.f32.gmra.mrb[38].mxu0 %v12330_v41 }
 0x67f   : > { %9063 = vmatprep.mubr.f32.mxu0 %v12355_v29 }
 0x682   : > { %9064 = vmatmul.mubr.f32.gmra.mrb[40].mxu0 %v12351_v23 }
 0x683   : > { %9066 = vmatprep.mubr.f32.mxu0 %v12376_v46 }
 0x686   : > { %9067 = vmatmul.mubr.f32.gmra.mrb[42].mxu0 %v12372_v55 }
 0x687   : > { %9069 = vmatprep.mubr.f32.mxu0 %v12397_v59 }
 0x68a   : > { %9070 = vmatmul.mubr.f32.gmra.mrb[44].mxu0 %v12393_v11 }
 0x68b   : > { %9072 = vmatprep.mubr.f32.mxu0 %v12417_v18 }
 0x68e   : > { %9073 = vmatmul.mubr.f32.gmra.mrb[46].mxu0 %v12414_v7 }
 0x745   : > { %v9053_v9 = vpop.f32.mrb[32].mxu0 }
 0x746   : > { %v9947_v35 = vadd.f32 %v9053_v9, %v6684_v24  ;;  %v6506_v50 = vpop.f32.mrb[33].mxu0 }
 0x747   : > { %v9948_v30 = vadd.f32 %v6684_v24, %v6506_v50 }
 0x748   : > { %6602 = vst.msk [vmem:[%s12631_s25 + $0x8] sm:$0xff] %vm6600_vm1, %v9947_v35 }
 0x749   : > { %6601 = vst.msk [vmem:[%s12631_s25] sm:$0xff] %vm6600_vm1, %v9948_v30  ;;  %v9056_v59 = vpop.f32.mrb[34].mxu0 }
 0x74a   : > { %v9949_v46 = vadd.f32 %v9056_v59, %v6684_v24  ;;  %v6518_v19 = vpop.f32.mrb[35].mxu0 }
 0x74b   : > { %v9950_v8 = vadd.f32 %v6684_v24, %v6518_v19 }
 0x74c   : > { %6604 = vst.msk [vmem:[%s12631_s25 + $0x18] sm:$0xff] %vm6600_vm1, %v9949_v46 }
 0x74d   : > { %6603 = vst.msk [vmem:[%s12631_s25 + $0x10] sm:$0xff] %vm6600_vm1, %v9950_v8  ;;  %v9059_v43 = vpop.f32.mrb[36].mxu0 }
 0x74e   : > { %v9951_v29 = vadd.f32 %v9059_v43, %v6684_v24  ;;  %v6530_v51 = vpop.f32.mrb[37].mxu0 }
 0x74f   : > { %v9952_v63 = vadd.f32 %v6684_v24, %v6530_v51 }
 0x750   : > { %6606 = vst.msk [vmem:[%s12631_s25 + $0x28] sm:$0xff] %vm6600_vm1, %v9951_v29 }
 0x751   : > { %6605 = vst.msk [vmem:[%s12631_s25 + $0x20] sm:$0xff] %vm6600_vm1, %v9952_v63  ;;  %v9062_v52 = vpop.f32.mrb[38].mxu0 }
 0x752   : > { %v9953_v47 = vadd.f32 %v9062_v52, %v6684_v24  ;;  %v6542_v4 = vpop.f32.mrb[39].mxu0 }
 0x753   : > { %v9954_v41 = vadd.f32 %v6684_v24, %v6542_v4 }
 0x754   : > { %6608 = vst.msk [vmem:[%s12631_s25 + $0x38] sm:$0xff] %vm6600_vm1, %v9953_v47 }
 0x755   : > { %6607 = vst.msk [vmem:[%s12631_s25 + $0x30] sm:$0xff] %vm6600_vm1, %v9954_v41  ;;  %v9065_v23 = vpop.f32.mrb[40].mxu0 }
 0x756   : > { %v9955_v55 = vadd.f32 %v9065_v23, %v6684_v24  ;;  %v6554_v0 = vpop.f32.mrb[41].mxu0 }
 0x757   : > { %v9956_v11 = vadd.f32 %v6684_v24, %v6554_v0 }
 0x758   : > { %6610 = vst.msk [vmem:[%s12631_s25 + $0x48] sm:$0xff] %vm6600_vm1, %v9955_v55 }
 0x759   : > { %6609 = vst.msk [vmem:[%s12631_s25 + $0x40] sm:$0xff] %vm6600_vm1, %v9956_v11  ;;  %v9068_v1 = vpop.f32.mrb[42].mxu0 }
 0x75a   : > { %v9957_v36 = vadd.f32 %v9068_v1, %v6684_v24  ;;  %v6566_v5 = vpop.f32.mrb[43].mxu0 }
 0x75b   : > { %v9958_v7 = vadd.f32 %v6684_v24, %v6566_v5 }
 0x75c   : > { %6612 = vst.msk [vmem:[%s12631_s25 + $0x58] sm:$0xff] %vm6600_vm1, %v9957_v36 }
 0x75d   : > { %6611 = vst.msk [vmem:[%s12631_s25 + $0x50] sm:$0xff] %vm6600_vm1, %v9958_v7  ;;  %v9071_v42 = vpop.f32.mrb[44].mxu0 }
 0x75e   : > { %v9959_v18 = vadd.f32 %v9071_v42, %v6684_v24  ;;  %v6578_v26 = vpop.f32.mrb[45].mxu0 }
 0x75f   : > { %v9960_v61 = vadd.f32 %v6684_v24, %v6578_v26 }
 0x760   : > { %6614 = vst.msk [vmem:[%s12631_s25 + $0x68] sm:$0xff] %vm6600_vm1, %v9959_v18 }
 0x761   : > { %6613 = vst.msk [vmem:[%s12631_s25 + $0x60] sm:$0xff] %vm6600_vm1, %v9960_v61  ;;  %v9074_v54 = vpop.f32.mrb[46].mxu0 }
 0x762   : > { %v9961_v48 = vadd.f32 %v9074_v54, %v6684_v24  ;;  %v6590_v49 = vpop.f32.mrb[47].mxu0 }
 0x763   : > { %v9962_v17 = vadd.f32 %v6684_v24, %v6590_v49 }
 0x764   : > { %6616 = vst.msk [vmem:[%s12631_s25 + $0x78] sm:$0xff] %vm6600_vm1, %v9961_v48 }
 0x765   : > { %6615 = vst.msk [vmem:[%s12631_s25 + $0x70] sm:$0xff] %vm6600_vm1, %v9962_v17 }
 0x766 PF: > { %s13_s12 = sadd.s32 1, %s10362_s12  }
 0x767   : > { %p10_p4 = scmp.ge.s32.totalorder %s13_s12, 4  }
 0x769   :  { %12 = sbr.rel (!%p10_p4) target bundleno = 1 (0x1), region = 62 }

</bundles_post_ra>
